<compile_context>
chip_gen: v7x
topology: tpu7x:2x2x1
jax: 0.10.0
libtpu: 0.0.40
codegen_flags: <defaults>
</compile_context>

<pallas_src>
import functools
import math

import jax
import jax.numpy as jnp
import numpy as np
from jax.experimental import pallas as pl
from jax.experimental.pallas import tpu as pltpu

RB = 256        # output rows per grid step for intermediate 3x3x3 convs
RB_HEAD = 512   # larger block for the fused 1x1+softmax stage (lane-sparse output)


def _round_up(x, m):
    return ((x + m - 1) // m) * m


def _cdiv(a, b):
    return (a + b - 1) // b


def _spec(shape, index_map, *, resident=False):
    """BlockSpec; constant-index-map (resident) operands get single buffering."""
    if resident and hasattr(pl, "Buffered"):
        try:
            return pl.BlockSpec(shape, index_map, pipeline_mode=pl.Buffered(1))
        except TypeError:   # older jax: no pipeline_mode / Buffered — fall back
            pass
    return pl.BlockSpec(shape, index_map)


# ---------------------------------------------------------------------------
# Kernel 1: ConvTranspose3d(kernel=2, stride=2) as one fused matmul.
#   Output columns ordered (a, b, c, cout); caller pixel-shuffles (bf16 copy,
#   fused by XLA into the next stage's prep).
# ---------------------------------------------------------------------------
def _upconv_kernel(x_ref, w_ref, b_ref, o_ref):
    y = jnp.dot(x_ref[...], w_ref[...], preferred_element_type=jnp.float32)
    o_ref[...] = (y + b_ref[...]).astype(o_ref.dtype)


def conv_transpose3d_2x2(x, w, b):
    """x: (N, D, H, W, Cin) NDHWC; w: torch layout (Cin, Cout, 2, 2, 2)."""
    N, D, H, W, Cin = x.shape
    Cout = w.shape[1]
    M = N * D * H * W
    rb = min(_round_up(M, 16), 512)
    Mp = _round_up(M, rb)
    xf = jnp.pad(x.reshape(M, Cin).astype(jnp.bfloat16), ((0, Mp - M), (0, 0)))
    # columns ordered (a, b, c, cout)
    wr = jnp.transpose(w, (0, 2, 3, 4, 1)).reshape(Cin, 8 * Cout).astype(jnp.bfloat16)
    bf = jnp.tile(b.astype(jnp.float32), 8).reshape(1, 8 * Cout)

    cost = pl.CostEstimate(
        flops=2 * Mp * Cin * 8 * Cout,
        transcendentals=0,
        bytes_accessed=Mp * Cin * 2 + Cin * 8 * Cout * 2 + Mp * 8 * Cout * 2,
    )
    out = pl.pallas_call(
        _upconv_kernel,
        out_shape=jax.ShapeDtypeStruct((Mp, 8 * Cout), jnp.bfloat16),
        grid_spec=pltpu.PrefetchScalarGridSpec(
            num_scalar_prefetch=0,
            grid=(Mp // rb,),
            in_specs=[
                pl.BlockSpec((rb, Cin), lambda i: (i, 0)),
                _spec((Cin, 8 * Cout), lambda i: (0, 0), resident=True),
                _spec((1, 8 * Cout), lambda i: (0, 0), resident=True),
            ],
            out_specs=pl.BlockSpec((rb, 8 * Cout), lambda i: (i, 0)),
        ),
        compiler_params=pltpu.CompilerParams(dimension_semantics=("parallel",)),
        cost_estimate=cost,
    )(xf, wr, bf)

    y = out[:M].reshape(N, D, H, W, 2, 2, 2, Cout)
    y = jnp.transpose(y, (0, 1, 4, 2, 5, 3, 6, 7))  # pixel shuffle
    return y.reshape(N, 2 * D, 2 * H, 2 * W, Cout)


# ---------------------------------------------------------------------------
# Kernel 2: Conv3d 3x3x3, pad=1 (+ ReLU), optionally fused with the final
#           1x1x1 conv + channel softmax.
#
# The activation arrives as a flattened, spatially-padded, kw-stacked bf16
# tensor Xf[(n*Dp + d)*Hp*W16 + h*W16 + w, kw*Cin + ci] that stays resident in
# VMEM (single buffer).  For output row block i, tap (kd, kh) reads rows at a
# constant, 16-aligned offset (kd*Hp + kh)*W16 and contributes one
# (rb, 3*Cin) x (3*Cin, Cout) bf16 matmul into an f32 register accumulator.
# ---------------------------------------------------------------------------
def _conv3x3_kernel(x_ref, w_ref, b_ref, *rest, hp, w16, rb, fused_head):
    if fused_head:
        wl_ref, bl_ref, o_ref = rest
    else:
        (o_ref,) = rest

    i = pl.program_id(0)
    cout = w_ref.shape[-1]
    acc = jnp.broadcast_to(b_ref[...], (rb, cout)).astype(jnp.float32)  # bias init
    for t in range(9):  # static unrolled taps (kd, kh); kw lives in the lane axis
        kd, kh = t // 3, t % 3
        off = (kd * hp + kh) * w16
        start = pl.multiple_of(i * rb + off, 16)
        acc = acc + jnp.dot(x_ref[pl.ds(start, rb), :], w_ref[t],
                            preferred_element_type=jnp.float32)
    h = jnp.maximum(acc, 0.0)  # DoubleConv activation (ReLU)

    if fused_head:
        z = jnp.dot(h.astype(jnp.bfloat16), wl_ref[...],
                    preferred_element_type=jnp.float32) + bl_ref[...]
        m = jnp.max(z, axis=-1, keepdims=True)
        e = jnp.exp(z - m)
        s = jnp.sum(e, axis=-1, keepdims=True)
        o_ref[...] = (e * pl.reciprocal(s, approx=True)).astype(o_ref.dtype)
    else:
        o_ref[...] = h.astype(o_ref.dtype)


def conv3x3(x, w, b, head=None):
    """3x3x3 conv (pad=1) + ReLU; optional fused (1x1x1 conv + softmax) head.

    x: (N, D, H, W, Cin) NDHWC (any float dtype);
    w: torch layout (Cout, Cin, 3, 3, 3);  b: (Cout,)
    head: None or (last_w (ncls, Cout, 1, 1, 1), last_b (ncls,)).
    """
    N, D, H, W, Cin = x.shape
    Cout = w.shape[0]
    Dp, Hp = D + 2, H + 2
    W16 = _round_up(W, 16)  # 16-aligned so bf16 sublane slices stay aligned
    KC = 3 * Cin
    rb = RB_HEAD if head is not None else RB

    # one fused XLA copy: cast->bf16 + zero-pad + kw-stack (3 shifted W slices into lanes)
    xp = jnp.pad(x.astype(jnp.bfloat16),
                 ((0, 0), (1, 1), (1, 1), (1, W16 + 1 - W), (0, 0)))
    xkw = jnp.concatenate([xp[:, :, :, kw:kw + W16, :] for kw in range(3)], axis=-1)
    rows_out = N * Dp * Hp * W16
    n_blocks = _cdiv(rows_out, rb)
    rows_out_p = n_blocks * rb
    max_off = (2 * Hp + 2) * W16
    rows_in = rows_out_p + max_off
    Xf = jnp.pad(xkw.reshape(rows_out, KC), ((0, rows_in - rows_out), (0, 0)))

    # weights: (Cout, Cin, 3,3,3) -> (9 taps=(kd,kh), 3*Cin=(kw,ci), Cout), bf16
    wt = jnp.transpose(w, (2, 3, 4, 1, 0)).reshape(9, KC, Cout).astype(jnp.bfloat16)
    bias = b.reshape(1, Cout).astype(jnp.float32)

    if head is None:
        out_cols = Cout
        out_dtype = jnp.bfloat16
        out_itemsize = 2
        extra_in = ()
        extra_specs = ()
        head_flops = 0
        n_trans = 0
    else:
        wl, bl = head
        ncls = wl.shape[0]
        out_cols = ncls
        out_dtype = jnp.float32
        out_itemsize = 4
        wlr = wl.reshape(ncls, Cout).T.astype(jnp.bfloat16)   # (Cout, ncls)
        blr = bl.reshape(1, ncls).astype(jnp.float32)
        extra_in = (wlr, blr)
        extra_specs = (
            _spec((Cout, ncls), lambda i: (0, 0), resident=True),
            _spec((1, ncls), lambda i: (0, 0), resident=True),
        )
        head_flops = 2 * rows_out_p * Cout * ncls
        n_trans = rows_out_p * ncls

    cost = pl.CostEstimate(
        flops=2 * rows_out_p * 9 * KC * Cout + head_flops,
        transcendentals=n_trans,
        bytes_accessed=(rows_in * KC * 2 + 9 * KC * Cout * 2
                        + rows_out_p * out_cols * out_itemsize),
    )

    # VMEM budget for the resident-Xf strategy (bf16 Xf single-buffered, bf16
    # weights, f32 bias, double-buffered output block, optional head weights).
    needed = (rows_in * KC * 2 + 9 * KC * Cout * 2 + 8 * 128 * 4
              + 2 * rb * _round_up(out_cols, 128) * out_itemsize)
    if head is not None:
        needed += Cout * _round_up(out_cols, 128) * 2 + 8 * 128 * 4
    vmem_limit = None
    if needed > (24 << 20):
        vmem_limit = min(int(needed * 3 // 2) + (4 << 20), 96 << 20)

    kernel = functools.partial(_conv3x3_kernel, hp=Hp, w16=W16, rb=rb,
                               fused_head=head is not None)
    out = pl.pallas_call(
        kernel,
        out_shape=jax.ShapeDtypeStruct((rows_out_p, out_cols), out_dtype),
        grid_spec=pltpu.PrefetchScalarGridSpec(
            num_scalar_prefetch=0,
            grid=(n_blocks,),
            in_specs=[
                _spec((rows_in, KC), lambda i: (0, 0), resident=True),      # activation
                _spec((9, KC, Cout), lambda i: (0, 0, 0), resident=True),   # weights
                _spec((1, Cout), lambda i: (0, 0), resident=True),          # bias
                *extra_specs,
            ],
            out_specs=pl.BlockSpec((rb, out_cols), lambda i: (i, 0)),
        ),
        compiler_params=pltpu.CompilerParams(
            dimension_semantics=("parallel",), vmem_limit_bytes=vmem_limit),
        cost_estimate=cost,
    )(Xf, wt, bias, *extra_in)

    y = out[:rows_out].reshape(N, Dp, Hp, W16, out_cols)[:, :D, :H, :W, :]
    return y


# ---------------------------------------------------------------------------
# DecoderBlock3d forward
# ---------------------------------------------------------------------------
def decoder_block3d_forward(params, x_ncdhw, features_ncdhw):
    x = jnp.transpose(x_ncdhw, (0, 2, 3, 4, 1)).astype(jnp.bfloat16)  # NCDHW -> NDHWC
    n_stages = len(params["stages"])
    for i, st in enumerate(params["stages"]):
        up = conv_transpose3d_2x2(x, st["up_w"], st["up_b"])               # bf16
        f = jnp.transpose(features_ncdhw[i], (0, 2, 3, 4, 1)).astype(jnp.bfloat16)
        xcat = jnp.concatenate([up, f], axis=-1)       # torch.cat([x, features[i]], dim=1)
        x = conv3x3(xcat, st["c1_w"], st["c1_b"])      # DoubleConv (conv -> relu) x2
        head = (params["last_w"], params["last_b"]) if i == n_stages - 1 else None
        x = conv3x3(x, st["c2_w"], st["c2_b"], head=head)  # last stage fuses 1x1 + softmax
    return jnp.transpose(x, (0, 4, 1, 2, 3))  # NDHWC -> NCDHW (f32 probabilities)


def init_params(key, decoder_channels, num_classes):
    params = {"stages": []}
    for i in range(len(decoder_channels) - 1):
        cin, cout = decoder_channels[i], decoder_channels[i + 1]
        key, *ks = jax.random.split(key, 7)
        params["stages"].append({
            "up_w": 0.1 * jax.random.normal(ks[0], (cin, cin // 2, 2, 2, 2), jnp.float32),
            "up_b": 0.1 * jax.random.normal(ks[1], (cin // 2,), jnp.float32),
            "c1_w": (1.0 / math.sqrt(27 * cin)) * jax.random.normal(ks[2], (cout, cin, 3, 3, 3), jnp.float32),
            "c1_b": 0.1 * jax.random.normal(ks[3], (cout,), jnp.float32),
            "c2_w": (1.0 / math.sqrt(27 * cout)) * jax.random.normal(ks[4], (cout, cout, 3, 3, 3), jnp.float32),
            "c2_b": 0.1 * jax.random.normal(ks[5], (cout,), jnp.float32),
        })
    key, k1, k2 = jax.random.split(key, 3)
    clast = decoder_channels[-1]
    params["last_w"] = 0.1 * jax.random.normal(k1, (num_classes, clast, 1, 1, 1), jnp.float32)
    params["last_b"] = 0.1 * jax.random.normal(k2, (num_classes,), jnp.float32)
    return params


# ---------------------------------------------------------------------------
# Pure-numpy reference (mirrors the PyTorch module semantics) for validation.
# ---------------------------------------------------------------------------
def _np_conv_transpose(x, w, b):
    N, Cin, D, H, W = x.shape
    Cout = w.shape[1]
    y = np.zeros((N, Cout, 2 * D, 2 * H, 2 * W), np.float64)
    for a in range(2):
        for bb in range(2):
            for c in range(2):
                y[:, :, a::2, bb::2, c::2] = np.einsum("nidhw,io->nodhw", x, w[:, :, a, bb, c])
    return y + b.reshape(1, -1, 1, 1, 1)


def _np_conv3(x, w, b):
    N, Cin, D, H, W = x.shape
    xp = np.pad(x, ((0, 0), (0, 0), (1, 1), (1, 1), (1, 1)))
    Cout = w.shape[0]
    y = np.zeros((N, Cout, D, H, W), np.float64)
    for kd in range(3):
        for kh in range(3):
            for kw in range(3):
                y += np.einsum("nidhw,oi->nodhw",
                               xp[:, :, kd:kd + D, kh:kh + H, kw:kw + W],
                               w[:, :, kd, kh, kw])
    return y + b.reshape(1, -1, 1, 1, 1)


def _np_forward(params, x, features):
    x = np.asarray(x, np.float64)
    for i, st in enumerate(params["stages"]):
        x = _np_conv_transpose(x, np.asarray(st["up_w"], np.float64), np.asarray(st["up_b"], np.float64))
        x = np.concatenate([x, np.asarray(features[i], np.float64)], axis=1)
        x = np.maximum(_np_conv3(x, np.asarray(st["c1_w"], np.float64), np.asarray(st["c1_b"], np.float64)), 0.0)
        x = np.maximum(_np_conv3(x, np.asarray(st["c2_w"], np.float64), np.asarray(st["c2_b"], np.float64)), 0.0)
    ncls = params["last_w"].shape[0]
    wl = np.asarray(params["last_w"], np.float64).reshape(ncls, -1)
    bl = np.asarray(params["last_b"], np.float64).reshape(1, -1, 1, 1, 1)
    logits = np.einsum("nidhw,oi->nodhw", x, wl) + bl
    m = logits.max(axis=1, keepdims=True)
    e = np.exp(logits - m)
    return e / e.sum(axis=1, keepdims=True)


if __name__ == "__main__":
    decoder_channels = [16, 8]
    num_classes = 3

    key = jax.random.PRNGKey(0)
    kp, kx, kf = jax.random.split(key, 3)
    params = init_params(kp, decoder_channels, num_classes)

    # x: (N=2, C=16, D=4, H=4, W=4); skip feature: (2, 8, 8, 8, 8)
    x = jax.random.normal(kx, (2, 16, 4, 4, 4), jnp.float32)
    features = [jax.random.normal(kf, (2, 8, 8, 8, 8), jnp.float32)]

    fwd = jax.jit(decoder_block3d_forward)
    out = jax.block_until_ready(fwd(params, x, features))

    assert out.shape == (2, num_classes, 8, 8, 8), out.shape
    out_np = np.asarray(out, np.float32)
    sums = out_np.sum(axis=1)
    assert np.allclose(sums, 1.0, atol=2e-2), "softmax over channel dim failed"

    ref = _np_forward(params, x, features).astype(np.float32)
    err = float(np.max(np.abs(out_np - ref)))
    assert err < 6e-2, f"mismatch vs numpy reference: max|diff|={err}"

    print("KERNEL_OK")
</pallas_src>

<mosaic_0001>
module attributes {stable_mosaic.version = 11 : i64} {
  func.func @_upconv_kernel(%arg0: i32, %arg1: memref<128x16xbf16, #tpu.memory_space<vmem>>, %arg2: memref<16x64xbf16, #tpu.memory_space<vmem>>, %arg3: memref<1x64xf32, #tpu.memory_space<vmem>>, %arg4: memref<128x64xbf16, #tpu.memory_space<vmem>>) attributes {dimension_semantics = [#tpu.dimension_semantics<parallel>], iteration_bounds = array<i64: 1>, scalar_prefetch = 0 : i64, scratch_operands = 0 : i64, tpu.core_type = #tpu.core_type<tc>, window_params = [{transform_indices = @transform_0, window_bounds = array<i64: 128, 16>}, {pipeline_mode = #tpu.pipeline_mode<synchronous>, transform_indices = @transform_1, window_bounds = array<i64: 16, 64>}, {pipeline_mode = #tpu.pipeline_mode<synchronous>, transform_indices = @transform_2, window_bounds = array<i64: 1, 64>}, {transform_indices = @transform_3, window_bounds = array<i64: 128, 64>}]} {
    %c0 = arith.constant 0 : index
    %c0_0 = arith.constant 0 : index
    %0 = vector.load %arg1[%c0, %c0_0] : memref<128x16xbf16, #tpu.memory_space<vmem>>, vector<128x16xbf16>
    %c0_1 = arith.constant 0 : index
    %c0_2 = arith.constant 0 : index
    %1 = vector.load %arg2[%c0_1, %c0_2] : memref<16x64xbf16, #tpu.memory_space<vmem>>, vector<16x64xbf16>
    %cst = arith.constant dense<0.000000e+00> : vector<128x64xf32>
    %2 = tpu.matmul %0, %1, %cst {dimension_numbers = #tpu.dot_dimension_numbers<[1], [0], [0], [1], [0, 0, 1, 1], [], []>} : vector<128x16xbf16>, vector<16x64xbf16>, vector<128x64xf32> -> vector<128x64xf32>
    %c0_3 = arith.constant 0 : index
    %c0_4 = arith.constant 0 : index
    %3 = vector.load %arg3[%c0_3, %c0_4] : memref<1x64xf32, #tpu.memory_space<vmem>>, vector<1x64xf32>
    %4 = vector.broadcast %3 : vector<1x64xf32> to vector<128x64xf32>
    %5 = arith.addf %2, %4 : vector<128x64xf32>
    %6 = arith.truncf %5 : vector<128x64xf32> to vector<128x64xbf16>
    %c0_5 = arith.constant 0 : index
    %c0_6 = arith.constant 0 : index
    %7 = vector.load %arg4[%c0_5, %c0_6] : memref<128x64xbf16, #tpu.memory_space<vmem>>, vector<128x64xbf16>
    tpu.vector_store %arg4[%c0_5, %c0_6], %6 {strides = array<i32>} : memref<128x64xbf16, #tpu.memory_space<vmem>>, vector<128x64xbf16>,
    return
  }
  func.func @transform_0(%arg0: i32) -> (i32, i32) {
    %c0_i32 = arith.constant 0 : i32
    %c0_i32_0 = arith.constant 0 : i32
    return %arg0, %c0_i32 : i32, i32
  }
  func.func @transform_1(%arg0: i32) -> (i32, i32) {
    %c0_i32 = arith.constant 0 : i32
    %c0_i32_0 = arith.constant 0 : i32
    %c0_i32_1 = arith.constant 0 : i32
    return %c0_i32, %c0_i32_0 : i32, i32
  }
  func.func @transform_2(%arg0: i32) -> (i32, i32) {
    %c0_i32 = arith.constant 0 : i32
    %c0_i32_0 = arith.constant 0 : i32
    %c0_i32_1 = arith.constant 0 : i32
    return %c0_i32, %c0_i32_0 : i32, i32
  }
  func.func @transform_3(%arg0: i32) -> (i32, i32) {
    %c0_i32 = arith.constant 0 : i32
    %c0_i32_0 = arith.constant 0 : i32
    return %arg0, %c0_i32 : i32, i32
  }
}

module attributes {stable_mosaic.version = 11 : i64} {
  func.func @_conv3x3_kernel(%arg0: i32, %arg1: memref<3680x48xbf16, #tpu.memory_space<vmem>>, %arg2: memref<9x48x8xbf16, #tpu.memory_space<vmem>>, %arg3: memref<1x8xf32, #tpu.memory_space<vmem>>, %arg4: memref<256x8xbf16, #tpu.memory_space<vmem>>) attributes {dimension_semantics = [#tpu.dimension_semantics<parallel>], iteration_bounds = array<i64: 13>, scalar_prefetch = 0 : i64, scratch_operands = 0 : i64, tpu.core_type = #tpu.core_type<tc>, window_params = [{pipeline_mode = #tpu.pipeline_mode<synchronous>, transform_indices = @transform_0, window_bounds = array<i64: 3680, 48>}, {pipeline_mode = #tpu.pipeline_mode<synchronous>, transform_indices = @transform_1, window_bounds = array<i64: 9, 48, 8>}, {pipeline_mode = #tpu.pipeline_mode<synchronous>, transform_indices = @transform_2, window_bounds = array<i64: 1, 8>}, {transform_indices = @transform_3, window_bounds = array<i64: 256, 8>}]} {
    %c0 = arith.constant 0 : index
    %c0_0 = arith.constant 0 : index
    %0 = vector.load %arg3[%c0, %c0_0] : memref<1x8xf32, #tpu.memory_space<vmem>>, vector<1x8xf32>
    %1 = vector.shape_cast %0 : vector<1x8xf32> to vector<1x8xf32>
    %2 = vector.broadcast %1 : vector<1x8xf32> to vector<256x8xf32>
    %c256_i32 = arith.constant 256 : i32
    %3 = arith.muli %arg0, %c256_i32 : i32
    %c0_i32 = arith.constant 0 : i32
    %4 = arith.addi %3, %c0_i32 : i32
    %5 = tpu.assume_multiple %4, 16 : i32
    %6 = arith.index_cast %5 : i32 to index
    %c0_1 = arith.constant 0 : index
    %7 = vector.load %arg1[%6, %c0_1] : memref<3680x48xbf16, #tpu.memory_space<vmem>>, vector<256x48xbf16>
    %c0_2 = arith.constant 0 : index
    %c0_3 = arith.constant 0 : index
    %c0_4 = arith.constant 0 : index
    %8 = vector.load %arg2[%c0_2, %c0_3, %c0_4] : memref<9x48x8xbf16, #tpu.memory_space<vmem>>, vector<1x48x8xbf16>
    %9 = vector.shape_cast %8 : vector<1x48x8xbf16> to vector<48x8xbf16>
    %cst = arith.constant dense<0.000000e+00> : vector<256x8xf32>
    %10 = tpu.matmul %7, %9, %cst {dimension_numbers = #tpu.dot_dimension_numbers<[1], [0], [0], [1], [0, 0, 1, 1], [], []>} : vector<256x48xbf16>, vector<48x8xbf16>, vector<256x8xf32> -> vector<256x8xf32>
    %11 = arith.addf %2, %10 : vector<256x8xf32>
    %c256_i32_5 = arith.constant 256 : i32
    %12 = arith.muli %arg0, %c256_i32_5 : i32
    %c16_i32 = arith.constant 16 : i32
    %13 = arith.addi %12, %c16_i32 : i32
    %14 = tpu.assume_multiple %13, 16 : i32
    %15 = arith.index_cast %14 : i32 to index
    %c0_6 = arith.constant 0 : index
    %16 = vector.load %arg1[%15, %c0_6] : memref<3680x48xbf16, #tpu.memory_space<vmem>>, vector<256x48xbf16>
    %c1 = arith.constant 1 : index
    %c0_7 = arith.constant 0 : index
    %c0_8 = arith.constant 0 : index
    %17 = vector.load %arg2[%c1, %c0_7, %c0_8] : memref<9x48x8xbf16, #tpu.memory_space<vmem>>, vector<1x48x8xbf16>
    %18 = vector.shape_cast %17 : vector<1x48x8xbf16> to vector<48x8xbf16>
    %cst_9 = arith.constant dense<0.000000e+00> : vector<256x8xf32>
    %19 = tpu.matmul %16, %18, %cst_9 {dimension_numbers = #tpu.dot_dimension_numbers<[1], [0], [0], [1], [0, 0, 1, 1], [], []>} : vector<256x48xbf16>, vector<48x8xbf16>, vector<256x8xf32> -> vector<256x8xf32>
    %20 = arith.addf %11, %19 : vector<256x8xf32>
    %c256_i32_10 = arith.constant 256 : i32
    %21 = arith.muli %arg0, %c256_i32_10 : i32
    %c32_i32 = arith.constant 32 : i32
    %22 = arith.addi %21, %c32_i32 : i32
    %23 = tpu.assume_multiple %22, 16 : i32
    %24 = arith.index_cast %23 : i32 to index
    %c0_11 = arith.constant 0 : index
    %25 = vector.load %arg1[%24, %c0_11] : memref<3680x48xbf16, #tpu.memory_space<vmem>>, vector<256x48xbf16>
    %c2 = arith.constant 2 : index
    %c0_12 = arith.constant 0 : index
    %c0_13 = arith.constant 0 : index
    %26 = vector.load %arg2[%c2, %c0_12, %c0_13] : memref<9x48x8xbf16, #tpu.memory_space<vmem>>, vector<1x48x8xbf16>
    %27 = vector.shape_cast %26 : vector<1x48x8xbf16> to vector<48x8xbf16>
    %cst_14 = arith.constant dense<0.000000e+00> : vector<256x8xf32>
    %28 = tpu.matmul %25, %27, %cst_14 {dimension_numbers = #tpu.dot_dimension_numbers<[1], [0], [0], [1], [0, 0, 1, 1], [], []>} : vector<256x48xbf16>, vector<48x8xbf16>, vector<256x8xf32> -> vector<256x8xf32>
    %29 = arith.addf %20, %28 : vector<256x8xf32>
    %c256_i32_15 = arith.constant 256 : i32
    %30 = arith.muli %arg0, %c256_i32_15 : i32
    %c160_i32 = arith.constant 160 : i32
    %31 = arith.addi %30, %c160_i32 : i32
    %32 = tpu.assume_multiple %31, 16 : i32
    %33 = arith.index_cast %32 : i32 to index
    %c0_16 = arith.constant 0 : index
    %34 = vector.load %arg1[%33, %c0_16] : memref<3680x48xbf16, #tpu.memory_space<vmem>>, vector<256x48xbf16>
    %c3 = arith.constant 3 : index
    %c0_17 = arith.constant 0 : index
    %c0_18 = arith.constant 0 : index
    %35 = vector.load %arg2[%c3, %c0_17, %c0_18] : memref<9x48x8xbf16, #tpu.memory_space<vmem>>, vector<1x48x8xbf16>
    %36 = vector.shape_cast %35 : vector<1x48x8xbf16> to vector<48x8xbf16>
    %cst_19 = arith.constant dense<0.000000e+00> : vector<256x8xf32>
    %37 = tpu.matmul %34, %36, %cst_19 {dimension_numbers = #tpu.dot_dimension_numbers<[1], [0], [0], [1], [0, 0, 1, 1], [], []>} : vector<256x48xbf16>, vector<48x8xbf16>, vector<256x8xf32> -> vector<256x8xf32>
    %38 = arith.addf %29, %37 : vector<256x8xf32>
    %c256_i32_20 = arith.constant 256 : i32
    %39 = arith.muli %arg0, %c256_i32_20 : i32
    %c176_i32 = arith.constant 176 : i32
    %40 = arith.addi %39, %c176_i32 : i32
    %41 = tpu.assume_multiple %40, 16 : i32
    %42 = arith.index_cast %41 : i32 to index
    %c0_21 = arith.constant 0 : index
    %43 = vector.load %arg1[%42, %c0_21] : memref<3680x48xbf16, #tpu.memory_space<vmem>>, vector<256x48xbf16>
    %c4 = arith.constant 4 : index
    %c0_22 = arith.constant 0 : index
    %c0_23 = arith.constant 0 : index
    %44 = vector.load %arg2[%c4, %c0_22, %c0_23] : memref<9x48x8xbf16, #tpu.memory_space<vmem>>, vector<1x48x8xbf16>
    %45 = vector.shape_cast %44 : vector<1x48x8xbf16> to vector<48x8xbf16>
    %cst_24 = arith.constant dense<0.000000e+00> : vector<256x8xf32>
    %46 = tpu.matmul %43, %45, %cst_24 {dimension_numbers = #tpu.dot_dimension_numbers<[1], [0], [0], [1], [0, 0, 1, 1], [], []>} : vector<256x48xbf16>, vector<48x8xbf16>, vector<256x8xf32> -> vector<256x8xf32>
    %47 = arith.addf %38, %46 : vector<256x8xf32>
    %c256_i32_25 = arith.constant 256 : i32
    %48 = arith.muli %arg0, %c256_i32_25 : i32
    %c192_i32 = arith.constant 192 : i32
    %49 = arith.addi %48, %c192_i32 : i32
    %50 = tpu.assume_multiple %49, 16 : i32
    %51 = arith.index_cast %50 : i32 to index
    %c0_26 = arith.constant 0 : index
    %52 = vector.load %arg1[%51, %c0_26] : memref<3680x48xbf16, #tpu.memory_space<vmem>>, vector<256x48xbf16>
    %c5 = arith.constant 5 : index
    %c0_27 = arith.constant 0 : index
    %c0_28 = arith.constant 0 : index
    %53 = vector.load %arg2[%c5, %c0_27, %c0_28] : memref<9x48x8xbf16, #tpu.memory_space<vmem>>, vector<1x48x8xbf16>
    %54 = vector.shape_cast %53 : vector<1x48x8xbf16> to vector<48x8xbf16>
    %cst_29 = arith.constant dense<0.000000e+00> : vector<256x8xf32>
    %55 = tpu.matmul %52, %54, %cst_29 {dimension_numbers = #tpu.dot_dimension_numbers<[1], [0], [0], [1], [0, 0, 1, 1], [], []>} : vector<256x48xbf16>, vector<48x8xbf16>, vector<256x8xf32> -> vector<256x8xf32>
    %56 = arith.addf %47, %55 : vector<256x8xf32>
    %c256_i32_30 = arith.constant 256 : i32
    %57 = arith.muli %arg0, %c256_i32_30 : i32
    %c320_i32 = arith.constant 320 : i32
    %58 = arith.addi %57, %c320_i32 : i32
    %59 = tpu.assume_multiple %58, 16 : i32
    %60 = arith.index_cast %59 : i32 to index
    %c0_31 = arith.constant 0 : index
    %61 = vector.load %arg1[%60, %c0_31] : memref<3680x48xbf16, #tpu.memory_space<vmem>>, vector<256x48xbf16>
    %c6 = arith.constant 6 : index
    %c0_32 = arith.constant 0 : index
    %c0_33 = arith.constant 0 : index
    %62 = vector.load %arg2[%c6, %c0_32, %c0_33] : memref<9x48x8xbf16, #tpu.memory_space<vmem>>, vector<1x48x8xbf16>
    %63 = vector.shape_cast %62 : vector<1x48x8xbf16> to vector<48x8xbf16>
    %cst_34 = arith.constant dense<0.000000e+00> : vector<256x8xf32>
    %64 = tpu.matmul %61, %63, %cst_34 {dimension_numbers = #tpu.dot_dimension_numbers<[1], [0], [0], [1], [0, 0, 1, 1], [], []>} : vector<256x48xbf16>, vector<48x8xbf16>, vector<256x8xf32> -> vector<256x8xf32>
    %65 = arith.addf %56, %64 : vector<256x8xf32>
    %c256_i32_35 = arith.constant 256 : i32
    %66 = arith.muli %arg0, %c256_i32_35 : i32
    %c336_i32 = arith.constant 336 : i32
    %67 = arith.addi %66, %c336_i32 : i32
    %68 = tpu.assume_multiple %67, 16 : i32
    %69 = arith.index_cast %68 : i32 to index
    %c0_36 = arith.constant 0 : index
    %70 = vector.load %arg1[%69, %c0_36] : memref<3680x48xbf16, #tpu.memory_space<vmem>>, vector<256x48xbf16>
    %c7 = arith.constant 7 : index
    %c0_37 = arith.constant 0 : index
    %c0_38 = arith.constant 0 : index
    %71 = vector.load %arg2[%c7, %c0_37, %c0_38] : memref<9x48x8xbf16, #tpu.memory_space<vmem>>, vector<1x48x8xbf16>
    %72 = vector.shape_cast %71 : vector<1x48x8xbf16> to vector<48x8xbf16>
    %cst_39 = arith.constant dense<0.000000e+00> : vector<256x8xf32>
    %73 = tpu.matmul %70, %72, %cst_39 {dimension_numbers = #tpu.dot_dimension_numbers<[1], [0], [0], [1], [0, 0, 1, 1], [], []>} : vector<256x48xbf16>, vector<48x8xbf16>, vector<256x8xf32> -> vector<256x8xf32>
    %74 = arith.addf %65, %73 : vector<256x8xf32>
    %c256_i32_40 = arith.constant 256 : i32
    %75 = arith.muli %arg0, %c256_i32_40 : i32
    %c352_i32 = arith.constant 352 : i32
    %76 = arith.addi %75, %c352_i32 : i32
    %77 = tpu.assume_multiple %76, 16 : i32
    %78 = arith.index_cast %77 : i32 to index
    %c0_41 = arith.constant 0 : index
    %79 = vector.load %arg1[%78, %c0_41] : memref<3680x48xbf16, #tpu.memory_space<vmem>>, vector<256x48xbf16>
    %c8 = arith.constant 8 : index
    %c0_42 = arith.constant 0 : index
    %c0_43 = arith.constant 0 : index
    %80 = vector.load %arg2[%c8, %c0_42, %c0_43] : memref<9x48x8xbf16, #tpu.memory_space<vmem>>, vector<1x48x8xbf16>
    %81 = vector.shape_cast %80 : vector<1x48x8xbf16> to vector<48x8xbf16>
    %cst_44 = arith.constant dense<0.000000e+00> : vector<256x8xf32>
    %82 = tpu.matmul %79, %81, %cst_44 {dimension_numbers = #tpu.dot_dimension_numbers<[1], [0], [0], [1], [0, 0, 1, 1], [], []>} : vector<256x48xbf16>, vector<48x8xbf16>, vector<256x8xf32> -> vector<256x8xf32>
    %83 = arith.addf %74, %82 : vector<256x8xf32>
    %cst_45 = arith.constant 0.000000e+00 : f32
    %84 = vector.broadcast %cst_45 : f32 to vector<256x8xf32>
    %85 = arith.maximumf %83, %84 : vector<256x8xf32>
    %86 = arith.truncf %85 : vector<256x8xf32> to vector<256x8xbf16>
    %c0_46 = arith.constant 0 : index
    %c0_47 = arith.constant 0 : index
    %87 = vector.load %arg4[%c0_46, %c0_47] : memref<256x8xbf16, #tpu.memory_space<vmem>>, vector<256x8xbf16>
    tpu.vector_store %arg4[%c0_46, %c0_47], %86 {strides = array<i32>} : memref<256x8xbf16, #tpu.memory_space<vmem>>, vector<256x8xbf16>,
    return
  }
  func.func @transform_0(%arg0: i32) -> (i32, i32) {
    %c0_i32 = arith.constant 0 : i32
    %c0_i32_0 = arith.constant 0 : i32
    %c0_i32_1 = arith.constant 0 : i32
    return %c0_i32, %c0_i32_0 : i32, i32
  }
  func.func @transform_1(%arg0: i32) -> (i32, i32, i32) {
    %c0_i32 = arith.constant 0 : i32
    %c0_i32_0 = arith.constant 0 : i32
    %c0_i32_1 = arith.constant 0 : i32
    %c0_i32_2 = arith.constant 0 : i32
    return %c0_i32, %c0_i32_0, %c0_i32_1 : i32, i32, i32
  }
  func.func @transform_2(%arg0: i32) -> (i32, i32) {
    %c0_i32 = arith.constant 0 : i32
    %c0_i32_0 = arith.constant 0 : i32
    %c0_i32_1 = arith.constant 0 : i32
    return %c0_i32, %c0_i32_0 : i32, i32
  }
  func.func @transform_3(%arg0: i32) -> (i32, i32) {
    %c0_i32 = arith.constant 0 : i32
    %c0_i32_0 = arith.constant 0 : i32
    return %arg0, %c0_i32 : i32, i32
  }
}

module attributes {stable_mosaic.version = 11 : i64} {
  func.func @_conv3x3_kernel(%arg0: i32, %arg1: memref<3936x24xbf16, #tpu.memory_space<vmem>>, %arg2: memref<9x24x8xbf16, #tpu.memory_space<vmem>>, %arg3: memref<1x8xf32, #tpu.memory_space<vmem>>, %arg4: memref<8x3xbf16, #tpu.memory_space<vmem>>, %arg5: memref<1x3xf32, #tpu.memory_space<vmem>>, %arg6: memref<512x3xf32, #tpu.memory_space<vmem>>) attributes {dimension_semantics = [#tpu.dimension_semantics<parallel>], iteration_bounds = array<i64: 7>, scalar_prefetch = 0 : i64, scratch_operands = 0 : i64, tpu.core_type = #tpu.core_type<tc>, window_params = [{pipeline_mode = #tpu.pipeline_mode<synchronous>, transform_indices = @transform_0, window_bounds = array<i64: 3936, 24>}, {pipeline_mode = #tpu.pipeline_mode<synchronous>, transform_indices = @transform_1, window_bounds = array<i64: 9, 24, 8>}, {pipeline_mode = #tpu.pipeline_mode<synchronous>, transform_indices = @transform_2, window_bounds = array<i64: 1, 8>}, {pipeline_mode = #tpu.pipeline_mode<synchronous>, transform_indices = @transform_3, window_bounds = array<i64: 8, 3>}, {pipeline_mode = #tpu.pipeline_mode<synchronous>, transform_indices = @transform_4, window_bounds = array<i64: 1, 3>}, {transform_indices = @transform_5, window_bounds = array<i64: 512, 3>}]} {
    %c0 = arith.constant 0 : index
    %c0_0 = arith.constant 0 : index
    %0 = vector.load %arg3[%c0, %c0_0] : memref<1x8xf32, #tpu.memory_space<vmem>>, vector<1x8xf32>
    %1 = vector.shape_cast %0 : vector<1x8xf32> to vector<1x8xf32>
    %2 = vector.broadcast %1 : vector<1x8xf32> to vector<512x8xf32>
    %c512_i32 = arith.constant 512 : i32
    %3 = arith.muli %arg0, %c512_i32 : i32
    %c0_i32 = arith.constant 0 : i32
    %4 = arith.addi %3, %c0_i32 : i32
    %5 = tpu.assume_multiple %4, 16 : i32
    %6 = arith.index_cast %5 : i32 to index
    %c0_1 = arith.constant 0 : index
    %7 = vector.load %arg1[%6, %c0_1] : memref<3936x24xbf16, #tpu.memory_space<vmem>>, vector<512x24xbf16>
    %c0_2 = arith.constant 0 : index
    %c0_3 = arith.constant 0 : index
    %c0_4 = arith.constant 0 : index
    %8 = vector.load %arg2[%c0_2, %c0_3, %c0_4] : memref<9x24x8xbf16, #tpu.memory_space<vmem>>, vector<1x24x8xbf16>
    %9 = vector.shape_cast %8 : vector<1x24x8xbf16> to vector<24x8xbf16>
    %cst = arith.constant dense<0.000000e+00> : vector<512x8xf32>
    %10 = tpu.matmul %7, %9, %cst {dimension_numbers = #tpu.dot_dimension_numbers<[1], [0], [0], [1], [0, 0, 1, 1], [], []>} : vector<512x24xbf16>, vector<24x8xbf16>, vector<512x8xf32> -> vector<512x8xf32>
    %11 = arith.addf %2, %10 : vector<512x8xf32>
    %c512_i32_5 = arith.constant 512 : i32
    %12 = arith.muli %arg0, %c512_i32_5 : i32
    %c16_i32 = arith.constant 16 : i32
    %13 = arith.addi %12, %c16_i32 : i32
    %14 = tpu.assume_multiple %13, 16 : i32
    %15 = arith.index_cast %14 : i32 to index
    %c0_6 = arith.constant 0 : index
    %16 = vector.load %arg1[%15, %c0_6] : memref<3936x24xbf16, #tpu.memory_space<vmem>>, vector<512x24xbf16>
    %c1 = arith.constant 1 : index
    %c0_7 = arith.constant 0 : index
    %c0_8 = arith.constant 0 : index
    %17 = vector.load %arg2[%c1, %c0_7, %c0_8] : memref<9x24x8xbf16, #tpu.memory_space<vmem>>, vector<1x24x8xbf16>
    %18 = vector.shape_cast %17 : vector<1x24x8xbf16> to vector<24x8xbf16>
    %cst_9 = arith.constant dense<0.000000e+00> : vector<512x8xf32>
    %19 = tpu.matmul %16, %18, %cst_9 {dimension_numbers = #tpu.dot_dimension_numbers<[1], [0], [0], [1], [0, 0, 1, 1], [], []>} : vector<512x24xbf16>, vector<24x8xbf16>, vector<512x8xf32> -> vector<512x8xf32>
    %20 = arith.addf %11, %19 : vector<512x8xf32>
    %c512_i32_10 = arith.constant 512 : i32
    %21 = arith.muli %arg0, %c512_i32_10 : i32
    %c32_i32 = arith.constant 32 : i32
    %22 = arith.addi %21, %c32_i32 : i32
    %23 = tpu.assume_multiple %22, 16 : i32
    %24 = arith.index_cast %23 : i32 to index
    %c0_11 = arith.constant 0 : index
    %25 = vector.load %arg1[%24, %c0_11] : memref<3936x24xbf16, #tpu.memory_space<vmem>>, vector<512x24xbf16>
    %c2 = arith.constant 2 : index
    %c0_12 = arith.constant 0 : index
    %c0_13 = arith.constant 0 : index
    %26 = vector.load %arg2[%c2, %c0_12, %c0_13] : memref<9x24x8xbf16, #tpu.memory_space<vmem>>, vector<1x24x8xbf16>
    %27 = vector.shape_cast %26 : vector<1x24x8xbf16> to vector<24x8xbf16>
    %cst_14 = arith.constant dense<0.000000e+00> : vector<512x8xf32>
    %28 = tpu.matmul %25, %27, %cst_14 {dimension_numbers = #tpu.dot_dimension_numbers<[1], [0], [0], [1], [0, 0, 1, 1], [], []>} : vector<512x24xbf16>, vector<24x8xbf16>, vector<512x8xf32> -> vector<512x8xf32>
    %29 = arith.addf %20, %28 : vector<512x8xf32>
    %c512_i32_15 = arith.constant 512 : i32
    %30 = arith.muli %arg0, %c512_i32_15 : i32
    %c160_i32 = arith.constant 160 : i32
    %31 = arith.addi %30, %c160_i32 : i32
    %32 = tpu.assume_multiple %31, 16 : i32
    %33 = arith.index_cast %32 : i32 to index
    %c0_16 = arith.constant 0 : index
    %34 = vector.load %arg1[%33, %c0_16] : memref<3936x24xbf16, #tpu.memory_space<vmem>>, vector<512x24xbf16>
    %c3 = arith.constant 3 : index
    %c0_17 = arith.constant 0 : index
    %c0_18 = arith.constant 0 : index
    %35 = vector.load %arg2[%c3, %c0_17, %c0_18] : memref<9x24x8xbf16, #tpu.memory_space<vmem>>, vector<1x24x8xbf16>
    %36 = vector.shape_cast %35 : vector<1x24x8xbf16> to vector<24x8xbf16>
    %cst_19 = arith.constant dense<0.000000e+00> : vector<512x8xf32>
    %37 = tpu.matmul %34, %36, %cst_19 {dimension_numbers = #tpu.dot_dimension_numbers<[1], [0], [0], [1], [0, 0, 1, 1], [], []>} : vector<512x24xbf16>, vector<24x8xbf16>, vector<512x8xf32> -> vector<512x8xf32>
    %38 = arith.addf %29, %37 : vector<512x8xf32>
    %c512_i32_20 = arith.constant 512 : i32
    %39 = arith.muli %arg0, %c512_i32_20 : i32
    %c176_i32 = arith.constant 176 : i32
    %40 = arith.addi %39, %c176_i32 : i32
    %41 = tpu.assume_multiple %40, 16 : i32
    %42 = arith.index_cast %41 : i32 to index
    %c0_21 = arith.constant 0 : index
    %43 = vector.load %arg1[%42, %c0_21] : memref<3936x24xbf16, #tpu.memory_space<vmem>>, vector<512x24xbf16>
    %c4 = arith.constant 4 : index
    %c0_22 = arith.constant 0 : index
    %c0_23 = arith.constant 0 : index
    %44 = vector.load %arg2[%c4, %c0_22, %c0_23] : memref<9x24x8xbf16, #tpu.memory_space<vmem>>, vector<1x24x8xbf16>
    %45 = vector.shape_cast %44 : vector<1x24x8xbf16> to vector<24x8xbf16>
    %cst_24 = arith.constant dense<0.000000e+00> : vector<512x8xf32>
    %46 = tpu.matmul %43, %45, %cst_24 {dimension_numbers = #tpu.dot_dimension_numbers<[1], [0], [0], [1], [0, 0, 1, 1], [], []>} : vector<512x24xbf16>, vector<24x8xbf16>, vector<512x8xf32> -> vector<512x8xf32>
    %47 = arith.addf %38, %46 : vector<512x8xf32>
    %c512_i32_25 = arith.constant 512 : i32
    %48 = arith.muli %arg0, %c512_i32_25 : i32
    %c192_i32 = arith.constant 192 : i32
    %49 = arith.addi %48, %c192_i32 : i32
    %50 = tpu.assume_multiple %49, 16 : i32
    %51 = arith.index_cast %50 : i32 to index
    %c0_26 = arith.constant 0 : index
    %52 = vector.load %arg1[%51, %c0_26] : memref<3936x24xbf16, #tpu.memory_space<vmem>>, vector<512x24xbf16>
    %c5 = arith.constant 5 : index
    %c0_27 = arith.constant 0 : index
    %c0_28 = arith.constant 0 : index
    %53 = vector.load %arg2[%c5, %c0_27, %c0_28] : memref<9x24x8xbf16, #tpu.memory_space<vmem>>, vector<1x24x8xbf16>
    %54 = vector.shape_cast %53 : vector<1x24x8xbf16> to vector<24x8xbf16>
    %cst_29 = arith.constant dense<0.000000e+00> : vector<512x8xf32>
    %55 = tpu.matmul %52, %54, %cst_29 {dimension_numbers = #tpu.dot_dimension_numbers<[1], [0], [0], [1], [0, 0, 1, 1], [], []>} : vector<512x24xbf16>, vector<24x8xbf16>, vector<512x8xf32> -> vector<512x8xf32>
    %56 = arith.addf %47, %55 : vector<512x8xf32>
    %c512_i32_30 = arith.constant 512 : i32
    %57 = arith.muli %arg0, %c512_i32_30 : i32
    %c320_i32 = arith.constant 320 : i32
    %58 = arith.addi %57, %c320_i32 : i32
    %59 = tpu.assume_multiple %58, 16 : i32
    %60 = arith.index_cast %59 : i32 to index
    %c0_31 = arith.constant 0 : index
    %61 = vector.load %arg1[%60, %c0_31] : memref<3936x24xbf16, #tpu.memory_space<vmem>>, vector<512x24xbf16>
    %c6 = arith.constant 6 : index
    %c0_32 = arith.constant 0 : index
    %c0_33 = arith.constant 0 : index
    %62 = vector.load %arg2[%c6, %c0_32, %c0_33] : memref<9x24x8xbf16, #tpu.memory_space<vmem>>, vector<1x24x8xbf16>
    %63 = vector.shape_cast %62 : vector<1x24x8xbf16> to vector<24x8xbf16>
    %cst_34 = arith.constant dense<0.000000e+00> : vector<512x8xf32>
    %64 = tpu.matmul %61, %63, %cst_34 {dimension_numbers = #tpu.dot_dimension_numbers<[1], [0], [0], [1], [0, 0, 1, 1], [], []>} : vector<512x24xbf16>, vector<24x8xbf16>, vector<512x8xf32> -> vector<512x8xf32>
    %65 = arith.addf %56, %64 : vector<512x8xf32>
    %c512_i32_35 = arith.constant 512 : i32
    %66 = arith.muli %arg0, %c512_i32_35 : i32
    %c336_i32 = arith.constant 336 : i32
    %67 = arith.addi %66, %c336_i32 : i32
    %68 = tpu.assume_multiple %67, 16 : i32
    %69 = arith.index_cast %68 : i32 to index
    %c0_36 = arith.constant 0 : index
    %70 = vector.load %arg1[%69, %c0_36] : memref<3936x24xbf16, #tpu.memory_space<vmem>>, vector<512x24xbf16>
    %c7 = arith.constant 7 : index
    %c0_37 = arith.constant 0 : index
    %c0_38 = arith.constant 0 : index
    %71 = vector.load %arg2[%c7, %c0_37, %c0_38] : memref<9x24x8xbf16, #tpu.memory_space<vmem>>, vector<1x24x8xbf16>
    %72 = vector.shape_cast %71 : vector<1x24x8xbf16> to vector<24x8xbf16>
    %cst_39 = arith.constant dense<0.000000e+00> : vector<512x8xf32>
    %73 = tpu.matmul %70, %72, %cst_39 {dimension_numbers = #tpu.dot_dimension_numbers<[1], [0], [0], [1], [0, 0, 1, 1], [], []>} : vector<512x24xbf16>, vector<24x8xbf16>, vector<512x8xf32> -> vector<512x8xf32>
    %74 = arith.addf %65, %73 : vector<512x8xf32>
    %c512_i32_40 = arith.constant 512 : i32
    %75 = arith.muli %arg0, %c512_i32_40 : i32
    %c352_i32 = arith.constant 352 : i32
    %76 = arith.addi %75, %c352_i32 : i32
    %77 = tpu.assume_multiple %76, 16 : i32
    %78 = arith.index_cast %77 : i32 to index
    %c0_41 = arith.constant 0 : index
    %79 = vector.load %arg1[%78, %c0_41] : memref<3936x24xbf16, #tpu.memory_space<vmem>>, vector<512x24xbf16>
    %c8 = arith.constant 8 : index
    %c0_42 = arith.constant 0 : index
    %c0_43 = arith.constant 0 : index
    %80 = vector.load %arg2[%c8, %c0_42, %c0_43] : memref<9x24x8xbf16, #tpu.memory_space<vmem>>, vector<1x24x8xbf16>
    %81 = vector.shape_cast %80 : vector<1x24x8xbf16> to vector<24x8xbf16>
    %cst_44 = arith.constant dense<0.000000e+00> : vector<512x8xf32>
    %82 = tpu.matmul %79, %81, %cst_44 {dimension_numbers = #tpu.dot_dimension_numbers<[1], [0], [0], [1], [0, 0, 1, 1], [], []>} : vector<512x24xbf16>, vector<24x8xbf16>, vector<512x8xf32> -> vector<512x8xf32>
    %83 = arith.addf %74, %82 : vector<512x8xf32>
    %cst_45 = arith.constant 0.000000e+00 : f32
    %84 = vector.broadcast %cst_45 : f32 to vector<512x8xf32>
    %85 = arith.maximumf %83, %84 : vector<512x8xf32>
    %86 = arith.truncf %85 : vector<512x8xf32> to vector<512x8xbf16>
    %c0_46 = arith.constant 0 : index
    %c0_47 = arith.constant 0 : index
    %87 = vector.load %arg4[%c0_46, %c0_47] : memref<8x3xbf16, #tpu.memory_space<vmem>>, vector<8x3xbf16>
    %cst_48 = arith.constant dense<0.000000e+00> : vector<512x3xf32>
    %88 = tpu.matmul %86, %87, %cst_48 {dimension_numbers = #tpu.dot_dimension_numbers<[1], [0], [0], [1], [0, 0, 1, 1], [], []>} : vector<512x8xbf16>, vector<8x3xbf16>, vector<512x3xf32> -> vector<512x3xf32>
    %c0_49 = arith.constant 0 : index
    %c0_50 = arith.constant 0 : index
    %89 = vector.load %arg5[%c0_49, %c0_50] : memref<1x3xf32, #tpu.memory_space<vmem>>, vector<1x3xf32>
    %90 = vector.broadcast %89 : vector<1x3xf32> to vector<512x3xf32>
    %91 = arith.addf %88, %90 : vector<512x3xf32>
    %cst_51 = arith.constant dense<0xFF800000> : vector<512xf32>
    %92 = vector.multi_reduction <maximumf>, %91, %cst_51 [1] : vector<512x3xf32> to vector<512xf32>
    %93 = vector.shape_cast %92 : vector<512xf32> to vector<512x1xf32>
    %94 = vector.broadcast %93 : vector<512x1xf32> to vector<512x3xf32>
    %95 = arith.subf %91, %94 : vector<512x3xf32>
    %96 = math.exp %95 : vector<512x3xf32>
    %cst_52 = arith.constant dense<0.000000e+00> : vector<512xf32>
    %97 = vector.multi_reduction <add>, %96, %cst_52 [1] : vector<512x3xf32> to vector<512xf32>
    %98 = vector.shape_cast %97 : vector<512xf32> to vector<512x1xf32>
    %99 = tpu.reciprocal %98 {approx = true} : vector<512x1xf32> -> vector<512x1xf32>
    %100 = vector.broadcast %99 : vector<512x1xf32> to vector<512x3xf32>
    %101 = arith.mulf %96, %100 : vector<512x3xf32>
    %c0_53 = arith.constant 0 : index
    %c0_54 = arith.constant 0 : index
    %102 = vector.load %arg6[%c0_53, %c0_54] : memref<512x3xf32, #tpu.memory_space<vmem>>, vector<512x3xf32>
    tpu.vector_store %arg6[%c0_53, %c0_54], %101 {strides = array<i32>} : memref<512x3xf32, #tpu.memory_space<vmem>>, vector<512x3xf32>,
    return
  }
  func.func @transform_0(%arg0: i32) -> (i32, i32) {
    %c0_i32 = arith.constant 0 : i32
    %c0_i32_0 = arith.constant 0 : i32
    %c0_i32_1 = arith.constant 0 : i32
    return %c0_i32, %c0_i32_0 : i32, i32
  }
  func.func @transform_1(%arg0: i32) -> (i32, i32, i32) {
    %c0_i32 = arith.constant 0 : i32
    %c0_i32_0 = arith.constant 0 : i32
    %c0_i32_1 = arith.constant 0 : i32
    %c0_i32_2 = arith.constant 0 : i32
    return %c0_i32, %c0_i32_0, %c0_i32_1 : i32, i32, i32
  }
  func.func @transform_2(%arg0: i32) -> (i32, i32) {
    %c0_i32 = arith.constant 0 : i32
    %c0_i32_0 = arith.constant 0 : i32
    %c0_i32_1 = arith.constant 0 : i32
    return %c0_i32, %c0_i32_0 : i32, i32
  }
  func.func @transform_3(%arg0: i32) -> (i32, i32) {
    %c0_i32 = arith.constant 0 : i32
    %c0_i32_0 = arith.constant 0 : i32
    %c0_i32_1 = arith.constant 0 : i32
    return %c0_i32, %c0_i32_0 : i32, i32
  }
  func.func @transform_4(%arg0: i32) -> (i32, i32) {
    %c0_i32 = arith.constant 0 : i32
    %c0_i32_0 = arith.constant 0 : i32
    %c0_i32_1 = arith.constant 0 : i32
    return %c0_i32, %c0_i32_0 : i32, i32
  }
  func.func @transform_5(%arg0: i32) -> (i32, i32) {
    %c0_i32 = arith.constant 0 : i32
    %c0_i32_0 = arith.constant 0 : i32
    return %arg0, %c0_i32 : i32, i32
  }
}

</mosaic_0001>

<bundles_post_ra>
// kernel: tile.8
= control target key start
LH: loop header
LB: loop body
LE: loop exit
PB: predicated region body
PF: predicated region fallthrough
CT: control target
= control target key end

     0   :  { %2 = vsyncpa [#allocation1], 0  ;;  %s44_s6 = smov [#allocation0]   ;;  %s70_s0 = inlined_call_operand.hbm [shape: f32[8], index: 0, kind: input, shape index: {}]   ;;  %s71_s1 = inlined_call_operand.vmem [shape: f32[8,8], index: 1, kind: output, shape index: {}]  }
   0x1   :  { %s9_s7 = sshll.u32 %s44_s6, 4  ;;  %s20_s10 = scalar_lea.hbm %s70_s0, 16  ;;  %s10_s7 = int_to_ptr.vmem [resolvable:$true] %s9_s7 }
   0x2   :  { %p21_p0 = scmp.ne.s32.totalorder %s70_s0, %s20_s10  ;;  %p24_p1 = scmp.lt.u32.totalorder %s20_s10, %s70_s0 }
   0x4   :  { %p26_p2 = pnand %p24_p1, %p21_p0 }
   0x6   :  { %29 = shalt.err (!%p26_p2)
}
   0x7   :  { %s30_s15 = scalar_lea.vmem %s10_s7, 16  ;;  %s34_s16 = scalar_lea.vmem %s10_s7, 32 }
   0x8   :  { %p31_p3 = scmp.ne.s32.totalorder %s10_s7, %s30_s15  ;;  %p35_p4 = scmp.lt.s32.totalorder %s10_s7, %s10_s7 }
   0x9   :  { %p36_p5 = scmp.lt.s32.totalorder %s34_s16, %s30_s15 }
   0xb   :  { %p37_p6 = por %p36_p5, %p35_p4 }
   0xd   :  { %p38_p7 = pnand %p37_p6, %p31_p3 }
   0xf   :  { %41 = shalt.err (!%p38_p7)
}
  0x10   :  { %12 = dma.hbm_to_vmem [thread:$0]  %s70_s0, 16, %s10_s7, [#allocation1]  }
  0x11   :  { %42 = dma.done.wait [#allocation1], 16  }
  0x12   :  { %43 = vsyncadd [#allocation1], 4294967280  ;;  %v16_v0 = vld [vmem:[#allocation0] ss:$0 sm:$0xff] }
  0x13   :  { %17 = vst [vmem:[%s71_s1] sm:$0xff] %v16_v0 }
  0x14   :  { %18 = vsyncpa [#allocation1], 1 }

// kernel: tile.9
= control target key start
LH: loop header
LB: loop body
LE: loop exit
PB: predicated region body
PF: predicated region fallthrough
CT: control target
= control target key end

     0   :  { %s67_s10 = smov 56   ;;  %s68_s11 = smov 40   ;;  %vm3_vm0 = vcmask 64512   ;;  %vm9_vm1 = vcmask 523712   ;;  %vm15_vm2 = vcmask 458112   ;;  %vm21_vm3 = vcmask 392512   ;;  %s111_s0 = inlined_call_operand.vmem [shape: f32[8,8], index: 0, kind: input, shape index: {}]   ;;  %s112_s1 = inlined_call_operand.vmem [shape: f32[1,64], index: 1, kind: output, shape index: {}]  }
   0x1   :  { %v53_v0 = vld [vmem:[%s111_s0 + $0x7] sm:$0x1]   ;;  %v55_v1 = vld [vmem:[%s111_s0 + $0x5] sm:$0x1]   ;;  %v54_v2 = vld [vmem:[%s111_s0 + $0x6] sm:$0x1]  }
   0x2   :  { %7 = vrot.lane.b32.xlu0 %v53_v0, %s67_s10  ;;  %19 = vrot.lane.b32.xlu1 %v55_v1, %s68_s11  ;;  %v56_v3 = vld [vmem:[%s111_s0 + $0x4] sm:$0x1]   ;;  %v2_v4 = vld [vmem:[%s111_s0] sm:$0x1]   ;;  %s69_s18 = smov 48   ;;  %s70_s19 = smov 32  }
   0x3   :  { %4 = vst.msk [vmem:[#allocation0] sm:$0x1] %vm3_vm0, %v2_v4   ;;  %v57_v5 = vld [vmem:[%s111_s0 + $0x3] sm:$0x1]   ;;  %v58_v6 = vld [vmem:[%s111_s0 + $0x2] sm:$0x1]  }
   0x4   :  { %s71_s24 = smov 24   ;;  %s72_s25 = smov 16   ;;  %v59_v7 = vld [vmem:[%s111_s0 + $0x1] sm:$0x1]   ;;  %vm27_vm4 = vcmask 326912   ;;  %vm33_vm5 = vcmask 261312  }
   0x5   :  { %s73_s0 = smov 8   ;;  %vm39_vm6 = vcmask 195712   ;;  %vm45_vm7 = vcmask 130112  }
   0x6   :  { %13 = vrot.lane.b32.xlu0 %v54_v2, %s69_s18  ;;  %25 = vrot.lane.b32.xlu1 %v56_v3, %s70_s19 }
   0xa   :  { %31 = vrot.lane.b32.xlu0 %v57_v5, %s71_s24  ;;  %37 = vrot.lane.b32.xlu1 %v58_v6, %s72_s25 }
   0xe   :  { %43 = vrot.lane.b32.xlu0 %v59_v7, %s73_s0 }
  0x74   :  { %v8_v8 = vpop.permute.xlu0 %7   ;;  %v20_v9 = vpop.permute.xlu1 %19  }
  0x75   :  { %10 = vst.msk [vmem:[#allocation0] sm:$0x1] %vm9_vm1, %v8_v8  }
  0x78   :  { %v14_v10 = vpop.permute.xlu0 %13   ;;  %v26_v11 = vpop.permute.xlu1 %25  }
  0x79   :  { %16 = vst.msk [vmem:[#allocation0] sm:$0x1] %vm15_vm2, %v14_v10  }
  0x7a   :  { %22 = vst.msk [vmem:[#allocation0] sm:$0x1] %vm21_vm3, %v20_v9  }
  0x7b   :  { %28 = vst.msk [vmem:[#allocation0] sm:$0x1] %vm27_vm4, %v26_v11  }
  0x7c   :  { %v32_v12 = vpop.permute.xlu0 %31   ;;  %v38_v13 = vpop.permute.xlu1 %37  }
  0x7d   :  { %34 = vst.msk [vmem:[#allocation0] sm:$0x1] %vm33_vm5, %v32_v12  }
  0x7e   :  { %40 = vst.msk [vmem:[#allocation0] sm:$0x1] %vm39_vm6, %v38_v13  }
  0x80   :  { %v44_v14 = vpop.permute.xlu0 %43  }
  0x81   :  { %46 = vst.msk [vmem:[#allocation0] sm:$0x1] %vm45_vm7, %v44_v14  }
  0x88   :  { %v50_v15 = vld [vmem:[#allocation0] sm:$0x1] }
  0x89   :  { %52 = vst [vmem:[%s112_s1] sm:$0x1] %v50_v15 }

// kernel: decoder_block3d_forward.3
= control target key start
LH: loop header
LB: loop body
LE: loop exit
PB: predicated region body
PF: predicated region fallthrough
CT: control target
= control target key end

     0   :  { %vm86_vm0 = vcmask 130048   ;;  %vm272_vm1 = vcmask 519168   ;;  %s503_s1 = inlined_call_operand.vmem [shape: bf16[16,64], index: 1, kind: input, shape index: {}]   ;;  %s504_s0 = inlined_call_operand.vmem [shape: bf16[128,16], index: 0, kind: input, shape index: {}]   ;;  %s505_s2 = inlined_call_operand.vmem [shape: f32[1,64], index: 2, kind: input, shape index: {}]   ;;  %s506_s3 = inlined_call_operand.vmem [shape: bf16[128,64], index: 3, kind: output, shape index: {}]  }
   0x1   :  { %v372_v0 = vld [vmem:[%s503_s1] sm:$0xff]   ;;  %v375_v3 = vld [vmem:[%s504_s0 + $0x8] sm:$0xff]   ;;  %v377_v5 = vld [vmem:[%s504_s0 + $0x10] sm:$0xff]  }
   0x2   :  { %v373_v1 = vld [vmem:[%s504_s0] sm:$0xff]   ;;  %352 = vmatprep.subr.bf16.mxu0 %v372_v0  ;;  %370 = vmatprep.subr.bf16.mxu1 %v372_v0  ;;  %v376_v4 = vld [vmem:[%s504_s0 + $0x28] sm:$0xff]   ;;  %v378_v6 = vld [vmem:[%s504_s0 + $0x30] sm:$0xff]  }
   0x3   :  { %v374_v2 = vld [vmem:[%s504_s0 + $0x20] sm:$0xff]   ;;  %353 = vmatpush3.bf16.msra.mxu0 %v372_v0  ;;  %371 = vmatpush3.bf16.msra.mxu1 %v372_v0  ;;  %v379_v7 = vld [vmem:[%s504_s0 + $0x18] sm:$0xff]  }
   0x4   :  { %354 = vmatprep.mubr.msk.bf16.mxu0 %vm86_vm0, %v373_v1  ;;  %362 = vmatprep.mubr.msk.bf16.mxu1 %vm86_vm0, %v374_v2  ;;  %v380_v8 = vld [vmem:[%s504_s0 + $0x38] sm:$0xff]   ;;  %v293_v9 = vld [vmem:[%s505_s2] ss:$0 sm:$0xff] }
   0x6   :  { %355 = vmatmul.mubr.msk.bf16.vlgmr.msra.gmra.mrb[0].mxu0 %vm86_vm0, %v375_v3  ;;  %363 = vmatmul.mubr.msk.bf16.vlgmr.msra.gmra.mrb[0].mxu1 %vm86_vm0, %v376_v4 }
   0x7   :  { %358 = vmatprep.mubr.msk.bf16.mxu0 %vm86_vm0, %v377_v5  ;;  %366 = vmatprep.mubr.msk.bf16.mxu1 %vm86_vm0, %v378_v6 }
   0xe   :  { %359 = vmatmul.mubr.msk.bf16.gmra.mrb[4].mxu0 %vm86_vm0, %v379_v7  ;;  %367 = vmatmul.mubr.msk.bf16.gmra.mrb[4].mxu1 %vm86_vm0, %v380_v8 }
  0xd9   :  { %v356_v10 = vpop.f32.mrb[0].mxu0  ;;  %v364_v11 = vpop.f32.mrb[0].mxu1 }
  0xda   :  { %v154_v12 = vadd.f32 %v356_v10, %v293_v9  ;;  %v186_v13 = vadd.f32 %v364_v11, %v293_v9  ;;  %v145_v14 = vpop.f32.mrb[1].mxu0  ;;  %v177_v15 = vpop.f32.mrb[1].mxu1 }
  0xdb   :  { %v146_v16 = vadd.f32 %v293_v9, %v145_v14  ;;  %v178_v17 = vadd.f32 %v293_v9, %v177_v15  ;;  %v357_v18 = vpop.f32.mrb[2].mxu0  ;;  %v365_v19 = vpop.f32.mrb[2].mxu1 }
  0xdc   :  { %v329_v20 = vpack.c.bf16 %v154_v12, %v154_v12  ;;  %v337_v21 = vpack.c.bf16 %v186_v13, %v186_v13  ;;  %v157_v22 = vadd.f32 %v357_v18, %v293_v9  ;;  %v189_v23 = vadd.f32 %v365_v19, %v293_v9  ;;  %v148_v24 = vpop.f32.mrb[3].mxu0  ;;  %v180_v25 = vpop.f32.mrb[3].mxu1 }
  0xdd   :  { %v327_v26 = vpack.c.bf16 %v146_v16, %v146_v16  ;;  %v335_v27 = vpack.c.bf16 %v178_v17, %v178_v17  ;;  %v149_v28 = vadd.f32 %v293_v9, %v148_v24  ;;  %v181_v29 = vadd.f32 %v293_v9, %v180_v25 }
  0xde   :  { %275 = vst.msk [vmem:[%s506_s3 + $0x8] sm:$0xf] %vm272_vm1, %v329_v20  ;;  %283 = vst.msk [vmem:[%s506_s3 + $0x28] sm:$0xf] %vm272_vm1, %v337_v21  ;;  %v330_v30 = vpack.c.bf16 %v157_v22, %v157_v22  ;;  %v338_v31 = vpack.c.bf16 %v189_v23, %v189_v23 }
  0xdf   :  { %273 = vst.msk [vmem:[%s506_s3] sm:$0xf] %vm272_vm1, %v327_v26  ;;  %281 = vst.msk [vmem:[%s506_s3 + $0x20] sm:$0xf] %vm272_vm1, %v335_v27  ;;  %v328_v32 = vpack.c.bf16 %v149_v28, %v149_v28  ;;  %v336_v33 = vpack.c.bf16 %v181_v29, %v181_v29 }
  0xe0   :  { %276 = vst.msk [vmem:[%s506_s3 + $0xc] sm:$0xf] %vm272_vm1, %v330_v30  ;;  %284 = vst.msk [vmem:[%s506_s3 + $0x2c] sm:$0xf] %vm272_vm1, %v338_v31 }
  0xe1   :  { %274 = vst.msk [vmem:[%s506_s3 + $0x4] sm:$0xf] %vm272_vm1, %v328_v32  ;;  %282 = vst.msk [vmem:[%s506_s3 + $0x24] sm:$0xf] %vm272_vm1, %v336_v33  ;;  %v360_v34 = vpop.f32.mrb[4].mxu0  ;;  %v368_v35 = vpop.f32.mrb[4].mxu1 }
  0xe2   :  { %v170_v36 = vadd.f32 %v360_v34, %v293_v9  ;;  %v202_v37 = vadd.f32 %v368_v35, %v293_v9  ;;  %v161_v38 = vpop.f32.mrb[5].mxu0  ;;  %v193_v39 = vpop.f32.mrb[5].mxu1 }
  0xe3   :  { %v162_v40 = vadd.f32 %v293_v9, %v161_v38  ;;  %v194_v41 = vadd.f32 %v293_v9, %v193_v39  ;;  %v361_v42 = vpop.f32.mrb[6].mxu0  ;;  %v369_v43 = vpop.f32.mrb[6].mxu1 }
  0xe4   :  { %v333_v44 = vpack.c.bf16 %v170_v36, %v170_v36  ;;  %v341_v45 = vpack.c.bf16 %v202_v37, %v202_v37  ;;  %v173_v46 = vadd.f32 %v361_v42, %v293_v9  ;;  %v205_v47 = vadd.f32 %v369_v43, %v293_v9  ;;  %v164_v48 = vpop.f32.mrb[7].mxu0  ;;  %v196_v49 = vpop.f32.mrb[7].mxu1 }
  0xe5   :  { %v331_v50 = vpack.c.bf16 %v162_v40, %v162_v40  ;;  %v339_v51 = vpack.c.bf16 %v194_v41, %v194_v41  ;;  %v165_v52 = vadd.f32 %v293_v9, %v164_v48  ;;  %v197_v53 = vadd.f32 %v293_v9, %v196_v49 }
  0xe6   :  { %279 = vst.msk [vmem:[%s506_s3 + $0x18] sm:$0xf] %vm272_vm1, %v333_v44  ;;  %287 = vst.msk [vmem:[%s506_s3 + $0x38] sm:$0xf] %vm272_vm1, %v341_v45  ;;  %v334_v54 = vpack.c.bf16 %v173_v46, %v173_v46  ;;  %v342_v55 = vpack.c.bf16 %v205_v47, %v205_v47 }
  0xe7   :  { %277 = vst.msk [vmem:[%s506_s3 + $0x10] sm:$0xf] %vm272_vm1, %v331_v50  ;;  %285 = vst.msk [vmem:[%s506_s3 + $0x30] sm:$0xf] %vm272_vm1, %v339_v51  ;;  %v332_v56 = vpack.c.bf16 %v165_v52, %v165_v52  ;;  %v340_v57 = vpack.c.bf16 %v197_v53, %v197_v53 }
  0xe8   :  { %280 = vst.msk [vmem:[%s506_s3 + $0x1c] sm:$0xf] %vm272_vm1, %v334_v54  ;;  %288 = vst.msk [vmem:[%s506_s3 + $0x3c] sm:$0xf] %vm272_vm1, %v342_v55 }
  0xe9   :  { %278 = vst.msk [vmem:[%s506_s3 + $0x14] sm:$0xf] %vm272_vm1, %v332_v56  ;;  %286 = vst.msk [vmem:[%s506_s3 + $0x34] sm:$0xf] %vm272_vm1, %v340_v57 }

// kernel: decoder_block3d_forward.4
= control target key start
LH: loop header
LB: loop body
LE: loop exit
PB: predicated region body
PF: predicated region fallthrough
CT: control target
= control target key end

     0   :  { %s5325_s12 = smov 0   ;;  %s5907_s0 = inlined_call_operand.vmem [shape: bf16[3680,48], index: 0, kind: input, shape index: {}]   ;;  %s5908_s1 = inlined_call_operand.vmem [shape: bf16[9,48,8], index: 1, kind: input, shape index: {}]   ;;  %s5909_s2 = inlined_call_operand.vmem [shape: f32[1,8], index: 2, kind: input, shape index: {}]   ;;  %s5910_s3 = inlined_call_operand.vmem [shape: bf16[3328,8], index: 3, kind: output, shape index: {}]  }
   0x1 LB: > { %s3862_s13 = sadd.s32 4294967295, %s5303_s12   ;;  %p3865_p0 = scmp.ge.s32.totalorder %s5303_s12, 1  ;;  %s5303_s12 = sphi %s5325_s12, %s13_s12  }
   0x2   : > { %p127_p1 = scmp.lt.s32.totalorder %s5303_s12, 14 }
   0x4   : > { %p128_p2 = pnand %p3865_p0, %p127_p1 }
   0x5   : > { %v5123_v0 = vld [vmem:[%s5908_s1] sm:$0xff] (!%p128_p2)   ;;  %s5338_s16 = sshll.u32 (!%p128_p2), %s3862_s13, 8  ;;  %v5125_v2 = vld [vmem:[%s5908_s1 + $0x8] sm:$0xff] (!%p128_p2)   ;;  %vm301_vm0 = vcmask (!%p128_p2), 392192   ;;  %v5127_v4 = vld [vmem:[%s5908_s1 + $0x10] sm:$0xff] (!%p128_p2)   ;;  %vm3767_vm1 = vcmask (!%p128_p2), 60416  }
   0x6   : > { %131 = sbr.rel (%p128_p2) target bundleno = 522 (0x20a), region = 32  ;;  %v5124_v1 = vld [vmem:[%s5908_s1 + $0x60] sm:$0xff] (!%p128_p2)   ;;  %s161_s19 = sshra.s32 (!%p128_p2), %s5338_s16, 3  ;;  %4479 = vmatprep.subr.bf16.mxu1 (!%p128_p2), %v5123_v0  ;;  %v5126_v3 = vld [vmem:[%s5908_s1 + $0x68] sm:$0xff] (!%p128_p2)   ;;  %v5128_v5 = vld [vmem:[%s5908_s1 + $0x70] sm:$0xff] (!%p128_p2)  }
   0x7   : > { %s3870_s22 = sshll.u32 (!%p128_p2), %s161_s19, 2  ;;  %4631 = vmatprep.subr.bf16.mxu0 (!%p128_p2), %v5124_v1  ;;  %4480 = vmatpush3.bf16.msra.mxu1 (!%p128_p2), %v5123_v0  ;;  %s1692_s30 = sadd.s32 (!%p128_p2), 176, %s5338_s16  ;;  %v5132_v9 = vld [vmem:[%s5908_s1 + $0x18] sm:$0xff] (!%p128_p2)   ;;  %v5139_v14 = vld [vmem:[%s5908_s1 + $0x80] sm:$0xff] (!%p128_p2)   ;;  %v5149_v22 = vld [vmem:[%s5908_s1 + $0x88] sm:$0xff] (!%p128_p2)  }
   0x8   : > { %s5353_s27 = scalar_lea.vmem (!%p128_p2), %s5907_s0, %s3870_s22  ;;  %4632 = vmatpush3.bf16.msra.mxu0 (!%p128_p2), %v5124_v1  ;;  %4481 = vmatprep.subr.bf16.mxu1 (!%p128_p2), %v5125_v2  ;;  %s1693_s6 = sshra.s32 (!%p128_p2), %s1692_s30, 3  ;;  %v5134_v11 = vld [vmem:[%s5908_s1 + $0x78] sm:$0xff] (!%p128_p2)   ;;  %v5144_v19 = vld [vmem:[%s5908_s1 + $0x20] sm:$0xff] (!%p128_p2)   ;;  %v5154_v25 = vld [vmem:[%s5908_s1 + $0x90] sm:$0xff] (!%p128_p2)  }
   0x9   : > { %4633 = vmatprep.subr.bf16.mxu0 (!%p128_p2), %v5126_v3  ;;  %v5129_v6 = vld [vmem:[%s5353_s27] sm:$0xff] (!%p128_p2)   ;;  %s4032_s7 = sshll.u32 (!%p128_p2), %s1693_s6, 2  ;;  %v5131_v8 = vld [vmem:[%s5353_s27 + $0x8] sm:$0xff] (!%p128_p2)   ;;  %v5135_v12 = vld [vmem:[%s5353_s27 + $0x10] sm:$0xff] (!%p128_p2)   ;;  %s2075_s20 = sadd.s32 (!%p128_p2), 192, %s5338_s16 }
   0xa   : > { %s5366_s10 = scalar_lea.vmem (!%p128_p2), %s5907_s0, %s4032_s7  ;;  %4485 = vmatprep.mubr.msk.bf16.mxu1 (!%p128_p2), %vm301_vm0, %v5129_v6  ;;  %v5137_v15 = vld [vmem:[%s5353_s27 + $0x18] sm:$0xff] (!%p128_p2)   ;;  %v5140_v17 = vld [vmem:[%s5353_s27 + $0x20] sm:$0xff] (!%p128_p2)   ;;  %s2076_s23 = sshra.s32 (!%p128_p2), %s2075_s20, 3  ;;  %v5142_v20 = vld [vmem:[%s5353_s27 + $0x28] sm:$0xff] (!%p128_p2)  }
   0xb   : > { %4482 = vmatpush3.bf16.msra.mxu1 (!%p128_p2), %v5125_v2  ;;  %v5130_v7 = vld [vmem:[%s5366_s10] sm:$0xff] (!%p128_p2)   ;;  %v5133_v10 = vld [vmem:[%s5366_s10 + $0x8] sm:$0xff] (!%p128_p2)   ;;  %v5136_v13 = vld [vmem:[%s5366_s10 + $0x10] sm:$0xff] (!%p128_p2)   ;;  %s4074_s24 = sshll.u32 (!%p128_p2), %s2076_s23, 2  ;;  %s543_s8 = sadd.s32 (!%p128_p2), 16, %s5338_s16 }
   0xc   : > { %4634 = vmatpush3.bf16.msra.mxu0 (!%p128_p2), %v5126_v3  ;;  %4483 = vmatprep.subr.bf16.mxu1 (!%p128_p2), %v5127_v4  ;;  %v5138_v16 = vld [vmem:[%s5366_s10 + $0x18] sm:$0xff] (!%p128_p2)   ;;  %v5141_v18 = vld [vmem:[%s5366_s10 + $0x20] sm:$0xff] (!%p128_p2)   ;;  %v5143_v21 = vld [vmem:[%s5366_s10 + $0x28] sm:$0xff] (!%p128_p2)   ;;  %s5409_s30 = scalar_lea.vmem (!%p128_p2), %s5907_s0, %s4074_s24  ;;  %s544_s9 = sshra.s32 (!%p128_p2), %s543_s8, 3 }
   0xd   : > { %4635 = vmatprep.subr.bf16.mxu0 %v5128_v5  ;;  %4637 = vmatprep.mubr.msk.bf16.mxu0 %vm301_vm0, %v5130_v7  ;;  %v5145_v23 = vld [vmem:[%s5353_s27 + $0x30] sm:$0xff]   ;;  %v5147_v26 = vld [vmem:[%s5353_s27 + $0x38] sm:$0xff]   ;;  %v5150_v28 = vld [vmem:[%s5353_s27 + $0x40] sm:$0xff]   ;;  %s3906_s11 = sshll.u32 %s544_s9, 2  ;;  %s2458_s24 = sadd.s32 320, %s5338_s16 }
   0xe   : > { %v5146_v24 = vld [vmem:[%s5366_s10 + $0x30] sm:$0xff]   ;;  %v5148_v27 = vld [vmem:[%s5366_s10 + $0x38] sm:$0xff]   ;;  %v5151_v29 = vld [vmem:[%s5409_s30] sm:$0xff]   ;;  %s5441_s19 = scalar_lea.vmem %s5907_s0, %s3906_s11  ;;  %s2459_s25 = sshra.s32 %s2458_s24, 3 }
   0xf   : > { %4484 = vmatpush3.bf16.msra.mxu1 %v5127_v4  ;;  %v5159_v30 = vld [vmem:[%s5908_s1 + $0x28] sm:$0xff]   ;;  %v5155_v33 = vld [vmem:[%s5353_s27 + $0x50] sm:$0xff]   ;;  %v5168_v35 = vld [vmem:[%s5908_s1 + $0x98] sm:$0xff]   ;;  %s4116_s26 = sshll.u32 %s2459_s25, 2  ;;  %s2841_s23 = sadd.s32 336, %s5338_s16 }
  0x10   : > { %4636 = vmatpush3.bf16.msra.mxu0 %v5128_v5  ;;  %4517 = vmatprep.subr.bf16.mxu1 %v5132_v9  ;;  %v5152_v31 = vld [vmem:[%s5353_s27 + $0x48] sm:$0xff]   ;;  %v5156_v34 = vld [vmem:[%s5409_s30 + $0x10] sm:$0xff]   ;;  %v5157_v36 = vld [vmem:[%s5353_s27 + $0x58] sm:$0xff]   ;;  %s5474_s4 = scalar_lea.vmem %s5907_s0, %s4116_s26  ;;  %s2842_s24 = sshra.s32 %s2841_s23, 3 }
  0x11   : > { %4669 = vmatprep.subr.bf16.mxu0 %v5134_v11  ;;  %v5153_v32 = vld [vmem:[%s5409_s30 + $0x8] sm:$0xff]   ;;  %v5172_v37 = vld [vmem:[%s5908_s1 + $0x30] sm:$0xff]   ;;  %v5158_v38 = vld [vmem:[%s5409_s30 + $0x18] sm:$0xff]   ;;  %s4158_s25 = sshll.u32 %s2842_s24, 2  ;;  %s1309_s6 = sadd.s32 160, %s5338_s16 }
  0x12   : > { %4486 = vmatmul.mubr.msk.bf16.vlgmr.msra.gmra.mrb[0].mxu1 %vm301_vm0, %v5131_v8  ;;  %v5160_v39 = vld [vmem:[%s5353_s27 + $0x60] sm:$0xff]   ;;  %v5162_v42 = vld [vmem:[%s5353_s27 + $0x68] sm:$0xff]   ;;  %v5164_v44 = vld [vmem:[%s5353_s27 + $0x70] sm:$0xff]   ;;  %s5542_s29 = scalar_lea.vmem %s5907_s0, %s4158_s25  ;;  %s1310_s8 = sshra.s32 %s1309_s6, 3 }
  0x13   : > { %4638 = vmatmul.mubr.msk.bf16.vlgmr.msra.gmra.mrb[0].mxu0 %vm301_vm0, %v5133_v10  ;;  %4518 = vmatpush3.bf16.msra.mxu1 %v5132_v9  ;;  %v5161_v40 = vld [vmem:[%s5409_s30 + $0x20] sm:$0xff]   ;;  %v5163_v43 = vld [vmem:[%s5409_s30 + $0x28] sm:$0xff]   ;;  %v5165_v45 = vld [vmem:[%s5409_s30 + $0x30] sm:$0xff]   ;;  %s3990_s14 = sshll.u32 %s1310_s8, 2  ;;  %s3224_s21 = sadd.s32 352, %s5338_s16 }
  0x14   : > { %4670 = vmatpush3.bf16.msra.mxu0 %v5134_v11  ;;  %4489 = vmatprep.mubr.msk.bf16.mxu1 %vm301_vm0, %v5135_v12  ;;  %v5178_v41 = vld [vmem:[%s5908_s1 + $0xa0] sm:$0xff]   ;;  %v5166_v46 = vld [vmem:[%s5353_s27 + $0x78] sm:$0xff]   ;;  %v5482_v50 = vld [vmem:[%s5908_s1 + $0xa8] sm:$0xff]   ;;  %s926_s27 = sadd.s32 32, %s5338_s16  ;;  %s5579_s18 = scalar_lea.vmem %s5907_s0, %s3990_s14 }
  0x15   : > { %4641 = vmatprep.mubr.msk.bf16.mxu0 %vm301_vm0, %v5136_v13  ;;  %4671 = vmatprep.subr.bf16.mxu0 %v5139_v14  ;;  %v5167_v47 = vld [vmem:[%s5409_s30 + $0x38] sm:$0xff]   ;;  %v5169_v48 = vld [vmem:[%s5441_s19] sm:$0xff]   ;;  %v5171_v51 = vld [vmem:[%s5441_s19 + $0x8] sm:$0xff]   ;;  %s927_s9 = sshra.s32 %s926_s27, 3  ;;  %s3225_s22 = sshra.s32 %s3224_s21, 3 }
  0x16   : > { %4519 = vmatprep.subr.bf16.mxu1 %v5144_v19  ;;  %v5170_v49 = vld [vmem:[%s5409_s30 + $0x40] sm:$0xff]   ;;  %v5173_v52 = vld [vmem:[%s5409_s30 + $0x48] sm:$0xff]   ;;  %v5174_v53 = vld [vmem:[%s5441_s19 + $0x10] sm:$0xff]   ;;  %s3948_s15 = sshll.u32 %s927_s9, 2  ;;  %s4200_s23 = sshll.u32 %s3225_s22, 2 }
  0x17   : > { %4520 = vmatpush3.bf16.msra.mxu1 %v5144_v19  ;;  %v5175_v54 = vld [vmem:[%s5409_s30 + $0x50] sm:$0xff]   ;;  %v5183_v55 = vld [vmem:[%s5908_s1 + $0x38] sm:$0xff]   ;;  %v5197_v56 = vld [vmem:[%s5908_s1 + $0x40] sm:$0xff]   ;;  %s5510_s20 = scalar_lea.vmem %s5907_s0, %s3948_s15  ;;  %s5603_s24 = scalar_lea.vmem %s5907_s0, %s4200_s23 }
  0x18   : > { %4672 = vmatpush3.bf16.msra.mxu0 %v5139_v14  ;;  %4521 = vmatprep.subr.bf16.mxu1 %v5159_v30  ;;  %v5176_v57 = vld [vmem:[%s5441_s19 + $0x18] sm:$0xff]   ;;  %v5179_v59 = vld [vmem:[%s5441_s19 + $0x20] sm:$0xff]   ;;  %v5519_v61 = vld [vmem:[%s5908_s1 + $0x48] sm:$0xff]  }
  0x19   : > { %4673 = vmatprep.subr.bf16.mxu0 %v5149_v22  ;;  %v5177_v58 = vld [vmem:[%s5409_s30 + $0x58] sm:$0xff]   ;;  %v5180_v60 = vld [vmem:[%s5409_s30 + $0x60] sm:$0xff]   ;;  %v5181_v62 = vld [vmem:[%s5441_s19 + $0x28] sm:$0xff]  }
  0x1a   : > { %4490 = vmatmul.mubr.msk.bf16.gmra.mrb[4].mxu1 %vm301_vm0, %v5137_v15  ;;  %v5182_v63 = vld [vmem:[%s5409_s30 + $0x68] sm:$0xff]   ;;  %v5184_v0 = vld [vmem:[%s5441_s19 + $0x30] sm:$0xff]   ;;  %v5186_v2 = vld [vmem:[%s5441_s19 + $0x38] sm:$0xff]  }
  0x1b   : > { %4642 = vmatmul.mubr.msk.bf16.gmra.mrb[4].mxu0 %vm301_vm0, %v5138_v16  ;;  %4493 = vmatprep.mubr.msk.bf16.mxu1 %vm301_vm0, %v5140_v17  ;;  %v5185_v1 = vld [vmem:[%s5409_s30 + $0x70] sm:$0xff]   ;;  %v5187_v3 = vld [vmem:[%s5409_s30 + $0x78] sm:$0xff]   ;;  %v5188_v4 = vld [vmem:[%s5441_s19 + $0x40] sm:$0xff]  }
  0x1c   : > { %4645 = vmatprep.mubr.msk.bf16.mxu0 %vm301_vm0, %v5141_v18  ;;  %4674 = vmatpush3.bf16.msra.mxu0 %v5149_v22  ;;  %v5189_v5 = vld [vmem:[%s5474_s4] sm:$0xff]   ;;  %v5190_v6 = vld [vmem:[%s5441_s19 + $0x48] sm:$0xff]   ;;  %v5193_v8 = vld [vmem:[%s5441_s19 + $0x50] sm:$0xff]  }
  0x1d   : > { %4707 = vmatprep.subr.bf16.mxu0 %v5154_v25  ;;  %4522 = vmatpush3.bf16.msra.mxu1 %v5159_v30  ;;  %v5191_v7 = vld [vmem:[%s5474_s4 + $0x8] sm:$0xff]   ;;  %v5194_v9 = vld [vmem:[%s5474_s4 + $0x10] sm:$0xff]   ;;  %v5195_v11 = vld [vmem:[%s5441_s19 + $0x58] sm:$0xff]  }
  0x1e   : > { %4555 = vmatprep.subr.bf16.mxu1 %v5172_v37  ;;  %v5206_v10 = vld [vmem:[%s5908_s1 + $0xb0] sm:$0xff]   ;;  %v5216_v12 = vld [vmem:[%s5908_s1 + $0xb8] sm:$0xff]   ;;  %v5198_v14 = vld [vmem:[%s5441_s19 + $0x60] sm:$0xff]  }
  0x1f   : > { %v5196_v13 = vld [vmem:[%s5474_s4 + $0x18] sm:$0xff]   ;;  %v5199_v15 = vld [vmem:[%s5474_s4 + $0x20] sm:$0xff]   ;;  %v5200_v17 = vld [vmem:[%s5441_s19 + $0x68] sm:$0xff]  }
  0x20   : > { %v5568_v16 = vld [vmem:[%s5908_s1 + $0xc0] sm:$0xff]   ;;  %v5201_v18 = vld [vmem:[%s5474_s4 + $0x28] sm:$0xff]   ;;  %v5202_v19 = vld [vmem:[%s5441_s19 + $0x70] sm:$0xff]  }
  0x21   : > { %v5205_v22 = vld [vmem:[%s5474_s4 + $0x38] sm:$0xff]  }
  0x22   : > { %4494 = vmatmul.mubr.msk.bf16.gmra.mrb[8].mxu1 %vm301_vm0, %v5142_v20  ;;  %v5203_v20 = vld [vmem:[%s5474_s4 + $0x30] sm:$0xff]   ;;  %v5235_v30 = vld [vmem:[%s5908_s1 + $0x58] sm:$0xff]  }
  0x23   : > { %4646 = vmatmul.mubr.msk.bf16.gmra.mrb[8].mxu0 %vm301_vm0, %v5143_v21  ;;  %4497 = vmatprep.mubr.msk.bf16.mxu1 %vm301_vm0, %v5145_v23  ;;  %v5204_v21 = vld [vmem:[%s5441_s19 + $0x78] sm:$0xff]   ;;  %v5207_v23 = vld [vmem:[%s5510_s20] sm:$0xff]  }
  0x24   : > { %4649 = vmatprep.mubr.msk.bf16.mxu0 %vm301_vm0, %v5146_v24  ;;  %v5208_v24 = vld [vmem:[%s5474_s4 + $0x40] sm:$0xff]  }
  0x2a   : > { %4498 = vmatmul.mubr.msk.bf16.gmra.mrb[12].mxu1 %vm301_vm0, %v5147_v26  ;;  %v5211_v26 = vld [vmem:[%s5474_s4 + $0x48] sm:$0xff]  }
  0x2b   : > { %4650 = vmatmul.mubr.msk.bf16.gmra.mrb[12].mxu0 %vm301_vm0, %v5148_v27  ;;  %4501 = vmatprep.mubr.msk.bf16.mxu1 %vm301_vm0, %v5150_v28  ;;  %v5212_v27 = vld [vmem:[%s5510_s20 + $0x10] sm:$0xff]  }
  0x2c   : > { %4675 = vmatprep.mubr.msk.bf16.mxu0 %vm301_vm0, %v5151_v29  ;;  %v5213_v28 = vld [vmem:[%s5474_s4 + $0x50] sm:$0xff]  }
  0x2d   : > { %v5221_v29 = vld [vmem:[%s5908_s1 + $0x50] sm:$0xff]  }
  0x32   : > { %4502 = vmatmul.mubr.msk.bf16.gmra.mrb[16].mxu1 %vm301_vm0, %v5152_v31  ;;  %v5214_v31 = vld [vmem:[%s5510_s20 + $0x18] sm:$0xff]  }
  0x33   : > { %4676 = vmatmul.mubr.msk.bf16.vlgmr.msra.gmra.mrb[0].mxu0 %vm301_vm0, %v5153_v32  ;;  %4505 = vmatprep.mubr.msk.bf16.mxu1 %vm301_vm0, %v5155_v33  ;;  %v5215_v32 = vld [vmem:[%s5474_s4 + $0x58] sm:$0xff]   ;;  %v5217_v33 = vld [vmem:[%s5510_s20 + $0x20] sm:$0xff]  }
  0x34   : > { %4708 = vmatpush3.bf16.msra.mxu0 %v5154_v25  ;;  %4679 = vmatprep.mubr.msk.bf16.mxu0 %vm301_vm0, %v5156_v34  ;;  %v5209_v25 = vld [vmem:[%s5510_s20 + $0x8] sm:$0xff]   ;;  %v5218_v34 = vld [vmem:[%s5474_s4 + $0x60] sm:$0xff]  }
  0x35   : > { %4709 = vmatprep.subr.bf16.mxu0 %v5168_v35 }
  0x38   : > { %4710 = vmatpush3.bf16.msra.mxu0 %v5168_v35  ;;  %v5219_v35 = vld [vmem:[%s5510_s20 + $0x28] sm:$0xff]  }
  0x39   : > { %4711 = vmatprep.subr.bf16.mxu0 %v5178_v41 }
  0x3a   : > { %4506 = vmatmul.mubr.msk.bf16.gmra.mrb[20].mxu1 %vm301_vm0, %v5157_v36  ;;  %v5294_v36 = vld [vmem:[%s5908_s1 + $0x60] sm:$0xff]  }
  0x3b   : > { %4680 = vmatmul.mubr.msk.bf16.gmra.mrb[4].mxu0 %vm301_vm0, %v5158_v38  ;;  %4509 = vmatprep.mubr.msk.bf16.mxu1 %vm301_vm0, %v5160_v39  ;;  %v5222_v38 = vld [vmem:[%s5510_s20 + $0x30] sm:$0xff]  }
  0x3c   : > { %4683 = vmatprep.mubr.msk.bf16.mxu0 %vm301_vm0, %v5161_v40  ;;  %4712 = vmatpush3.bf16.msra.mxu0 %v5178_v41  ;;  %v5223_v39 = vld [vmem:[%s5474_s4 + $0x70] sm:$0xff]   ;;  %v5224_v40 = vld [vmem:[%s5510_s20 + $0x38] sm:$0xff]  }
  0x3d   : > { %4745 = vmatprep.subr.bf16.mxu0 %v5482_v50  ;;  %v5225_v41 = vld [vmem:[%s5474_s4 + $0x78] sm:$0xff]  }
  0x42   : > { %4510 = vmatmul.mubr.msk.bf16.gmra.mrb[24].mxu1 %vm301_vm0, %v5162_v42  ;;  %v5226_v42 = vld [vmem:[%s5510_s20 + $0x40] sm:$0xff]  }
  0x43   : > { %4684 = vmatmul.mubr.msk.bf16.gmra.mrb[8].mxu0 %vm301_vm0, %v5163_v43  ;;  %4513 = vmatprep.mubr.msk.bf16.mxu1 %vm301_vm0, %v5164_v44  ;;  %v5227_v43 = vld [vmem:[%s5542_s29] sm:$0xff]   ;;  %v5228_v44 = vld [vmem:[%s5510_s20 + $0x48] sm:$0xff]  }
  0x44   : > { %4687 = vmatprep.mubr.msk.bf16.mxu0 %vm301_vm0, %v5165_v45  ;;  %v5229_v45 = vld [vmem:[%s5542_s29 + $0x8] sm:$0xff]  }
  0x4a   : > { %4514 = vmatmul.mubr.msk.bf16.gmra.mrb[28].mxu1 %vm301_vm0, %v5166_v46  ;;  %v5231_v46 = vld [vmem:[%s5510_s20 + $0x50] sm:$0xff]  }
  0x4b   : > { %4688 = vmatmul.mubr.msk.bf16.gmra.mrb[12].mxu0 %vm301_vm0, %v5167_v47  ;;  %4523 = vmatprep.mubr.msk.bf16.mxu1 %vm301_vm0, %v5169_v48  ;;  %v5232_v47 = vld [vmem:[%s5542_s29 + $0x10] sm:$0xff]   ;;  %v5244_v48 = vld [vmem:[%s5908_s1 + $0xc8] sm:$0xff]  }
  0x4c   : > { %4691 = vmatprep.mubr.msk.bf16.mxu0 %vm301_vm0, %v5170_v49  ;;  %v5253_v49 = vld [vmem:[%s5908_s1 + $0xd0] sm:$0xff]  }
  0x52   : > { %4524 = vmatmul.mubr.msk.bf16.vlgmr.msra.gmra.mrb[0].mxu1 %vm301_vm0, %v5171_v51  ;;  %v5234_v51 = vld [vmem:[%s5542_s29 + $0x18] sm:$0xff]  }
  0x53   : > { %4692 = vmatmul.mubr.msk.bf16.gmra.mrb[16].mxu0 %vm301_vm0, %v5173_v52  ;;  %4556 = vmatpush3.bf16.msra.mxu1 %v5172_v37  ;;  %v5220_v37 = vld [vmem:[%s5474_s4 + $0x68] sm:$0xff]   ;;  %v5236_v52 = vld [vmem:[%s5510_s20 + $0x60] sm:$0xff]  }
  0x54   : > { %4527 = vmatprep.mubr.msk.bf16.mxu1 %vm301_vm0, %v5174_v53  ;;  %4695 = vmatprep.mubr.msk.bf16.mxu0 %vm301_vm0, %v5175_v54  ;;  %v5237_v53 = vld [vmem:[%s5542_s29 + $0x20] sm:$0xff]   ;;  %v5238_v54 = vld [vmem:[%s5510_s20 + $0x68] sm:$0xff]  }
  0x55   : > { %4557 = vmatprep.subr.bf16.mxu1 %v5183_v55 }
  0x57   : > { %4558 = vmatpush3.bf16.msra.mxu1 %v5183_v55  ;;  %v5239_v55 = vld [vmem:[%s5542_s29 + $0x28] sm:$0xff]  }
  0x58   : > { %4559 = vmatprep.subr.bf16.mxu1 %v5197_v56 }
  0x5a   : > { %4528 = vmatmul.mubr.msk.bf16.gmra.mrb[4].mxu1 %vm301_vm0, %v5176_v57  ;;  %v5241_v57 = vld [vmem:[%s5542_s29 + $0x30] sm:$0xff]  }
  0x5b   : > { %4696 = vmatmul.mubr.msk.bf16.gmra.mrb[20].mxu0 %vm301_vm0, %v5177_v58  ;;  %4531 = vmatprep.mubr.msk.bf16.mxu1 %vm301_vm0, %v5179_v59  ;;  %v5242_v58 = vld [vmem:[%s5510_s20 + $0x78] sm:$0xff]  }
  0x5c   : > { %4699 = vmatprep.mubr.msk.bf16.mxu0 %vm301_vm0, %v5180_v60  ;;  %4560 = vmatpush3.bf16.msra.mxu1 %v5197_v56  ;;  %v5240_v56 = vld [vmem:[%s5510_s20 + $0x70] sm:$0xff]   ;;  %v5243_v59 = vld [vmem:[%s5542_s29 + $0x38] sm:$0xff]   ;;  %v5245_v60 = vld [vmem:[%s5579_s18] sm:$0xff]  }
  0x5d   : > { %4593 = vmatprep.subr.bf16.mxu1 %v5519_v61 }
  0x62   : > { %4532 = vmatmul.mubr.msk.bf16.gmra.mrb[8].mxu1 %vm301_vm0, %v5181_v62  ;;  %v5247_v62 = vld [vmem:[%s5579_s18 + $0x8] sm:$0xff]  }
  0x63   : > { %4700 = vmatmul.mubr.msk.bf16.gmra.mrb[24].mxu0 %vm301_vm0, %v5182_v63  ;;  %4535 = vmatprep.mubr.msk.bf16.mxu1 %vm301_vm0, %v5184_v0  ;;  %v5248_v63 = vld [vmem:[%s5542_s29 + $0x48] sm:$0xff]   ;;  %v5249_v0 = vld [vmem:[%s5579_s18 + $0x10] sm:$0xff]  }
  0x64   : > { %4703 = vmatprep.mubr.msk.bf16.mxu0 %vm301_vm0, %v5185_v1  ;;  %v5250_v1 = vld [vmem:[%s5542_s29 + $0x50] sm:$0xff]  }
  0x6a   : > { %4536 = vmatmul.mubr.msk.bf16.gmra.mrb[12].mxu1 %vm301_vm0, %v5186_v2  ;;  %v5295_v2 = vld [vmem:[%s5908_s1 + $0x68] sm:$0xff]  }
  0x6b   : > { %4704 = vmatmul.mubr.msk.bf16.gmra.mrb[28].mxu0 %vm301_vm0, %v5187_v3  ;;  %4539 = vmatprep.mubr.msk.bf16.mxu1 %vm301_vm0, %v5188_v4  ;;  %v5251_v3 = vld [vmem:[%s5579_s18 + $0x18] sm:$0xff]  }
  0x6c   : > { %4713 = vmatprep.mubr.msk.bf16.mxu0 %vm301_vm0, %v5189_v5  ;;  %v5252_v4 = vld [vmem:[%s5542_s29 + $0x58] sm:$0xff]   ;;  %v5254_v5 = vld [vmem:[%s5579_s18 + $0x20] sm:$0xff]  }
  0x72   : > { %4540 = vmatmul.mubr.msk.bf16.gmra.mrb[16].mxu1 %vm301_vm0, %v5190_v6  ;;  %v5255_v6 = vld [vmem:[%s5542_s29 + $0x60] sm:$0xff]  }
  0x73   : > { %4714 = vmatmul.mubr.msk.bf16.vlgmr.msra.gmra.mrb[0].mxu0 %vm301_vm0, %v5191_v7  ;;  %4543 = vmatprep.mubr.msk.bf16.mxu1 %vm301_vm0, %v5193_v8  ;;  %v5296_v7 = vld [vmem:[%s5908_s1 + $0x70] sm:$0xff]   ;;  %v5256_v8 = vld [vmem:[%s5579_s18 + $0x28] sm:$0xff]  }
  0x74   : > { %4746 = vmatpush3.bf16.msra.mxu0 %v5482_v50  ;;  %4717 = vmatprep.mubr.msk.bf16.mxu0 %vm301_vm0, %v5194_v9  ;;  %v5233_v50 = vld [vmem:[%s5510_s20 + $0x58] sm:$0xff]   ;;  %v5257_v9 = vld [vmem:[%s5542_s29 + $0x68] sm:$0xff]  }
  0x75   : > { %4747 = vmatprep.subr.bf16.mxu0 %v5206_v10 }
  0x78   : > { %4748 = vmatpush3.bf16.msra.mxu0 %v5206_v10  ;;  %v5258_v10 = vld [vmem:[%s5579_s18 + $0x30] sm:$0xff]  }
  0x79   : > { %4749 = vmatprep.subr.bf16.mxu0 %v5216_v12 }
  0x7a   : > { %4544 = vmatmul.mubr.msk.bf16.gmra.mrb[20].mxu1 %vm301_vm0, %v5195_v11  ;;  %v5259_v11 = vld [vmem:[%s5542_s29 + $0x70] sm:$0xff]  }
  0x7b   : > { %4718 = vmatmul.mubr.msk.bf16.gmra.mrb[4].mxu0 %vm301_vm0, %v5196_v13  ;;  %4547 = vmatprep.mubr.msk.bf16.mxu1 %vm301_vm0, %v5198_v14  ;;  %v5261_v13 = vld [vmem:[%s5542_s29 + $0x78] sm:$0xff]   ;;  %v5262_v14 = vld [vmem:[%s5579_s18 + $0x40] sm:$0xff]  }
  0x7c   : > { %4721 = vmatprep.mubr.msk.bf16.mxu0 %vm301_vm0, %v5199_v15  ;;  %4750 = vmatpush3.bf16.msra.mxu0 %v5216_v12  ;;  %v5260_v12 = vld [vmem:[%s5579_s18 + $0x38] sm:$0xff]   ;;  %v5263_v15 = vld [vmem:[%s5603_s24] sm:$0xff]  }
  0x7d   : > { %4783 = vmatprep.subr.bf16.mxu0 %v5568_v16 }
  0x82   : > { %4548 = vmatmul.mubr.msk.bf16.gmra.mrb[24].mxu1 %vm301_vm0, %v5200_v17  ;;  %v5265_v17 = vld [vmem:[%s5603_s24 + $0x8] sm:$0xff]  }
  0x83   : > { %4722 = vmatmul.mubr.msk.bf16.gmra.mrb[8].mxu0 %vm301_vm0, %v5201_v18  ;;  %4551 = vmatprep.mubr.msk.bf16.mxu1 %vm301_vm0, %v5202_v19  ;;  %v5266_v18 = vld [vmem:[%s5579_s18 + $0x50] sm:$0xff]  }
  0x84   : > { %4725 = vmatprep.mubr.msk.bf16.mxu0 %vm301_vm0, %v5203_v20  ;;  %v5267_v19 = vld [vmem:[%s5603_s24 + $0x10] sm:$0xff]   ;;  %v5268_v20 = vld [vmem:[%s5579_s18 + $0x58] sm:$0xff]  }
  0x8a   : > { %4552 = vmatmul.mubr.msk.bf16.gmra.mrb[28].mxu1 %vm301_vm0, %v5204_v21  ;;  %v5269_v21 = vld [vmem:[%s5603_s24 + $0x18] sm:$0xff]  }
  0x8b   : > { %4726 = vmatmul.mubr.msk.bf16.gmra.mrb[12].mxu0 %vm301_vm0, %v5205_v22  ;;  %4561 = vmatprep.mubr.msk.bf16.mxu1 %vm301_vm0, %v5207_v23  ;;  %v5270_v22 = vld [vmem:[%s5579_s18 + $0x60] sm:$0xff]  }
  0x8c   : > { %4729 = vmatprep.mubr.msk.bf16.mxu0 %vm301_vm0, %v5208_v24  ;;  %v5271_v23 = vld [vmem:[%s5603_s24 + $0x20] sm:$0xff]   ;;  %v5272_v24 = vld [vmem:[%s5579_s18 + $0x68] sm:$0xff]  }
  0x92   : > { %4562 = vmatmul.mubr.msk.bf16.vlgmr.msra.gmra.mrb[0].mxu1 %vm301_vm0, %v5209_v25  ;;  %v5273_v25 = vld [vmem:[%s5603_s24 + $0x28] sm:$0xff]  }
  0x93   : > { %4730 = vmatmul.mubr.msk.bf16.gmra.mrb[16].mxu0 %vm301_vm0, %v5211_v26  ;;  %4594 = vmatpush3.bf16.msra.mxu1 %v5519_v61  ;;  %v5246_v61 = vld [vmem:[%s5542_s29 + $0x40] sm:$0xff]   ;;  %v5274_v26 = vld [vmem:[%s5579_s18 + $0x70] sm:$0xff]  }
  0x94   : > { %4565 = vmatprep.mubr.msk.bf16.mxu1 %vm301_vm0, %v5212_v27  ;;  %4733 = vmatprep.mubr.msk.bf16.mxu0 %vm301_vm0, %v5213_v28  ;;  %v5275_v27 = vld [vmem:[%s5603_s24 + $0x30] sm:$0xff]   ;;  %v5276_v28 = vld [vmem:[%s5579_s18 + $0x78] sm:$0xff]  }
  0x95   : > { %4595 = vmatprep.subr.bf16.mxu1 %v5221_v29 }
  0x97   : > { %4596 = vmatpush3.bf16.msra.mxu1 %v5221_v29  ;;  %v5277_v29 = vld [vmem:[%s5603_s24 + $0x38] sm:$0xff]  }
  0x98   : > { %4597 = vmatprep.subr.bf16.mxu1 %v5235_v30 }
  0x9a   : > { %4566 = vmatmul.mubr.msk.bf16.gmra.mrb[4].mxu1 %vm301_vm0, %v5214_v31  ;;  %v5279_v31 = vld [vmem:[%s5603_s24 + $0x40] sm:$0xff]  }
  0x9b   : > { %4734 = vmatmul.mubr.msk.bf16.gmra.mrb[20].mxu0 %vm301_vm0, %v5215_v32  ;;  %4569 = vmatprep.mubr.msk.bf16.mxu1 %vm301_vm0, %v5217_v33  ;;  %v5280_v32 = vld [vmem:[%s5366_s10 + $0x48] sm:$0xff]  }
  0x9c   : > { %4737 = vmatprep.mubr.msk.bf16.mxu0 %vm301_vm0, %v5218_v34  ;;  %4598 = vmatpush3.bf16.msra.mxu1 %v5235_v30  ;;  %v5278_v30 = vld [vmem:[%s5366_s10 + $0x40] sm:$0xff]   ;;  %v5281_v33 = vld [vmem:[%s5603_s24 + $0x48] sm:$0xff]   ;;  %v5282_v34 = vld [vmem:[%s5366_s10 + $0x50] sm:$0xff]  }
  0x9d   : > { %4821 = vmatprep.subr.bf16.mxu1 %v5294_v36 }
  0xa2   : > { %4570 = vmatmul.mubr.msk.bf16.gmra.mrb[8].mxu1 %vm301_vm0, %v5219_v35  ;;  %v5283_v35 = vld [vmem:[%s5603_s24 + $0x50] sm:$0xff]  }
  0xa3   : > { %4738 = vmatmul.mubr.msk.bf16.gmra.mrb[24].mxu0 %vm301_vm0, %v5220_v37  ;;  %4573 = vmatprep.mubr.msk.bf16.mxu1 %vm301_vm0, %v5222_v38  ;;  %v5285_v37 = vld [vmem:[%s5603_s24 + $0x58] sm:$0xff]   ;;  %v5286_v38 = vld [vmem:[%s5366_s10 + $0x60] sm:$0xff]  }
  0xa4   : > { %4741 = vmatprep.mubr.msk.bf16.mxu0 %vm301_vm0, %v5223_v39  ;;  %v5287_v39 = vld [vmem:[%s5603_s24 + $0x60] sm:$0xff]  }
  0xaa   : > { %4574 = vmatmul.mubr.msk.bf16.gmra.mrb[12].mxu1 %vm301_vm0, %v5224_v40  ;;  %v5288_v40 = vld [vmem:[%s5366_s10 + $0x68] sm:$0xff]  }
  0xab   : > { %4742 = vmatmul.mubr.msk.bf16.gmra.mrb[28].mxu0 %vm301_vm0, %v5225_v41  ;;  %4577 = vmatprep.mubr.msk.bf16.mxu1 %vm301_vm0, %v5226_v42  ;;  %v5289_v41 = vld [vmem:[%s5603_s24 + $0x68] sm:$0xff]   ;;  %v5290_v42 = vld [vmem:[%s5366_s10 + $0x70] sm:$0xff]  }
  0xac   : > { %4751 = vmatprep.mubr.msk.bf16.mxu0 %vm301_vm0, %v5227_v43  ;;  %v5291_v43 = vld [vmem:[%s5603_s24 + $0x70] sm:$0xff]  }
  0xb2   : > { %4578 = vmatmul.mubr.msk.bf16.gmra.mrb[16].mxu1 %vm301_vm0, %v5228_v44  ;;  %v5292_v44 = vld [vmem:[%s5366_s10 + $0x78] sm:$0xff]  }
  0xb3   : > { %4752 = vmatmul.mubr.msk.bf16.vlgmr.msra.gmra.mrb[0].mxu0 %vm301_vm0, %v5229_v45  ;;  %4581 = vmatprep.mubr.msk.bf16.mxu1 %vm301_vm0, %v5231_v46  ;;  %v5293_v45 = vld [vmem:[%s5603_s24 + $0x78] sm:$0xff]  }
  0xb4   : > { %4784 = vmatpush3.bf16.msra.mxu0 %v5568_v16  ;;  %4755 = vmatprep.mubr.msk.bf16.mxu0 %vm301_vm0, %v5232_v47  ;;  %v5264_v16 = vld [vmem:[%s5579_s18 + $0x48] sm:$0xff]  }
  0xb5   : > { %4785 = vmatprep.subr.bf16.mxu0 %v5244_v48 }
  0xb8   : > { %4786 = vmatpush3.bf16.msra.mxu0 %v5244_v48 }
  0xb9   : > { %4787 = vmatprep.subr.bf16.mxu0 %v5253_v49 }
  0xba   : > { %4582 = vmatmul.mubr.msk.bf16.gmra.mrb[20].mxu1 %vm301_vm0, %v5233_v50 }
  0xbb   : > { %4756 = vmatmul.mubr.msk.bf16.gmra.mrb[4].mxu0 %vm301_vm0, %v5234_v51  ;;  %4585 = vmatprep.mubr.msk.bf16.mxu1 %vm301_vm0, %v5236_v52 }
  0xbc   : > { %4759 = vmatprep.mubr.msk.bf16.mxu0 %vm301_vm0, %v5237_v53  ;;  %4788 = vmatpush3.bf16.msra.mxu0 %v5253_v49 }
  0xc2   : > { %4586 = vmatmul.mubr.msk.bf16.gmra.mrb[24].mxu1 %vm301_vm0, %v5238_v54 }
  0xc3   : > { %4760 = vmatmul.mubr.msk.bf16.gmra.mrb[8].mxu0 %vm301_vm0, %v5239_v55  ;;  %4589 = vmatprep.mubr.msk.bf16.mxu1 %vm301_vm0, %v5240_v56 }
  0xc4   : > { %4763 = vmatprep.mubr.msk.bf16.mxu0 %vm301_vm0, %v5241_v57 }
  0xca   : > { %4590 = vmatmul.mubr.msk.bf16.gmra.mrb[28].mxu1 %vm301_vm0, %v5242_v58 }
  0xcb   : > { %4764 = vmatmul.mubr.msk.bf16.gmra.mrb[12].mxu0 %vm301_vm0, %v5243_v59  ;;  %4599 = vmatprep.mubr.msk.bf16.mxu1 %vm301_vm0, %v5245_v60 }
  0xcc   : > { %4767 = vmatprep.mubr.msk.bf16.mxu0 %vm301_vm0, %v5246_v61 }
  0xd2   : > { %4600 = vmatmul.mubr.msk.bf16.vlgmr.msra.gmra.mrb[0].mxu1 %vm301_vm0, %v5247_v62  ;;  %v5796_v62 = vld [vmem:[%s5909_s2] ss:$0 sm:$0xff] }
  0xd3   : > { %4768 = vmatmul.mubr.msk.bf16.gmra.mrb[16].mxu0 %vm301_vm0, %v5248_v63  ;;  %4824 = vmatpush3.bf16.msra.mxu1 %v5294_v36  ;;  %v5284_v36 = vld [vmem:[%s5366_s10 + $0x58] sm:$0xff]   ;;  %s3866_s10 = sshll.u32 %s3862_s13, 5 }
  0xd4   : > { %4603 = vmatprep.mubr.msk.bf16.mxu1 %vm301_vm0, %v5249_v0  ;;  %4771 = vmatprep.mubr.msk.bf16.mxu0 %vm301_vm0, %v5250_v1  ;;  %p147_p3 = scmp.lt.s32.totalorder %s3866_s10, 415 }
  0xd5   : > { %4822 = vmatprep.subr.bf16.mxu1 %v5295_v2 }
  0xd6   : > { %s5912_s10 = smov (!%p147_p3, %s3866_s10), 415 }
  0xd7   : > { %4825 = vmatpush3.bf16.msra.mxu1 %v5295_v2  ;;  %s3867_s13 = sshll.u32 %s5912_s10, 2 }
  0xd8   : > { %4823 = vmatprep.subr.bf16.mxu1 %v5296_v7  ;;  %s5805_s21 = scalar_lea.vmem %s5910_s3, %s3867_s13 }
  0xda   : > { %4604 = vmatmul.mubr.msk.bf16.gmra.mrb[4].mxu1 %vm301_vm0, %v5251_v3 }
  0xdb   : > { %4772 = vmatmul.mubr.msk.bf16.gmra.mrb[20].mxu0 %vm301_vm0, %v5252_v4  ;;  %4607 = vmatprep.mubr.msk.bf16.mxu1 %vm301_vm0, %v5254_v5 }
  0xdc   : > { %4775 = vmatprep.mubr.msk.bf16.mxu0 %vm301_vm0, %v5255_v6  ;;  %4826 = vmatpush3.bf16.msra.mxu1 %v5296_v7 }
  0xe2   : > { %4608 = vmatmul.mubr.msk.bf16.gmra.mrb[8].mxu1 %vm301_vm0, %v5256_v8 }
  0xe3   : > { %4776 = vmatmul.mubr.msk.bf16.gmra.mrb[24].mxu0 %vm301_vm0, %v5257_v9  ;;  %4611 = vmatprep.mubr.msk.bf16.mxu1 %vm301_vm0, %v5258_v10 }
  0xe4   : > { %4779 = vmatprep.mubr.msk.bf16.mxu0 %vm301_vm0, %v5259_v11 }
  0xea   : > { %4612 = vmatmul.mubr.msk.bf16.gmra.mrb[12].mxu1 %vm301_vm0, %v5260_v12 }
  0xeb   : > { %4780 = vmatmul.mubr.msk.bf16.gmra.mrb[28].mxu0 %vm301_vm0, %v5261_v13  ;;  %4615 = vmatprep.mubr.msk.bf16.mxu1 %vm301_vm0, %v5262_v14 }
  0xec   : > { %4789 = vmatprep.mubr.msk.bf16.mxu0 %vm301_vm0, %v5263_v15 }
  0xf2   : > { %4616 = vmatmul.mubr.msk.bf16.gmra.mrb[16].mxu1 %vm301_vm0, %v5264_v16 }
  0xf3   : > { %4790 = vmatmul.mubr.msk.bf16.vlgmr.msra.gmra.mrb[0].mxu0 %vm301_vm0, %v5265_v17  ;;  %4619 = vmatprep.mubr.msk.bf16.mxu1 %vm301_vm0, %v5266_v18 }
  0xf4   : > { %4793 = vmatprep.mubr.msk.bf16.mxu0 %vm301_vm0, %v5267_v19 }
  0xfa   : > { %4620 = vmatmul.mubr.msk.bf16.gmra.mrb[20].mxu1 %vm301_vm0, %v5268_v20 }
  0xfb   : > { %4794 = vmatmul.mubr.msk.bf16.gmra.mrb[4].mxu0 %vm301_vm0, %v5269_v21  ;;  %4623 = vmatprep.mubr.msk.bf16.mxu1 %vm301_vm0, %v5270_v22 }
  0xfc   : > { %4797 = vmatprep.mubr.msk.bf16.mxu0 %vm301_vm0, %v5271_v23 }
 0x102   : > { %4624 = vmatmul.mubr.msk.bf16.gmra.mrb[24].mxu1 %vm301_vm0, %v5272_v24 }
 0x103   : > { %4798 = vmatmul.mubr.msk.bf16.gmra.mrb[8].mxu0 %vm301_vm0, %v5273_v25  ;;  %4627 = vmatprep.mubr.msk.bf16.mxu1 %vm301_vm0, %v5274_v26 }
 0x104   : > { %4801 = vmatprep.mubr.msk.bf16.mxu0 %vm301_vm0, %v5275_v27 }
 0x10a   : > { %4628 = vmatmul.mubr.msk.bf16.gmra.mrb[28].mxu1 %vm301_vm0, %v5276_v28 }
 0x10b   : > { %4802 = vmatmul.mubr.msk.bf16.gmra.mrb[12].mxu0 %vm301_vm0, %v5277_v29  ;;  %4653 = vmatprep.mubr.msk.bf16.mxu1 %vm301_vm0, %v5278_v30 }
 0x10c   : > { %4805 = vmatprep.mubr.msk.bf16.mxu0 %vm301_vm0, %v5279_v31 }
 0x112   : > { %4654 = vmatmul.mubr.msk.bf16.vlgmr.msra.gmra.mrb[16].mxu1 %vm301_vm0, %v5280_v32 }
 0x113   : > { %4806 = vmatmul.mubr.msk.bf16.gmra.mrb[16].mxu0 %vm301_vm0, %v5281_v33  ;;  %4657 = vmatprep.mubr.msk.bf16.mxu1 %vm301_vm0, %v5282_v34 }
 0x114   : > { %4809 = vmatprep.mubr.msk.bf16.mxu0 %vm301_vm0, %v5283_v35 }
 0x11a   : > { %4658 = vmatmul.mubr.msk.bf16.gmra.mrb[20].mxu1 %vm301_vm0, %v5284_v36 }
 0x11b   : > { %4810 = vmatmul.mubr.msk.bf16.gmra.mrb[20].mxu0 %vm301_vm0, %v5285_v37  ;;  %4661 = vmatprep.mubr.msk.bf16.mxu1 %vm301_vm0, %v5286_v38 }
 0x11c   : > { %4813 = vmatprep.mubr.msk.bf16.mxu0 %vm301_vm0, %v5287_v39 }
 0x122   : > { %4662 = vmatmul.mubr.msk.bf16.gmra.mrb[24].mxu1 %vm301_vm0, %v5288_v40 }
 0x123   : > { %4814 = vmatmul.mubr.msk.bf16.gmra.mrb[24].mxu0 %vm301_vm0, %v5289_v41  ;;  %4665 = vmatprep.mubr.msk.bf16.mxu1 %vm301_vm0, %v5290_v42 }
 0x124   : > { %4817 = vmatprep.mubr.msk.bf16.mxu0 %vm301_vm0, %v5291_v43 }
 0x12a   : > { %4666 = vmatmul.mubr.msk.bf16.gmra.mrb[28].mxu1 %vm301_vm0, %v5292_v44 }
 0x12b   : > { %4818 = vmatmul.mubr.msk.bf16.gmra.mrb[28].mxu0 %vm301_vm0, %v5293_v45 }
 0x1a5   : > { %v4601_v46 = vpop.f32.mrb[0].mxu1 }
 0x1a6   : > { %v1533_v47 = vpop.f32.mrb[1].mxu1  ;;  %v4827_v63 = vadd.f32 %v4601_v46, %v5796_v62 }
 0x1a7   : > { %v4602_v48 = vpop.f32.mrb[2].mxu1  ;;  %v4829_v0 = vadd.f32 %v5796_v62, %v1533_v47 }
 0x1a8   : > { %v1536_v49 = vpop.f32.mrb[3].mxu1  ;;  %v4831_v2 = vadd.f32 %v4602_v48, %v5796_v62 }
 0x1a9   : > { %v4833_v5 = vadd.f32 %v5796_v62, %v1536_v49 }
 0x1ad   : > { %v4605_v50 = vpop.f32.mrb[4].mxu1 }
 0x1ae   : > { %v1549_v51 = vpop.f32.mrb[5].mxu1  ;;  %v4835_v17 = vadd.f32 %v4605_v50, %v5796_v62 }
 0x1af   : > { %v4606_v52 = vpop.f32.mrb[6].mxu1  ;;  %v4837_v19 = vadd.f32 %v5796_v62, %v1549_v51 }
 0x1b0   : > { %v1552_v53 = vpop.f32.mrb[7].mxu1  ;;  %v4839_v22 = vadd.f32 %v4606_v52, %v5796_v62 }
 0x1b1   : > { %v4841_v25 = vadd.f32 %v5796_v62, %v1552_v53 }
 0x1b5   : > { %v4609_v54 = vpop.f32.mrb[8].mxu1 }
 0x1b6   : > { %v1565_v55 = vpop.f32.mrb[9].mxu1  ;;  %v4843_v37 = vadd.f32 %v4609_v54, %v5796_v62 }
 0x1b7   : > { %v4610_v56 = vpop.f32.mrb[10].mxu1  ;;  %v4845_v39 = vadd.f32 %v5796_v62, %v1565_v55 }
 0x1b8   : > { %v5781_v57 = vpop.f32.mrb[11].mxu1  ;;  %v4847_v42 = vadd.f32 %v4610_v56, %v5796_v62 }
 0x1b9   : > { %v4849_v45 = vadd.f32 %v5796_v62, %v5781_v57 }
 0x1bd   : > { %v5785_v58 = vpop.f32.mrb[12].mxu1 }
 0x1be   : > { %v5787_v59 = vpop.f32.mrb[13].mxu1 }
 0x1bf   : > { %v5789_v60 = vpop.f32.mrb[14].mxu1 }
 0x1c0   : > { %v5791_v61 = vpop.f32.mrb[15].mxu1 }
 0x1c6   : > { %v4791_v1 = vpop.f32.mrb[0].mxu0 }
 0x1c7   : > { %v4828_v3 = vadd.f32 %v4827_v63, %v4791_v1  ;;  %v3448_v4 = vpop.f32.mrb[1].mxu0  ;;  %v4851_v63 = vadd.f32 %v5785_v58, %v5796_v62  ;;  %v4857_v58 = vadd.f32 %v5796_v62, %v5791_v61 }
 0x1c8   : > { %v4830_v6 = vadd.f32 %v4829_v0, %v3448_v4  ;;  %v4792_v7 = vpop.f32.mrb[2].mxu0  ;;  %v4853_v0 = vadd.f32 %v5796_v62, %v5787_v59 }
 0x1c9   : > { %v3609_v8 = vmax.f32 %v4828_v3, 0.0  ;;  %v4832_v9 = vadd.f32 %v4831_v2, %v4792_v7  ;;  %v3451_v10 = vpop.f32.mrb[3].mxu0  ;;  %v4855_v3 = vadd.f32 %v5789_v60, %v5796_v62 }
 0x1ca   : > { %v3607_v11 = vmax.f32 %v4830_v6, 0.0  ;;  %v4834_v12 = vadd.f32 %v4833_v5, %v3451_v10 }
 0x1cb   : > { %v4278_v13 = vpack.c.bf16 %v3609_v8, %v3609_v8  ;;  %v3610_v14 = vmax.f32 %v4832_v9, 0.0 }
 0x1cc   : > { %v4276_v15 = vpack.c.bf16 %v3607_v11, %v3607_v11  ;;  %v3608_v16 = vmax.f32 %v4834_v12, 0.0 }
 0x1cd   : > { %3770 = vst.msk [vmem:[%s5805_s21 + $0x8] sm:$0xf] %vm3767_vm1, %v4278_v13  ;;  %v4279_v18 = vpack.c.bf16 %v3610_v14, %v3610_v14 }
 0x1ce   : > { %3768 = vst.msk [vmem:[%s5805_s21] sm:$0xf] %vm3767_vm1, %v4276_v15  ;;  %v4277_v20 = vpack.c.bf16 %v3608_v16, %v3608_v16  ;;  %v4795_v21 = vpop.f32.mrb[4].mxu0 }
 0x1cf   : > { %3771 = vst.msk [vmem:[%s5805_s21 + $0xc] sm:$0xf] %vm3767_vm1, %v4279_v18  ;;  %v4836_v23 = vadd.f32 %v4835_v17, %v4795_v21  ;;  %v3464_v24 = vpop.f32.mrb[5].mxu0 }
 0x1d0   : > { %3769 = vst.msk [vmem:[%s5805_s21 + $0x4] sm:$0xf] %vm3767_vm1, %v4277_v20  ;;  %v4838_v26 = vadd.f32 %v4837_v19, %v3464_v24  ;;  %v4796_v27 = vpop.f32.mrb[6].mxu0 }
 0x1d1   : > { %v3613_v28 = vmax.f32 %v4836_v23, 0.0  ;;  %v4840_v29 = vadd.f32 %v4839_v22, %v4796_v27  ;;  %v3467_v30 = vpop.f32.mrb[7].mxu0 }
 0x1d2   : > { %v3611_v31 = vmax.f32 %v4838_v26, 0.0  ;;  %v4842_v32 = vadd.f32 %v4841_v25, %v3467_v30 }
 0x1d3   : > { %v4282_v33 = vpack.c.bf16 %v3613_v28, %v3613_v28  ;;  %v3614_v34 = vmax.f32 %v4840_v29, 0.0 }
 0x1d4   : > { %v4280_v35 = vpack.c.bf16 %v3611_v31, %v3611_v31  ;;  %v3612_v36 = vmax.f32 %v4842_v32, 0.0 }
 0x1d5   : > { %3774 = vst.msk [vmem:[%s5805_s21 + $0x18] sm:$0xf] %vm3767_vm1, %v4282_v33  ;;  %v4283_v38 = vpack.c.bf16 %v3614_v34, %v3614_v34 }
 0x1d6   : > { %3772 = vst.msk [vmem:[%s5805_s21 + $0x10] sm:$0xf] %vm3767_vm1, %v4280_v35  ;;  %v4281_v40 = vpack.c.bf16 %v3612_v36, %v3612_v36  ;;  %v4799_v41 = vpop.f32.mrb[8].mxu0 }
 0x1d7   : > { %3775 = vst.msk [vmem:[%s5805_s21 + $0x1c] sm:$0xf] %vm3767_vm1, %v4283_v38  ;;  %v4844_v43 = vadd.f32 %v4843_v37, %v4799_v41  ;;  %v3480_v44 = vpop.f32.mrb[9].mxu0 }
 0x1d8   : > { %3773 = vst.msk [vmem:[%s5805_s21 + $0x14] sm:$0xf] %vm3767_vm1, %v4281_v40  ;;  %v4846_v46 = vadd.f32 %v4845_v39, %v3480_v44  ;;  %v4800_v47 = vpop.f32.mrb[10].mxu0 }
 0x1d9   : > { %v3617_v48 = vmax.f32 %v4844_v43, 0.0  ;;  %v4848_v49 = vadd.f32 %v4847_v42, %v4800_v47  ;;  %v3483_v50 = vpop.f32.mrb[11].mxu0 }
 0x1da   : > { %v3615_v51 = vmax.f32 %v4846_v46, 0.0  ;;  %v4850_v52 = vadd.f32 %v4849_v45, %v3483_v50 }
 0x1db   : > { %v4286_v53 = vpack.c.bf16 %v3617_v48, %v3617_v48  ;;  %v3618_v54 = vmax.f32 %v4848_v49, 0.0 }
 0x1dc   : > { %v4284_v55 = vpack.c.bf16 %v3615_v51, %v3615_v51  ;;  %v3616_v56 = vmax.f32 %v4850_v52, 0.0 }
 0x1dd   : > { %3778 = vst.msk [vmem:[%s5805_s21 + $0x28] sm:$0xf] %vm3767_vm1, %v4286_v53  ;;  %v4287_v57 = vpack.c.bf16 %v3618_v54, %v3618_v54 }
 0x1de   : > { %3776 = vst.msk [vmem:[%s5805_s21 + $0x20] sm:$0xf] %vm3767_vm1, %v4284_v55  ;;  %v4285_v1 = vpack.c.bf16 %v3616_v56, %v3616_v56  ;;  %v4803_v2 = vpop.f32.mrb[12].mxu0 }
 0x1df   : > { %3779 = vst.msk [vmem:[%s5805_s21 + $0x2c] sm:$0xf] %vm3767_vm1, %v4287_v57  ;;  %v4852_v4 = vadd.f32 %v4851_v63, %v4803_v2  ;;  %v3496_v5 = vpop.f32.mrb[13].mxu0 }
 0x1e0   : > { %3777 = vst.msk [vmem:[%s5805_s21 + $0x24] sm:$0xf] %vm3767_vm1, %v4285_v1  ;;  %v4854_v6 = vadd.f32 %v4853_v0, %v3496_v5  ;;  %v4804_v59 = vpop.f32.mrb[14].mxu0 }
 0x1e1   : > { %v3621_v7 = vmax.f32 %v4852_v4, 0.0  ;;  %v4856_v8 = vadd.f32 %v4855_v3, %v4804_v59  ;;  %v3499_v9 = vpop.f32.mrb[15].mxu0 }
 0x1e2   : > { %v3619_v10 = vmax.f32 %v4854_v6, 0.0  ;;  %v4858_v11 = vadd.f32 %v4857_v58, %v3499_v9 }
 0x1e3   : > { %v4290_v60 = vpack.c.bf16 %v3621_v7, %v3621_v7  ;;  %v3622_v12 = vmax.f32 %v4856_v8, 0.0 }
 0x1e4   : > { %v4288_v13 = vpack.c.bf16 %v3619_v10, %v3619_v10  ;;  %v3620_v14 = vmax.f32 %v4858_v11, 0.0 }
 0x1e5   : > { %3782 = vst.msk [vmem:[%s5805_s21 + $0x38] sm:$0xf] %vm3767_vm1, %v4290_v60  ;;  %v4291_v15 = vpack.c.bf16 %v3622_v12, %v3622_v12  ;;  %v4655_v61 = vpop.f32.mrb[16].mxu1 }
 0x1e6   : > { %3780 = vst.msk [vmem:[%s5805_s21 + $0x30] sm:$0xf] %vm3767_vm1, %v4288_v13  ;;  %v4289_v16 = vpack.c.bf16 %v3620_v14, %v3620_v14  ;;  %v4859_v17 = vadd.f32 %v4655_v61, %v5796_v62  ;;  %v4807_v18 = vpop.f32.mrb[16].mxu0  ;;  %v1980_v19 = vpop.f32.mrb[17].mxu1 }
 0x1e7   : > { %3783 = vst.msk [vmem:[%s5805_s21 + $0x3c] sm:$0xf] %vm3767_vm1, %v4291_v15  ;;  %v4861_v20 = vadd.f32 %v5796_v62, %v1980_v19  ;;  %v3512_v21 = vpop.f32.mrb[17].mxu0  ;;  %v4656_v22 = vpop.f32.mrb[18].mxu1 }
 0x1e8   : > { %3781 = vst.msk [vmem:[%s5805_s21 + $0x34] sm:$0xf] %vm3767_vm1, %v4289_v16  ;;  %v4860_v23 = vadd.f32 %v4859_v17, %v4807_v18  ;;  %v4863_v24 = vadd.f32 %v4656_v22, %v5796_v62  ;;  %v4808_v25 = vpop.f32.mrb[18].mxu0  ;;  %v1983_v26 = vpop.f32.mrb[19].mxu1 }
 0x1e9   : > { %v4862_v27 = vadd.f32 %v4861_v20, %v3512_v21  ;;  %v4865_v28 = vadd.f32 %v5796_v62, %v1983_v26  ;;  %v3515_v29 = vpop.f32.mrb[19].mxu0 }
 0x1ea   : > { %v3625_v30 = vmax.f32 %v4860_v23, 0.0  ;;  %v4864_v31 = vadd.f32 %v4863_v24, %v4808_v25 }
 0x1eb   : > { %v3623_v32 = vmax.f32 %v4862_v27, 0.0  ;;  %v4866_v33 = vadd.f32 %v4865_v28, %v3515_v29 }
 0x1ec   : > { %v4294_v34 = vpack.c.bf16 %v3625_v30, %v3625_v30  ;;  %v3626_v35 = vmax.f32 %v4864_v31, 0.0 }
 0x1ed   : > { %v4292_v36 = vpack.c.bf16 %v3623_v32, %v3623_v32  ;;  %v3624_v37 = vmax.f32 %v4866_v33, 0.0  ;;  %v4659_v38 = vpop.f32.mrb[20].mxu1 }
 0x1ee   : > { %3786 = vst.msk [vmem:[%s5805_s21 + $0x48] sm:$0xf] %vm3767_vm1, %v4294_v34  ;;  %v4295_v39 = vpack.c.bf16 %v3626_v35, %v3626_v35  ;;  %v4867_v40 = vadd.f32 %v4659_v38, %v5796_v62  ;;  %v4811_v41 = vpop.f32.mrb[20].mxu0  ;;  %v1996_v42 = vpop.f32.mrb[21].mxu1 }
 0x1ef   : > { %3784 = vst.msk [vmem:[%s5805_s21 + $0x40] sm:$0xf] %vm3767_vm1, %v4292_v36  ;;  %v4293_v43 = vpack.c.bf16 %v3624_v37, %v3624_v37  ;;  %v4869_v44 = vadd.f32 %v5796_v62, %v1996_v42  ;;  %v3528_v45 = vpop.f32.mrb[21].mxu0  ;;  %v4660_v46 = vpop.f32.mrb[22].mxu1 }
 0x1f0   : > { %3787 = vst.msk [vmem:[%s5805_s21 + $0x4c] sm:$0xf] %vm3767_vm1, %v4295_v39  ;;  %v4868_v47 = vadd.f32 %v4867_v40, %v4811_v41  ;;  %v4871_v48 = vadd.f32 %v4660_v46, %v5796_v62  ;;  %v4812_v49 = vpop.f32.mrb[22].mxu0  ;;  %v1999_v50 = vpop.f32.mrb[23].mxu1 }
 0x1f1   : > { %3785 = vst.msk [vmem:[%s5805_s21 + $0x44] sm:$0xf] %vm3767_vm1, %v4293_v43  ;;  %v4870_v51 = vadd.f32 %v4869_v44, %v3528_v45  ;;  %v4873_v52 = vadd.f32 %v5796_v62, %v1999_v50  ;;  %v3531_v53 = vpop.f32.mrb[23].mxu0 }
 0x1f2   : > { %v3629_v54 = vmax.f32 %v4868_v47, 0.0  ;;  %v4872_v55 = vadd.f32 %v4871_v48, %v4812_v49 }
 0x1f3   : > { %v3627_v56 = vmax.f32 %v4870_v51, 0.0  ;;  %v4874_v63 = vadd.f32 %v4873_v52, %v3531_v53 }
 0x1f4   : > { %v4298_v57 = vpack.c.bf16 %v3629_v54, %v3629_v54  ;;  %v3630_v0 = vmax.f32 %v4872_v55, 0.0 }
 0x1f5   : > { %v4296_v1 = vpack.c.bf16 %v3627_v56, %v3627_v56  ;;  %v3628_v2 = vmax.f32 %v4874_v63, 0.0  ;;  %v4663_v3 = vpop.f32.mrb[24].mxu1 }
 0x1f6   : > { %3790 = vst.msk [vmem:[%s5805_s21 + $0x58] sm:$0xf] %vm3767_vm1, %v4298_v57  ;;  %v4299_v4 = vpack.c.bf16 %v3630_v0, %v3630_v0  ;;  %v4875_v5 = vadd.f32 %v4663_v3, %v5796_v62  ;;  %v4815_v58 = vpop.f32.mrb[24].mxu0  ;;  %v2012_v6 = vpop.f32.mrb[25].mxu1 }
 0x1f7   : > { %3788 = vst.msk [vmem:[%s5805_s21 + $0x50] sm:$0xf] %vm3767_vm1, %v4296_v1  ;;  %v4297_v59 = vpack.c.bf16 %v3628_v2, %v3628_v2  ;;  %v4877_v7 = vadd.f32 %v5796_v62, %v2012_v6  ;;  %v3544_v8 = vpop.f32.mrb[25].mxu0  ;;  %v4664_v9 = vpop.f32.mrb[26].mxu1 }
 0x1f8   : > { %3791 = vst.msk [vmem:[%s5805_s21 + $0x5c] sm:$0xf] %vm3767_vm1, %v4299_v4  ;;  %v4876_v10 = vadd.f32 %v4875_v5, %v4815_v58  ;;  %v4879_v11 = vadd.f32 %v4664_v9, %v5796_v62  ;;  %v4816_v60 = vpop.f32.mrb[26].mxu0  ;;  %v2015_v12 = vpop.f32.mrb[27].mxu1 }
 0x1f9   : > { %3789 = vst.msk [vmem:[%s5805_s21 + $0x54] sm:$0xf] %vm3767_vm1, %v4297_v59  ;;  %v4878_v13 = vadd.f32 %v4877_v7, %v3544_v8  ;;  %v4881_v14 = vadd.f32 %v5796_v62, %v2015_v12  ;;  %v3547_v15 = vpop.f32.mrb[27].mxu0 }
 0x1fa   : > { %v3633_v61 = vmax.f32 %v4876_v10, 0.0  ;;  %v4880_v16 = vadd.f32 %v4879_v11, %v4816_v60 }
 0x1fb   : > { %v3631_v17 = vmax.f32 %v4878_v13, 0.0  ;;  %v4882_v18 = vadd.f32 %v4881_v14, %v3547_v15 }
 0x1fc   : > { %v4302_v19 = vpack.c.bf16 %v3633_v61, %v3633_v61  ;;  %v3634_v20 = vmax.f32 %v4880_v16, 0.0 }
 0x1fd   : > { %v4300_v21 = vpack.c.bf16 %v3631_v17, %v3631_v17  ;;  %v3632_v22 = vmax.f32 %v4882_v18, 0.0  ;;  %v4667_v23 = vpop.f32.mrb[28].mxu1 }
 0x1fe   : > { %3794 = vst.msk [vmem:[%s5805_s21 + $0x68] sm:$0xf] %vm3767_vm1, %v4302_v19  ;;  %v4303_v24 = vpack.c.bf16 %v3634_v20, %v3634_v20  ;;  %v4883_v25 = vadd.f32 %v4667_v23, %v5796_v62  ;;  %v4819_v26 = vpop.f32.mrb[28].mxu0  ;;  %v2028_v27 = vpop.f32.mrb[29].mxu1 }
 0x1ff   : > { %3792 = vst.msk [vmem:[%s5805_s21 + $0x60] sm:$0xf] %vm3767_vm1, %v4300_v21  ;;  %v4301_v28 = vpack.c.bf16 %v3632_v22, %v3632_v22  ;;  %v4885_v29 = vadd.f32 %v5796_v62, %v2028_v27  ;;  %v3560_v30 = vpop.f32.mrb[29].mxu0  ;;  %v4668_v31 = vpop.f32.mrb[30].mxu1 }
 0x200   : > { %3795 = vst.msk [vmem:[%s5805_s21 + $0x6c] sm:$0xf] %vm3767_vm1, %v4303_v24  ;;  %v4884_v32 = vadd.f32 %v4883_v25, %v4819_v26  ;;  %v4887_v33 = vadd.f32 %v4668_v31, %v5796_v62  ;;  %v4820_v34 = vpop.f32.mrb[30].mxu0  ;;  %v2031_v35 = vpop.f32.mrb[31].mxu1 }
 0x201   : > { %3793 = vst.msk [vmem:[%s5805_s21 + $0x64] sm:$0xf] %vm3767_vm1, %v4301_v28  ;;  %v4886_v36 = vadd.f32 %v4885_v29, %v3560_v30  ;;  %v4889_v37 = vadd.f32 %v5796_v62, %v2031_v35  ;;  %v3563_v38 = vpop.f32.mrb[31].mxu0 }
 0x202   : > { %v3637_v39 = vmax.f32 %v4884_v32, 0.0  ;;  %v4888_v40 = vadd.f32 %v4887_v33, %v4820_v34 }
 0x203   : > { %v3635_v41 = vmax.f32 %v4886_v36, 0.0  ;;  %v4890_v42 = vadd.f32 %v4889_v37, %v3563_v38 }
 0x204   : > { %v4306_v43 = vpack.c.bf16 %v3637_v39, %v3637_v39  ;;  %v3638_v44 = vmax.f32 %v4888_v40, 0.0 }
 0x205   : > { %v4304_v45 = vpack.c.bf16 %v3635_v41, %v3635_v41  ;;  %v3636_v46 = vmax.f32 %v4890_v42, 0.0 }
 0x206   : > { %3798 = vst.msk [vmem:[%s5805_s21 + $0x78] sm:$0xf] %vm3767_vm1, %v4306_v43  ;;  %v4307_v47 = vpack.c.bf16 %v3638_v44, %v3638_v44 }
 0x207   : > { %3796 = vst.msk [vmem:[%s5805_s21 + $0x70] sm:$0xf] %vm3767_vm1, %v4304_v45  ;;  %v4305_v48 = vpack.c.bf16 %v3636_v46, %v3636_v46 }
 0x208   : > { %3799 = vst.msk [vmem:[%s5805_s21 + $0x7c] sm:$0xf] %vm3767_vm1, %v4307_v47 }
 0x209   : > { %3797 = vst.msk [vmem:[%s5805_s21 + $0x74] sm:$0xf] %vm3767_vm1, %v4305_v48 }
 0x20a PF: > { %s13_s12 = sadd.s32 1, %s5303_s12  }
 0x20b   : > { %p10_p4 = scmp.ge.s32.totalorder %s13_s12, 15  }
 0x20d   :  { %12 = sbr.rel (!%p10_p4) target bundleno = 1 (0x1), region = 76 }

// kernel: decoder_block3d_forward.5
= control target key start
LH: loop header
LB: loop body
LE: loop exit
PB: predicated region body
PF: predicated region fallthrough
CT: control target
= control target key end

     0   :  { %s10666_s18 = smov 0   ;;  %s12537_s0 = inlined_call_operand.vmem [shape: bf16[3936,24], index: 0, kind: input, shape index: {}]   ;;  %s12538_s1 = inlined_call_operand.vmem [shape: bf16[9,24,8], index: 1, kind: input, shape index: {}]   ;;  %s12539_s2 = inlined_call_operand.vmem [shape: f32[1,8], index: 2, kind: input, shape index: {}]   ;;  %s12540_s3 = inlined_call_operand.vmem [shape: bf16[8,3], index: 3, kind: input, shape index: {}]   ;;  %s12541_s4 = inlined_call_operand.vmem [shape: f32[1,3], index: 4, kind: input, shape index: {}]   ;;  %s12542_s5 = inlined_call_operand.vmem [shape: f32[3584,3], index: 5, kind: output, shape index: {}]  }
   0x1 LB: > { %s7785_s19 = sadd.s32 4294967295, %s10634_s18   ;;  %p7788_p0 = scmp.ge.s32.totalorder %s10634_s18, 1  ;;  %s10634_s18 = sphi %s10666_s18, %s15_s18  }
   0x2   : > { %p177_p1 = scmp.lt.s32.totalorder %s10634_s18, 8 }
   0x4   : > { %p178_p2 = pnand %p7788_p0, %p177_p1 }
   0x6   : > { %181 = sbr.rel (%p178_p2) target bundleno = 1415 (0x587), region = 40 }
   0xd   : > { %v10066_v0 = vld [vmem:[%s12538_s1] sm:$0xff]   ;;  %vm552_vm0 = vcmask 1043456   ;;  %v10067_v1 = vld [vmem:[%s12538_s1 + $0x30] sm:$0xff]   ;;  %s10682_s24 = sshll.u32 %s7785_s19, 9  ;;  %v10068_v2 = vld [vmem:[%s12538_s1 + $0x8] ss:$0 sps:$4 sm:$0xff]  }
   0xe   : > { %8794 = vmatprep.subr.bf16.mxu1 %v10066_v0  ;;  %9066 = vmatprep.subr.bf16.mxu0 %v10067_v1  ;;  %v10069_v3 = vld [vmem:[%s12538_s1 + $0x38] ss:$0 sps:$4 sm:$0xff]   ;;  %s215_s29 = sshra.s32 %s10682_s24, 3  ;;  %vm455_vm1 = vcmask 195584   ;;  %s2991_s30 = sadd.s32 176, %s10682_s24  ;;  %v10074_v4 = vld [vmem:[%s12538_s1 + $0x3c] sm:$0xff]  }
   0xf   : > { %8795 = vmatpush3.bf16.msra.mxu1 %v10066_v0  ;;  %9067 = vmatpush3.bf16.msra.mxu0 %v10067_v1  ;;  %v554_v5 = vsel %vm552_vm0, %v10068_v2, 0  ;;  %s7793_s8 = sshll.u32 %s215_s29, 2  ;;  %s2992_s9 = sshra.s32 %s2991_s30, 3  ;;  %v10135_v6 = vld [vmem:[%s12538_s1 + $0xc] sm:$0xff]   ;;  %v3330_v7 = vsel %vm552_vm0, %v10069_v3, 0  ;;  %vm6565_vm2 = vcmask 64512  }
  0x10   : > { %10048 = vmatprep.subr.msk.bf16.mxu1 %vm552_vm0, %v10068_v2  ;;  %10052 = vmatprep.subr.msk.bf16.mxu0 %vm552_vm0, %v10069_v3  ;;  %s10705_s14 = scalar_lea.vmem %s12537_s0, %s7793_s8  ;;  %s8070_s15 = sshll.u32 %s2992_s9, 2  ;;  %v10107_v30 = vld [vmem:[%s12538_s1 + $0x44] ss:$0 sps:$4 sm:$0xff]   ;;  %v10137_v47 = vld [vmem:[%s12538_s1 + $0x14] ss:$0 sps:$4 sm:$0xff]   ;;  %v10813_v50 = vld [vmem:[%s12538_s1 + $0x48] sm:$0xff]  }
  0x11   : > { %v10070_v8 = vld [vmem:[%s10705_s14] sm:$0xff]   ;;  %s10711_s20 = scalar_lea.vmem %s12537_s0, %s8070_s15  ;;  %v10072_v10 = vld [vmem:[%s10705_s14 + $0x8] sm:$0xff]   ;;  %v10075_v12 = vld [vmem:[%s10705_s14 + $0x10] sm:$0xff]   ;;  %v4024_v31 = vsel %vm552_vm0, %v10107_v30, 0  ;;  %s909_s23 = sadd.s32 16, %s10682_s24  ;;  %v1248_v49 = vsel %vm552_vm0, %v10137_v47, 0 }
  0x12   : > { %v10071_v9 = vld [vmem:[%s10711_s20] sm:$0xff]   ;;  %8798 = vmatprep.mubr.msk.bf16.mxu1 %vm455_vm1, %v10070_v8  ;;  %v10073_v11 = vld [vmem:[%s10711_s20 + $0x8] sm:$0xff]   ;;  %v10076_v13 = vld [vmem:[%s10711_s20 + $0x10] sm:$0xff]   ;;  %s3685_s25 = sadd.s32 192, %s10682_s24  ;;  %s910_s26 = sshra.s32 %s909_s23, 3  ;;  %vm6954_vm3 = vcmask 23552  }
  0x13   : > { %8797 = vmatpush3.bf16.msra.mxu1 %v554_v5  ;;  %9069 = vmatpush3.bf16.msra.mxu0 %v3330_v7  ;;  %v10077_v14 = vld [vmem:[%s10705_s14 + $0x18] sm:$0xff]   ;;  %v10079_v16 = vld [vmem:[%s10705_s14 + $0x20] sm:$0xff]   ;;  %v10081_v18 = vld [vmem:[%s10705_s14 + $0x28] sm:$0xff]   ;;  %s3686_s27 = sshra.s32 %s3685_s25, 3  ;;  %s7860_s28 = sshll.u32 %s910_s26, 2 }
  0x14   : > { %9070 = vmatprep.mubr.msk.bf16.mxu0 %vm455_vm1, %v10071_v9  ;;  %9134 = vmatprep.subr.bf16.mxu0 %v10074_v4  ;;  %v10078_v15 = vld [vmem:[%s10711_s20 + $0x18] sm:$0xff]   ;;  %v10080_v17 = vld [vmem:[%s10711_s20 + $0x20] sm:$0xff]   ;;  %v10082_v19 = vld [vmem:[%s10711_s20 + $0x28] sm:$0xff]   ;;  %s8140_s29 = sshll.u32 %s3686_s27, 2  ;;  %s10793_s7 = scalar_lea.vmem %s12537_s0, %s7860_s28 }
  0x15   : > { %8862 = vmatprep.subr.bf16.mxu1 %v10135_v6  ;;  %v10083_v20 = vld [vmem:[%s10705_s14 + $0x30] sm:$0xff]   ;;  %v10085_v22 = vld [vmem:[%s10705_s14 + $0x38] sm:$0xff]   ;;  %v10087_v24 = vld [vmem:[%s10705_s14 + $0x40] sm:$0xff]   ;;  %s10801_s12 = scalar_lea.vmem %s12537_s0, %s8140_s29  ;;  %s1603_s16 = sadd.s32 32, %s10682_s24 }
  0x16   : > { %8799 = vmatmul.mubr.msk.bf16.vlgmr.msra.gmra.mrb[0].mxu1 %vm455_vm1, %v10072_v10  ;;  %9071 = vmatmul.mubr.msk.bf16.vlgmr.msra.gmra.mrb[0].mxu0 %vm455_vm1, %v10073_v11  ;;  %v10084_v21 = vld [vmem:[%s10711_s20 + $0x30] sm:$0xff]   ;;  %v10086_v23 = vld [vmem:[%s10711_s20 + $0x38] sm:$0xff]   ;;  %v10088_v25 = vld [vmem:[%s10711_s20 + $0x40] sm:$0xff]   ;;  %s1604_s17 = sshra.s32 %s1603_s16, 3  ;;  %s4379_s21 = sadd.s32 320, %s10682_s24 }
  0x17   : > { %8863 = vmatpush3.bf16.msra.mxu1 %v10135_v6  ;;  %9135 = vmatpush3.bf16.msra.mxu0 %v10074_v4  ;;  %v10089_v26 = vld [vmem:[%s10705_s14 + $0x48] sm:$0xff]   ;;  %v10091_v28 = vld [vmem:[%s10705_s14 + $0x50] sm:$0xff]   ;;  %v10093_v32 = vld [vmem:[%s10705_s14 + $0x58] sm:$0xff]   ;;  %s7930_s22 = sshll.u32 %s1604_s17, 2  ;;  %s4380_s23 = sshra.s32 %s4379_s21, 3 }
  0x18   : > { %8802 = vmatprep.mubr.msk.bf16.mxu1 %vm455_vm1, %v10075_v12  ;;  %9074 = vmatprep.mubr.msk.bf16.mxu0 %vm455_vm1, %v10076_v13  ;;  %v10090_v27 = vld [vmem:[%s10711_s20 + $0x48] sm:$0xff]   ;;  %v10092_v29 = vld [vmem:[%s10711_s20 + $0x50] sm:$0xff]   ;;  %v10094_v33 = vld [vmem:[%s10711_s20 + $0x58] sm:$0xff]   ;;  %s8210_s25 = sshll.u32 %s4380_s23, 2  ;;  %s10888_s30 = scalar_lea.vmem %s12537_s0, %s7930_s22 }
  0x19   : > { %10053 = vmatprep.subr.msk.bf16.mxu0 %vm552_vm0, %v10107_v30  ;;  %v10095_v34 = vld [vmem:[%s10705_s14 + $0x60] sm:$0xff]   ;;  %v10097_v36 = vld [vmem:[%s10705_s14 + $0x68] sm:$0xff]   ;;  %v10099_v38 = vld [vmem:[%s10705_s14 + $0x70] sm:$0xff]   ;;  %10049 = vmatprep.subr.msk.bf16.mxu1 %vm552_vm0, %v10137_v47  ;;  %s10898_s11 = scalar_lea.vmem %s12537_s0, %s8210_s25  ;;  %s2297_s21 = sadd.s32 160, %s10682_s24 }
  0x1a   : > { %v10096_v35 = vld [vmem:[%s10711_s20 + $0x60] sm:$0xff]   ;;  %v10098_v37 = vld [vmem:[%s10711_s20 + $0x68] sm:$0xff]   ;;  %v10100_v39 = vld [vmem:[%s10711_s20 + $0x70] sm:$0xff]   ;;  %s5767_s16 = sadd.s32 352, %s10682_s24  ;;  %s7789_s27 = sshll.u32 %s7785_s19, 6 }
  0x1b   : > { %9137 = vmatpush3.bf16.msra.mxu0 %v4024_v31  ;;  %v10101_v40 = vld [vmem:[%s10705_s14 + $0x78] sm:$0xff]   ;;  %v10103_v42 = vld [vmem:[%s10705_s14 + $0x80] sm:$0xff]   ;;  %v10105_v44 = vld [vmem:[%s10705_s14 + $0x88] sm:$0xff]   ;;  %8865 = vmatpush3.bf16.msra.mxu1 %v1248_v49  ;;  %s5768_s17 = sshra.s32 %s5767_s16, 3  ;;  %p201_p3 = scmp.lt.s32.totalorder %s7789_s27, 447 }
  0x1c   : > { %v10102_v41 = vld [vmem:[%s10711_s20 + $0x78] sm:$0xff]   ;;  %v10104_v43 = vld [vmem:[%s10711_s20 + $0x80] sm:$0xff]   ;;  %v10106_v45 = vld [vmem:[%s10711_s20 + $0x88] sm:$0xff]   ;;  %9202 = vmatprep.subr.bf16.mxu0 %v10813_v50 }
  0x1d   : > { %v10108_v46 = vld [vmem:[%s10705_s14 + $0x90] sm:$0xff]   ;;  %v10110_v51 = vld [vmem:[%s10705_s14 + $0x98] sm:$0xff]   ;;  %v10112_v53 = vld [vmem:[%s10705_s14 + $0xa0] sm:$0xff]   ;;  %s12650_s27 = smov (!%p201_p3, %s7789_s27), 447 }
  0x1e   : > { %8803 = vmatmul.mubr.msk.bf16.gmra.mrb[4].mxu1 %vm455_vm1, %v10077_v14  ;;  %9075 = vmatmul.mubr.msk.bf16.gmra.mrb[4].mxu0 %vm455_vm1, %v10078_v15  ;;  %v10109_v48 = vld [vmem:[%s10711_s20 + $0x90] sm:$0xff]   ;;  %v10111_v52 = vld [vmem:[%s10711_s20 + $0x98] sm:$0xff]   ;;  %v10113_v54 = vld [vmem:[%s10711_s20 + $0xa0] sm:$0xff]   ;;  %s7790_s28 = sshll.u32 %s12650_s27, 3 }
  0x1f   : > { %8806 = vmatprep.mubr.msk.bf16.mxu1 %vm455_vm1, %v10079_v16  ;;  %9078 = vmatprep.mubr.msk.bf16.mxu0 %vm455_vm1, %v10080_v17  ;;  %v10114_v55 = vld [vmem:[%s10705_s14 + $0xa8] sm:$0xff]   ;;  %v10116_v57 = vld [vmem:[%s10705_s14 + $0xb0] sm:$0xff]   ;;  %v10118_v59 = vld [vmem:[%s10705_s14 + $0xb8] sm:$0xff]   ;;  %s12340_s8 = scalar_lea.vmem %s12542_s5, %s7790_s28 }
  0x20   : > { %v10115_v56 = vld [vmem:[%s10711_s20 + $0xa8] sm:$0xff]   ;;  %v10117_v58 = vld [vmem:[%s10711_s20 + $0xb0] sm:$0xff]   ;;  %v10119_v60 = vld [vmem:[%s10711_s20 + $0xb8] sm:$0xff]  }
  0x21   : > { %v10120_v61 = vld [vmem:[%s10705_s14 + $0xc0] sm:$0xff]   ;;  %v10122_v63 = vld [vmem:[%s10705_s14 + $0xc8] sm:$0xff]   ;;  %v10124_v1 = vld [vmem:[%s10705_s14 + $0xd0] sm:$0xff]  }
  0x22   : > { %v10121_v62 = vld [vmem:[%s10711_s20 + $0xc0] sm:$0xff]   ;;  %v10123_v0 = vld [vmem:[%s10711_s20 + $0xc8] sm:$0xff]   ;;  %v10125_v2 = vld [vmem:[%s10711_s20 + $0xd0] sm:$0xff]  }
  0x23   : > { %v10126_v3 = vld [vmem:[%s10705_s14 + $0xd8] sm:$0xff]   ;;  %v10128_v5 = vld [vmem:[%s10705_s14 + $0xe0] sm:$0xff]   ;;  %v10130_v7 = vld [vmem:[%s10705_s14 + $0xe8] sm:$0xff]  }
  0x24   : > { %v10127_v4 = vld [vmem:[%s10711_s20 + $0xd8] sm:$0xff]   ;;  %v10129_v6 = vld [vmem:[%s10711_s20 + $0xe0] sm:$0xff]   ;;  %v10131_v8 = vld [vmem:[%s10711_s20 + $0xe8] sm:$0xff]  }
  0x25   : > { %v10132_v9 = vld [vmem:[%s10705_s14 + $0xf0] sm:$0xff]   ;;  %v10134_v11 = vld [vmem:[%s10705_s14 + $0xf8] sm:$0xff]   ;;  %v10138_v13 = vld [vmem:[%s10793_s7] sm:$0xff]   ;;  %s5073_s14 = sadd.s32 336, %s10682_s24 }
  0x26   : > { %8807 = vmatmul.mubr.msk.bf16.gmra.mrb[8].mxu1 %vm455_vm1, %v10081_v18  ;;  %9079 = vmatmul.mubr.msk.bf16.gmra.mrb[8].mxu0 %vm455_vm1, %v10082_v19  ;;  %v10133_v10 = vld [vmem:[%s10711_s20 + $0xf0] sm:$0xff]   ;;  %v10136_v12 = vld [vmem:[%s10711_s20 + $0xf8] sm:$0xff]   ;;  %v10139_v14 = vld [vmem:[%s10801_s12] sm:$0xff]  }
  0x27   : > { %8810 = vmatprep.mubr.msk.bf16.mxu1 %vm455_vm1, %v10083_v20  ;;  %9082 = vmatprep.mubr.msk.bf16.mxu0 %vm455_vm1, %v10084_v21  ;;  %v10140_v15 = vld [vmem:[%s10793_s7 + $0x8] sm:$0xff]   ;;  %v10143_v17 = vld [vmem:[%s10793_s7 + $0x10] sm:$0xff]   ;;  %v10203_v20 = vld [vmem:[%s12538_s1 + $0x18] sm:$0xff]  }
  0x28   : > { %v10141_v16 = vld [vmem:[%s10801_s12 + $0x8] sm:$0xff]   ;;  %v10175_v18 = vld [vmem:[%s12538_s1 + $0x50] ss:$0 sps:$4 sm:$0xff]   ;;  %v10205_v21 = vld [vmem:[%s12538_s1 + $0x20] ss:$0 sps:$4 sm:$0xff]   ;;  %8930 = vmatprep.subr.bf16.mxu1 %v10203_v20 }
  0x29   : > { %v10144_v19 = vld [vmem:[%s10801_s12 + $0x10] sm:$0xff]   ;;  %v10150_v30 = vld [vmem:[%s10801_s12 + $0x28] sm:$0xff]   ;;  %v10169_v49 = vld [vmem:[%s10793_s7 + $0x78] sm:$0xff]  }
  0x2a   : > { %v10151_v31 = vld [vmem:[%s10793_s7 + $0x30] sm:$0xff]  }
  0x2b   : > { %v10167_v47 = vld [vmem:[%s10793_s7 + $0x70] sm:$0xff]  }
  0x2e   : > { %8811 = vmatmul.mubr.msk.bf16.gmra.mrb[12].mxu1 %vm455_vm1, %v10085_v22  ;;  %9083 = vmatmul.mubr.msk.bf16.gmra.mrb[12].mxu0 %vm455_vm1, %v10086_v23  ;;  %v10145_v22 = vld [vmem:[%s10793_s7 + $0x18] sm:$0xff]  }
  0x2f   : > { %8814 = vmatprep.mubr.msk.bf16.mxu1 %vm455_vm1, %v10087_v24  ;;  %9086 = vmatprep.mubr.msk.bf16.mxu0 %vm455_vm1, %v10088_v25  ;;  %v10146_v23 = vld [vmem:[%s10801_s12 + $0x18] sm:$0xff]   ;;  %v4718_v24 = vsel %vm552_vm0, %v10175_v18, 0  ;;  %v10147_v25 = vld [vmem:[%s10793_s7 + $0x20] sm:$0xff]  }
  0x36   : > { %8815 = vmatmul.mubr.msk.bf16.gmra.mrb[16].mxu1 %vm455_vm1, %v10089_v26  ;;  %9087 = vmatmul.mubr.msk.bf16.gmra.mrb[16].mxu0 %vm455_vm1, %v10090_v27  ;;  %v10911_v26 = vld [vmem:[%s12538_s1 + $0x54] sm:$0xff]   ;;  %v10148_v27 = vld [vmem:[%s10801_s12 + $0x20] sm:$0xff]  }
  0x37   : > { %8818 = vmatprep.mubr.msk.bf16.mxu1 %vm455_vm1, %v10091_v28  ;;  %9090 = vmatprep.mubr.msk.bf16.mxu0 %vm455_vm1, %v10092_v29  ;;  %v1942_v28 = vsel %vm552_vm0, %v10205_v21, 0  ;;  %v10149_v29 = vld [vmem:[%s10793_s7 + $0x28] sm:$0xff]  }
  0x3e   : > { %8819 = vmatmul.mubr.msk.bf16.gmra.mrb[20].mxu1 %vm455_vm1, %v10093_v32  ;;  %9091 = vmatmul.mubr.msk.bf16.gmra.mrb[20].mxu0 %vm455_vm1, %v10094_v33  ;;  %v10152_v32 = vld [vmem:[%s10801_s12 + $0x30] sm:$0xff]   ;;  %v10153_v33 = vld [vmem:[%s10793_s7 + $0x38] sm:$0xff]  }
  0x3f   : > { %8822 = vmatprep.mubr.msk.bf16.mxu1 %vm455_vm1, %v10095_v34  ;;  %9094 = vmatprep.mubr.msk.bf16.mxu0 %vm455_vm1, %v10096_v35  ;;  %v10154_v34 = vld [vmem:[%s10801_s12 + $0x38] sm:$0xff]   ;;  %v10155_v35 = vld [vmem:[%s10793_s7 + $0x40] sm:$0xff]  }
  0x46   : > { %8823 = vmatmul.mubr.msk.bf16.gmra.mrb[24].mxu1 %vm455_vm1, %v10097_v36  ;;  %9095 = vmatmul.mubr.msk.bf16.gmra.mrb[24].mxu0 %vm455_vm1, %v10098_v37  ;;  %v10156_v36 = vld [vmem:[%s10801_s12 + $0x40] sm:$0xff]   ;;  %v10157_v37 = vld [vmem:[%s10793_s7 + $0x48] sm:$0xff]  }
  0x47   : > { %8826 = vmatprep.mubr.msk.bf16.mxu1 %vm455_vm1, %v10099_v38  ;;  %9098 = vmatprep.mubr.msk.bf16.mxu0 %vm455_vm1, %v10100_v39  ;;  %v10158_v38 = vld [vmem:[%s10801_s12 + $0x48] sm:$0xff]   ;;  %v10159_v39 = vld [vmem:[%s10793_s7 + $0x50] sm:$0xff]  }
  0x4e   : > { %8827 = vmatmul.mubr.msk.bf16.gmra.mrb[28].mxu1 %vm455_vm1, %v10101_v40  ;;  %9099 = vmatmul.mubr.msk.bf16.gmra.mrb[28].mxu0 %vm455_vm1, %v10102_v41  ;;  %v10160_v40 = vld [vmem:[%s10801_s12 + $0x50] sm:$0xff]   ;;  %v10161_v41 = vld [vmem:[%s10793_s7 + $0x58] sm:$0xff]  }
  0x4f   : > { %8830 = vmatprep.mubr.msk.bf16.mxu1 %vm455_vm1, %v10103_v42  ;;  %9102 = vmatprep.mubr.msk.bf16.mxu0 %vm455_vm1, %v10104_v43  ;;  %v10162_v42 = vld [vmem:[%s10801_s12 + $0x58] sm:$0xff]   ;;  %v10163_v43 = vld [vmem:[%s10793_s7 + $0x60] sm:$0xff]  }
  0x56   : > { %8831 = vmatmul.mubr.msk.bf16.gmra.mrb[32].mxu1 %vm455_vm1, %v10105_v44  ;;  %9103 = vmatmul.mubr.msk.bf16.gmra.mrb[32].mxu0 %vm455_vm1, %v10106_v45  ;;  %v10164_v44 = vld [vmem:[%s10801_s12 + $0x60] sm:$0xff]   ;;  %v10165_v45 = vld [vmem:[%s10793_s7 + $0x68] sm:$0xff]  }
  0x57   : > { %8834 = vmatprep.mubr.msk.bf16.mxu1 %vm455_vm1, %v10108_v46  ;;  %9106 = vmatprep.mubr.msk.bf16.mxu0 %vm455_vm1, %v10109_v48  ;;  %v10166_v46 = vld [vmem:[%s10801_s12 + $0x68] sm:$0xff]   ;;  %v10168_v48 = vld [vmem:[%s10801_s12 + $0x70] sm:$0xff]  }
  0x5e   : > { %8835 = vmatmul.mubr.msk.bf16.gmra.mrb[36].mxu1 %vm455_vm1, %v10110_v51  ;;  %9107 = vmatmul.mubr.msk.bf16.gmra.mrb[36].mxu0 %vm455_vm1, %v10111_v52  ;;  %v10171_v51 = vld [vmem:[%s10793_s7 + $0x80] sm:$0xff]  }
  0x5f   : > { %8838 = vmatprep.mubr.msk.bf16.mxu1 %vm455_vm1, %v10112_v53  ;;  %9110 = vmatprep.mubr.msk.bf16.mxu0 %vm455_vm1, %v10113_v54  ;;  %v10172_v52 = vld [vmem:[%s10801_s12 + $0x80] sm:$0xff]   ;;  %v10173_v53 = vld [vmem:[%s10793_s7 + $0x88] sm:$0xff]  }
  0x60   : > { %v10174_v54 = vld [vmem:[%s10801_s12 + $0x88] sm:$0xff]  }
  0x66   : > { %8839 = vmatmul.mubr.msk.bf16.gmra.mrb[40].mxu1 %vm455_vm1, %v10114_v55  ;;  %9111 = vmatmul.mubr.msk.bf16.gmra.mrb[40].mxu0 %vm455_vm1, %v10115_v56  ;;  %v10176_v55 = vld [vmem:[%s10793_s7 + $0x90] sm:$0xff]  }
  0x67   : > { %8842 = vmatprep.mubr.msk.bf16.mxu1 %vm455_vm1, %v10116_v57  ;;  %9114 = vmatprep.mubr.msk.bf16.mxu0 %vm455_vm1, %v10117_v58  ;;  %v10177_v56 = vld [vmem:[%s10801_s12 + $0x90] sm:$0xff]   ;;  %v10178_v57 = vld [vmem:[%s10793_s7 + $0x98] sm:$0xff]  }
  0x68   : > { %v10179_v58 = vld [vmem:[%s10801_s12 + $0x98] sm:$0xff]  }
  0x6e   : > { %8843 = vmatmul.mubr.msk.bf16.gmra.mrb[44].mxu1 %vm455_vm1, %v10118_v59  ;;  %9115 = vmatmul.mubr.msk.bf16.gmra.mrb[44].mxu0 %vm455_vm1, %v10119_v60  ;;  %v10180_v59 = vld [vmem:[%s10793_s7 + $0xa0] sm:$0xff]  }
  0x6f   : > { %8846 = vmatprep.mubr.msk.bf16.mxu1 %vm455_vm1, %v10120_v61  ;;  %9118 = vmatprep.mubr.msk.bf16.mxu0 %vm455_vm1, %v10121_v62  ;;  %v10181_v60 = vld [vmem:[%s10801_s12 + $0xa0] sm:$0xff]   ;;  %v10182_v61 = vld [vmem:[%s10793_s7 + $0xa8] sm:$0xff]  }
  0x70   : > { %v10183_v62 = vld [vmem:[%s10801_s12 + $0xa8] sm:$0xff]  }
  0x76   : > { %8847 = vmatmul.mubr.msk.bf16.gmra.mrb[48].mxu1 %vm455_vm1, %v10122_v63  ;;  %9119 = vmatmul.mubr.msk.bf16.gmra.mrb[48].mxu0 %vm455_vm1, %v10123_v0  ;;  %v10184_v63 = vld [vmem:[%s10793_s7 + $0xb0] sm:$0xff]  }
  0x77   : > { %8850 = vmatprep.mubr.msk.bf16.mxu1 %vm455_vm1, %v10124_v1  ;;  %9122 = vmatprep.mubr.msk.bf16.mxu0 %vm455_vm1, %v10125_v2  ;;  %v10185_v0 = vld [vmem:[%s10801_s12 + $0xb0] sm:$0xff]   ;;  %v10186_v1 = vld [vmem:[%s10793_s7 + $0xb8] sm:$0xff]  }
  0x78   : > { %v10187_v2 = vld [vmem:[%s10801_s12 + $0xb8] sm:$0xff]  }
  0x7e   : > { %8851 = vmatmul.mubr.msk.bf16.gmra.mrb[52].mxu1 %vm455_vm1, %v10126_v3  ;;  %9123 = vmatmul.mubr.msk.bf16.gmra.mrb[52].mxu0 %vm455_vm1, %v10127_v4  ;;  %v10188_v3 = vld [vmem:[%s10793_s7 + $0xc0] sm:$0xff]  }
  0x7f   : > { %8854 = vmatprep.mubr.msk.bf16.mxu1 %vm455_vm1, %v10128_v5  ;;  %9126 = vmatprep.mubr.msk.bf16.mxu0 %vm455_vm1, %v10129_v6  ;;  %v10189_v4 = vld [vmem:[%s10801_s12 + $0xc0] sm:$0xff]   ;;  %v10190_v5 = vld [vmem:[%s10793_s7 + $0xc8] sm:$0xff]  }
  0x80   : > { %v10191_v6 = vld [vmem:[%s10801_s12 + $0xc8] sm:$0xff]  }
  0x86   : > { %8855 = vmatmul.mubr.msk.bf16.gmra.mrb[56].mxu1 %vm455_vm1, %v10130_v7  ;;  %9127 = vmatmul.mubr.msk.bf16.gmra.mrb[56].mxu0 %vm455_vm1, %v10131_v8  ;;  %v10192_v7 = vld [vmem:[%s10793_s7 + $0xd0] sm:$0xff]  }
  0x87   : > { %8858 = vmatprep.mubr.msk.bf16.mxu1 %vm455_vm1, %v10132_v9  ;;  %9130 = vmatprep.mubr.msk.bf16.mxu0 %vm455_vm1, %v10133_v10  ;;  %v10193_v8 = vld [vmem:[%s10801_s12 + $0xd0] sm:$0xff]   ;;  %v10194_v9 = vld [vmem:[%s10793_s7 + $0xd8] sm:$0xff]  }
  0x88   : > { %v10195_v10 = vld [vmem:[%s10801_s12 + $0xd8] sm:$0xff]  }
  0x8e   : > { %8859 = vmatmul.mubr.msk.bf16.gmra.mrb[60].mxu1 %vm455_vm1, %v10134_v11  ;;  %9131 = vmatmul.mubr.msk.bf16.gmra.mrb[60].mxu0 %vm455_vm1, %v10136_v12  ;;  %v10196_v11 = vld [vmem:[%s10793_s7 + $0xe0] sm:$0xff]  }
  0x8f   : > { %8866 = vmatprep.mubr.msk.bf16.mxu1 %vm455_vm1, %v10138_v13  ;;  %9138 = vmatprep.mubr.msk.bf16.mxu0 %vm455_vm1, %v10139_v14  ;;  %v10197_v12 = vld [vmem:[%s10801_s12 + $0xe0] sm:$0xff]   ;;  %v10198_v13 = vld [vmem:[%s10793_s7 + $0xe8] sm:$0xff]  }
  0x90   : > { %v10199_v14 = vld [vmem:[%s10801_s12 + $0xe8] sm:$0xff]  }
  0x96   : > { %8867 = vmatmul.mubr.msk.bf16.vlgmr.msra.gmra.mrb[0].mxu1 %vm455_vm1, %v10140_v15  ;;  %9139 = vmatmul.mubr.msk.bf16.vlgmr.msra.gmra.mrb[0].mxu0 %vm455_vm1, %v10141_v16  ;;  %v10200_v15 = vld [vmem:[%s10793_s7 + $0xf0] sm:$0xff]  }
  0x97   : > { %8870 = vmatprep.mubr.msk.bf16.mxu1 %vm455_vm1, %v10143_v17  ;;  %9203 = vmatpush3.bf16.msra.mxu0 %v10813_v50  ;;  %v10170_v50 = vld [vmem:[%s10801_s12 + $0x78] sm:$0xff]   ;;  %v10201_v16 = vld [vmem:[%s10801_s12 + $0xf0] sm:$0xff]  }
  0x98   : > { %9142 = vmatprep.mubr.msk.bf16.mxu0 %vm455_vm1, %v10144_v19  ;;  %10054 = vmatprep.subr.msk.bf16.mxu0 %vm552_vm0, %v10175_v18  ;;  %v10202_v17 = vld [vmem:[%s10793_s7 + $0xf8] sm:$0xff]   ;;  %v10206_v19 = vld [vmem:[%s10888_s30] sm:$0xff]   ;;  %s2298_s7 = sshra.s32 %s2297_s21, 3  ;;  %s8350_s21 = sshll.u32 %s5768_s17, 2 }
  0x99   : > { %8931 = vmatpush3.bf16.msra.mxu1 %v10203_v20  ;;  %v10204_v18 = vld [vmem:[%s10801_s12 + $0xf8] sm:$0xff]   ;;  %v10207_v20 = vld [vmem:[%s10898_s11] sm:$0xff]   ;;  %s5074_s12 = sshra.s32 %s5073_s14, 3  ;;  %s8000_s20 = sshll.u32 %s2298_s7, 2 }
  0x9a   : > { %10050 = vmatprep.subr.msk.bf16.mxu1 %vm552_vm0, %v10205_v21  ;;  %v10271_v21 = vld [vmem:[%s12538_s1 + $0x24] sm:$0xff]   ;;  %s8280_s22 = sshll.u32 %s5074_s12, 2  ;;  %s11042_s26 = scalar_lea.vmem %s12537_s0, %s8000_s20 }
  0x9b   : > { %9205 = vmatpush3.bf16.msra.mxu0 %v4718_v24  ;;  %v10211_v24 = vld [vmem:[%s10888_s30 + $0x10] sm:$0xff]   ;;  %s11048_s29 = scalar_lea.vmem %s12537_s0, %s8280_s22  ;;  %s11199_s14 = scalar_lea.vmem %s12537_s0, %s8350_s21 }
  0x9c   : > { %9270 = vmatprep.subr.bf16.mxu0 %v10911_v26 }
  0x9d   : > { %8933 = vmatpush3.bf16.msra.mxu1 %v1942_v28  ;;  %v10273_v28 = vld [vmem:[%s12538_s1 + $0x2c] ss:$0 sps:$4 sm:$0xff]  }
  0x9e   : > { %8871 = vmatmul.mubr.msk.bf16.gmra.mrb[4].mxu1 %vm455_vm1, %v10145_v22  ;;  %9143 = vmatmul.mubr.msk.bf16.gmra.mrb[4].mxu0 %vm455_vm1, %v10146_v23  ;;  %v10208_v22 = vld [vmem:[%s10888_s30 + $0x8] sm:$0xff]  }
  0x9f   : > { %8874 = vmatprep.mubr.msk.bf16.mxu1 %vm455_vm1, %v10147_v25  ;;  %9146 = vmatprep.mubr.msk.bf16.mxu0 %vm455_vm1, %v10148_v27  ;;  %v10209_v23 = vld [vmem:[%s10898_s11 + $0x8] sm:$0xff]   ;;  %v10212_v25 = vld [vmem:[%s10898_s11 + $0x10] sm:$0xff]   ;;  %v10243_v27 = vld [vmem:[%s12538_s1 + $0x5c] ss:$0 sps:$4 sm:$0xff]  }
  0xa0   : > { %8998 = vmatprep.subr.bf16.mxu1 %v10271_v21 }
  0xa6   : > { %8875 = vmatmul.mubr.msk.bf16.gmra.mrb[8].mxu1 %vm455_vm1, %v10149_v29  ;;  %9147 = vmatmul.mubr.msk.bf16.gmra.mrb[8].mxu0 %vm455_vm1, %v10150_v30  ;;  %v10213_v29 = vld [vmem:[%s10888_s30 + $0x18] sm:$0xff]  }
  0xa7   : > { %8878 = vmatprep.mubr.msk.bf16.mxu1 %vm455_vm1, %v10151_v31  ;;  %9150 = vmatprep.mubr.msk.bf16.mxu0 %vm455_vm1, %v10152_v32  ;;  %v10214_v30 = vld [vmem:[%s10898_s11 + $0x18] sm:$0xff]   ;;  %v10215_v31 = vld [vmem:[%s10888_s30 + $0x20] sm:$0xff]   ;;  %v5412_v32 = vsel %vm552_vm0, %v10243_v27, 0 }
  0xae   : > { %8879 = vmatmul.mubr.msk.bf16.gmra.mrb[12].mxu1 %vm455_vm1, %v10153_v33  ;;  %9151 = vmatmul.mubr.msk.bf16.gmra.mrb[12].mxu0 %vm455_vm1, %v10154_v34  ;;  %v11070_v33 = vld [vmem:[%s12538_s1 + $0x60] sm:$0xff]   ;;  %v2636_v34 = vsel %vm552_vm0, %v10273_v28, 0 }
  0xaf   : > { %8882 = vmatprep.mubr.msk.bf16.mxu1 %vm455_vm1, %v10155_v35  ;;  %9154 = vmatprep.mubr.msk.bf16.mxu0 %vm455_vm1, %v10156_v36  ;;  %v10217_v35 = vld [vmem:[%s10888_s30 + $0x28] sm:$0xff]  }
  0xb0   : > { %v10218_v36 = vld [vmem:[%s10898_s11 + $0x28] sm:$0xff]  }
  0xb6   : > { %8883 = vmatmul.mubr.msk.bf16.gmra.mrb[16].mxu1 %vm455_vm1, %v10157_v37  ;;  %9155 = vmatmul.mubr.msk.bf16.gmra.mrb[16].mxu0 %vm455_vm1, %v10158_v38  ;;  %v10219_v37 = vld [vmem:[%s10888_s30 + $0x30] sm:$0xff]  }
  0xb7   : > { %8886 = vmatprep.mubr.msk.bf16.mxu1 %vm455_vm1, %v10159_v39  ;;  %9158 = vmatprep.mubr.msk.bf16.mxu0 %vm455_vm1, %v10160_v40  ;;  %v10220_v38 = vld [vmem:[%s10898_s11 + $0x30] sm:$0xff]   ;;  %v10221_v39 = vld [vmem:[%s10888_s30 + $0x38] sm:$0xff]  }
  0xb8   : > { %v10222_v40 = vld [vmem:[%s10898_s11 + $0x38] sm:$0xff]  }
  0xbe   : > { %8887 = vmatmul.mubr.msk.bf16.gmra.mrb[20].mxu1 %vm455_vm1, %v10161_v41  ;;  %9159 = vmatmul.mubr.msk.bf16.gmra.mrb[20].mxu0 %vm455_vm1, %v10162_v42  ;;  %v10223_v41 = vld [vmem:[%s10888_s30 + $0x40] sm:$0xff]  }
  0xbf   : > { %8890 = vmatprep.mubr.msk.bf16.mxu1 %vm455_vm1, %v10163_v43  ;;  %9162 = vmatprep.mubr.msk.bf16.mxu0 %vm455_vm1, %v10164_v44  ;;  %v10224_v42 = vld [vmem:[%s10898_s11 + $0x40] sm:$0xff]   ;;  %v10225_v43 = vld [vmem:[%s10888_s30 + $0x48] sm:$0xff]  }
  0xc0   : > { %v10226_v44 = vld [vmem:[%s10898_s11 + $0x48] sm:$0xff]  }
  0xc6   : > { %8891 = vmatmul.mubr.msk.bf16.gmra.mrb[24].mxu1 %vm455_vm1, %v10165_v45  ;;  %9163 = vmatmul.mubr.msk.bf16.gmra.mrb[24].mxu0 %vm455_vm1, %v10166_v46  ;;  %v10227_v45 = vld [vmem:[%s10888_s30 + $0x50] sm:$0xff]  }
  0xc7   : > { %8894 = vmatprep.mubr.msk.bf16.mxu1 %vm455_vm1, %v10167_v47  ;;  %9166 = vmatprep.mubr.msk.bf16.mxu0 %vm455_vm1, %v10168_v48  ;;  %v10228_v46 = vld [vmem:[%s10898_s11 + $0x50] sm:$0xff]   ;;  %v10229_v47 = vld [vmem:[%s10888_s30 + $0x58] sm:$0xff]  }
  0xc8   : > { %v10230_v48 = vld [vmem:[%s10898_s11 + $0x58] sm:$0xff]  }
  0xce   : > { %8895 = vmatmul.mubr.msk.bf16.gmra.mrb[28].mxu1 %vm455_vm1, %v10169_v49  ;;  %9167 = vmatmul.mubr.msk.bf16.gmra.mrb[28].mxu0 %vm455_vm1, %v10170_v50  ;;  %v10231_v49 = vld [vmem:[%s10888_s30 + $0x60] sm:$0xff]  }
  0xcf   : > { %8898 = vmatprep.mubr.msk.bf16.mxu1 %vm455_vm1, %v10171_v51  ;;  %9170 = vmatprep.mubr.msk.bf16.mxu0 %vm455_vm1, %v10172_v52  ;;  %v10232_v50 = vld [vmem:[%s10898_s11 + $0x60] sm:$0xff]   ;;  %v10233_v51 = vld [vmem:[%s10888_s30 + $0x68] sm:$0xff]  }
  0xd0   : > { %v10234_v52 = vld [vmem:[%s10898_s11 + $0x68] sm:$0xff]  }
  0xd6   : > { %8899 = vmatmul.mubr.msk.bf16.gmra.mrb[32].mxu1 %vm455_vm1, %v10173_v53  ;;  %9171 = vmatmul.mubr.msk.bf16.gmra.mrb[32].mxu0 %vm455_vm1, %v10174_v54  ;;  %v10235_v53 = vld [vmem:[%s10888_s30 + $0x70] sm:$0xff]  }
  0xd7   : > { %8902 = vmatprep.mubr.msk.bf16.mxu1 %vm455_vm1, %v10176_v55  ;;  %9174 = vmatprep.mubr.msk.bf16.mxu0 %vm455_vm1, %v10177_v56  ;;  %v10236_v54 = vld [vmem:[%s10898_s11 + $0x70] sm:$0xff]   ;;  %v10237_v55 = vld [vmem:[%s10888_s30 + $0x78] sm:$0xff]  }
  0xd8   : > { %v10238_v56 = vld [vmem:[%s10898_s11 + $0x78] sm:$0xff]  }
  0xde   : > { %8903 = vmatmul.mubr.msk.bf16.gmra.mrb[36].mxu1 %vm455_vm1, %v10178_v57  ;;  %9175 = vmatmul.mubr.msk.bf16.gmra.mrb[36].mxu0 %vm455_vm1, %v10179_v58  ;;  %v10239_v57 = vld [vmem:[%s10888_s30 + $0x80] sm:$0xff]  }
  0xdf   : > { %8906 = vmatprep.mubr.msk.bf16.mxu1 %vm455_vm1, %v10180_v59  ;;  %9178 = vmatprep.mubr.msk.bf16.mxu0 %vm455_vm1, %v10181_v60  ;;  %v10240_v58 = vld [vmem:[%s10898_s11 + $0x80] sm:$0xff]   ;;  %v10241_v59 = vld [vmem:[%s10888_s30 + $0x88] sm:$0xff]  }
  0xe0   : > { %v10242_v60 = vld [vmem:[%s10898_s11 + $0x88] sm:$0xff]  }
  0xe6   : > { %8907 = vmatmul.mubr.msk.bf16.gmra.mrb[40].mxu1 %vm455_vm1, %v10182_v61  ;;  %9179 = vmatmul.mubr.msk.bf16.gmra.mrb[40].mxu0 %vm455_vm1, %v10183_v62  ;;  %v10244_v61 = vld [vmem:[%s10888_s30 + $0x90] sm:$0xff]  }
  0xe7   : > { %8910 = vmatprep.mubr.msk.bf16.mxu1 %vm455_vm1, %v10184_v63  ;;  %9182 = vmatprep.mubr.msk.bf16.mxu0 %vm455_vm1, %v10185_v0  ;;  %v10245_v62 = vld [vmem:[%s10898_s11 + $0x90] sm:$0xff]   ;;  %v10246_v63 = vld [vmem:[%s10888_s30 + $0x98] sm:$0xff]  }
  0xe8   : > { %v10247_v0 = vld [vmem:[%s10898_s11 + $0x98] sm:$0xff]  }
  0xee   : > { %8911 = vmatmul.mubr.msk.bf16.gmra.mrb[44].mxu1 %vm455_vm1, %v10186_v1  ;;  %9183 = vmatmul.mubr.msk.bf16.gmra.mrb[44].mxu0 %vm455_vm1, %v10187_v2  ;;  %v10248_v1 = vld [vmem:[%s10888_s30 + $0xa0] sm:$0xff]  }
  0xef   : > { %8914 = vmatprep.mubr.msk.bf16.mxu1 %vm455_vm1, %v10188_v3  ;;  %9186 = vmatprep.mubr.msk.bf16.mxu0 %vm455_vm1, %v10189_v4  ;;  %v10249_v2 = vld [vmem:[%s10898_s11 + $0xa0] sm:$0xff]   ;;  %v10250_v3 = vld [vmem:[%s10888_s30 + $0xa8] sm:$0xff]  }
  0xf0   : > { %v10251_v4 = vld [vmem:[%s10898_s11 + $0xa8] sm:$0xff]  }
  0xf6   : > { %8915 = vmatmul.mubr.msk.bf16.gmra.mrb[48].mxu1 %vm455_vm1, %v10190_v5  ;;  %9187 = vmatmul.mubr.msk.bf16.gmra.mrb[48].mxu0 %vm455_vm1, %v10191_v6  ;;  %v10252_v5 = vld [vmem:[%s10888_s30 + $0xb0] sm:$0xff]  }
  0xf7   : > { %8918 = vmatprep.mubr.msk.bf16.mxu1 %vm455_vm1, %v10192_v7  ;;  %9190 = vmatprep.mubr.msk.bf16.mxu0 %vm455_vm1, %v10193_v8  ;;  %v10253_v6 = vld [vmem:[%s10898_s11 + $0xb0] sm:$0xff]   ;;  %v10254_v7 = vld [vmem:[%s10888_s30 + $0xb8] sm:$0xff]  }
  0xf8   : > { %v10255_v8 = vld [vmem:[%s10898_s11 + $0xb8] sm:$0xff]  }
  0xfe   : > { %8919 = vmatmul.mubr.msk.bf16.gmra.mrb[52].mxu1 %vm455_vm1, %v10194_v9  ;;  %9191 = vmatmul.mubr.msk.bf16.gmra.mrb[52].mxu0 %vm455_vm1, %v10195_v10  ;;  %v10256_v9 = vld [vmem:[%s10888_s30 + $0xc0] sm:$0xff]  }
  0xff   : > { %8922 = vmatprep.mubr.msk.bf16.mxu1 %vm455_vm1, %v10196_v11  ;;  %9194 = vmatprep.mubr.msk.bf16.mxu0 %vm455_vm1, %v10197_v12  ;;  %v10257_v10 = vld [vmem:[%s10898_s11 + $0xc0] sm:$0xff]   ;;  %v10258_v11 = vld [vmem:[%s10888_s30 + $0xc8] sm:$0xff]  }
 0x100   : > { %v10259_v12 = vld [vmem:[%s10898_s11 + $0xc8] sm:$0xff]  }
 0x106   : > { %8923 = vmatmul.mubr.msk.bf16.gmra.mrb[56].mxu1 %vm455_vm1, %v10198_v13  ;;  %9195 = vmatmul.mubr.msk.bf16.gmra.mrb[56].mxu0 %vm455_vm1, %v10199_v14  ;;  %v10260_v13 = vld [vmem:[%s10888_s30 + $0xd0] sm:$0xff]  }
 0x107   : > { %8926 = vmatprep.mubr.msk.bf16.mxu1 %vm455_vm1, %v10200_v15  ;;  %9198 = vmatprep.mubr.msk.bf16.mxu0 %vm455_vm1, %v10201_v16  ;;  %v10261_v14 = vld [vmem:[%s10898_s11 + $0xd0] sm:$0xff]   ;;  %v10262_v15 = vld [vmem:[%s10888_s30 + $0xd8] sm:$0xff]  }
 0x108   : > { %v10263_v16 = vld [vmem:[%s10898_s11 + $0xd8] sm:$0xff]  }
 0x10e   : > { %8927 = vmatmul.mubr.msk.bf16.gmra.mrb[60].mxu1 %vm455_vm1, %v10202_v17  ;;  %9199 = vmatmul.mubr.msk.bf16.gmra.mrb[60].mxu0 %vm455_vm1, %v10204_v18  ;;  %v10264_v17 = vld [vmem:[%s10888_s30 + $0xe0] sm:$0xff]  }
 0x10f   : > { %8934 = vmatprep.mubr.msk.bf16.mxu1 %vm455_vm1, %v10206_v19  ;;  %9206 = vmatprep.mubr.msk.bf16.mxu0 %vm455_vm1, %v10207_v20  ;;  %v10265_v18 = vld [vmem:[%s10898_s11 + $0xe0] sm:$0xff]   ;;  %v10266_v19 = vld [vmem:[%s10888_s30 + $0xe8] sm:$0xff]  }
 0x110   : > { %v10267_v20 = vld [vmem:[%s10898_s11 + $0xe8] sm:$0xff]  }
 0x116   : > { %8935 = vmatmul.mubr.msk.bf16.vlgmr.msra.gmra.mrb[0].mxu1 %vm455_vm1, %v10208_v22  ;;  %9207 = vmatmul.mubr.msk.bf16.vlgmr.msra.gmra.mrb[0].mxu0 %vm455_vm1, %v10209_v23  ;;  %v10269_v22 = vld [vmem:[%s10898_s11 + $0xf0] sm:$0xff]   ;;  %v10270_v23 = vld [vmem:[%s10888_s30 + $0xf8] sm:$0xff]  }
 0x117   : > { %8938 = vmatprep.mubr.msk.bf16.mxu1 %vm455_vm1, %v10211_v24  ;;  %9271 = vmatpush3.bf16.msra.mxu0 %v10911_v26  ;;  %v10216_v26 = vld [vmem:[%s10898_s11 + $0x20] sm:$0xff]   ;;  %v10272_v24 = vld [vmem:[%s10898_s11 + $0xf8] sm:$0xff]  }
 0x118   : > { %9210 = vmatprep.mubr.msk.bf16.mxu0 %vm455_vm1, %v10212_v25  ;;  %10055 = vmatprep.subr.msk.bf16.mxu0 %vm552_vm0, %v10243_v27  ;;  %v10274_v25 = vld [vmem:[%s11042_s26] sm:$0xff]  }
 0x119   : > { %8999 = vmatpush3.bf16.msra.mxu1 %v10271_v21  ;;  %v10268_v21 = vld [vmem:[%s10888_s30 + $0xf0] sm:$0xff]   ;;  %v10275_v27 = vld [vmem:[%s11048_s29] sm:$0xff]  }
 0x11a   : > { %10051 = vmatprep.subr.msk.bf16.mxu1 %vm552_vm0, %v10273_v28  ;;  %v10276_v28 = vld [vmem:[%s11042_s26 + $0x8] sm:$0xff]  }
 0x11b   : > { %9273 = vmatpush3.bf16.msra.mxu0 %v5412_v32  ;;  %v10311_v32 = vld [vmem:[%s12538_s1 + $0x68] ss:$0 sps:$4 sm:$0xff]  }
 0x11c   : > { %9338 = vmatprep.subr.bf16.mxu0 %v11070_v33 }
 0x11d   : > { %9001 = vmatpush3.bf16.msra.mxu1 %v2636_v34  ;;  %v6106_v34 = vsel %vm552_vm0, %v10311_v32, 0 }
 0x11e   : > { %8939 = vmatmul.mubr.msk.bf16.gmra.mrb[4].mxu1 %vm455_vm1, %v10213_v29  ;;  %9211 = vmatmul.mubr.msk.bf16.gmra.mrb[4].mxu0 %vm455_vm1, %v10214_v30  ;;  %v10277_v29 = vld [vmem:[%s11048_s29 + $0x8] sm:$0xff]   ;;  %v10279_v30 = vld [vmem:[%s11042_s26 + $0x10] sm:$0xff]  }
 0x11f   : > { %8942 = vmatprep.mubr.msk.bf16.mxu1 %vm455_vm1, %v10215_v31  ;;  %9214 = vmatprep.mubr.msk.bf16.mxu0 %vm455_vm1, %v10216_v26  ;;  %v10280_v31 = vld [vmem:[%s11048_s29 + $0x10] sm:$0xff]   ;;  %v10281_v26 = vld [vmem:[%s11042_s26 + $0x18] sm:$0xff]  }
 0x126   : > { %8943 = vmatmul.mubr.msk.bf16.gmra.mrb[8].mxu1 %vm455_vm1, %v10217_v35  ;;  %9215 = vmatmul.mubr.msk.bf16.gmra.mrb[8].mxu0 %vm455_vm1, %v10218_v36  ;;  %v10282_v35 = vld [vmem:[%s11048_s29 + $0x18] sm:$0xff]   ;;  %v10283_v36 = vld [vmem:[%s11042_s26 + $0x20] sm:$0xff]  }
 0x127   : > { %8946 = vmatprep.mubr.msk.bf16.mxu1 %vm455_vm1, %v10219_v37  ;;  %9218 = vmatprep.mubr.msk.bf16.mxu0 %vm455_vm1, %v10220_v38  ;;  %v10284_v37 = vld [vmem:[%s11048_s29 + $0x20] sm:$0xff]   ;;  %v10286_v38 = vld [vmem:[%s11048_s29 + $0x28] sm:$0xff]  }
 0x12e   : > { %8947 = vmatmul.mubr.msk.bf16.gmra.mrb[12].mxu1 %vm455_vm1, %v10221_v39  ;;  %9219 = vmatmul.mubr.msk.bf16.gmra.mrb[12].mxu0 %vm455_vm1, %v10222_v40  ;;  %v10287_v39 = vld [vmem:[%s11042_s26 + $0x30] sm:$0xff]  }
 0x12f   : > { %8950 = vmatprep.mubr.msk.bf16.mxu1 %vm455_vm1, %v10223_v41  ;;  %9222 = vmatprep.mubr.msk.bf16.mxu0 %vm455_vm1, %v10224_v42  ;;  %v10288_v40 = vld [vmem:[%s11048_s29 + $0x30] sm:$0xff]   ;;  %v10289_v41 = vld [vmem:[%s11042_s26 + $0x38] sm:$0xff]  }
 0x130   : > { %v10290_v42 = vld [vmem:[%s11048_s29 + $0x38] sm:$0xff]  }
 0x136   : > { %8951 = vmatmul.mubr.msk.bf16.gmra.mrb[16].mxu1 %vm455_vm1, %v10225_v43  ;;  %9223 = vmatmul.mubr.msk.bf16.gmra.mrb[16].mxu0 %vm455_vm1, %v10226_v44  ;;  %v10291_v43 = vld [vmem:[%s11042_s26 + $0x40] sm:$0xff]  }
 0x137   : > { %8954 = vmatprep.mubr.msk.bf16.mxu1 %vm455_vm1, %v10227_v45  ;;  %9226 = vmatprep.mubr.msk.bf16.mxu0 %vm455_vm1, %v10228_v46  ;;  %v10292_v44 = vld [vmem:[%s11048_s29 + $0x40] sm:$0xff]   ;;  %v10293_v45 = vld [vmem:[%s11042_s26 + $0x48] sm:$0xff]  }
 0x138   : > { %v10294_v46 = vld [vmem:[%s11048_s29 + $0x48] sm:$0xff]  }
 0x13e   : > { %8955 = vmatmul.mubr.msk.bf16.gmra.mrb[20].mxu1 %vm455_vm1, %v10229_v47  ;;  %9227 = vmatmul.mubr.msk.bf16.gmra.mrb[20].mxu0 %vm455_vm1, %v10230_v48  ;;  %v10295_v47 = vld [vmem:[%s11042_s26 + $0x50] sm:$0xff]  }
 0x13f   : > { %8958 = vmatprep.mubr.msk.bf16.mxu1 %vm455_vm1, %v10231_v49  ;;  %9230 = vmatprep.mubr.msk.bf16.mxu0 %vm455_vm1, %v10232_v50  ;;  %v10296_v48 = vld [vmem:[%s11048_s29 + $0x50] sm:$0xff]   ;;  %v10297_v49 = vld [vmem:[%s11042_s26 + $0x58] sm:$0xff]  }
 0x140   : > { %v10298_v50 = vld [vmem:[%s11048_s29 + $0x58] sm:$0xff]  }
 0x146   : > { %8959 = vmatmul.mubr.msk.bf16.gmra.mrb[24].mxu1 %vm455_vm1, %v10233_v51  ;;  %9231 = vmatmul.mubr.msk.bf16.gmra.mrb[24].mxu0 %vm455_vm1, %v10234_v52  ;;  %v10299_v51 = vld [vmem:[%s11042_s26 + $0x60] sm:$0xff]  }
 0x147   : > { %8962 = vmatprep.mubr.msk.bf16.mxu1 %vm455_vm1, %v10235_v53  ;;  %9234 = vmatprep.mubr.msk.bf16.mxu0 %vm455_vm1, %v10236_v54  ;;  %v10300_v52 = vld [vmem:[%s11048_s29 + $0x60] sm:$0xff]   ;;  %v10301_v53 = vld [vmem:[%s11042_s26 + $0x68] sm:$0xff]  }
 0x148   : > { %v10302_v54 = vld [vmem:[%s11048_s29 + $0x68] sm:$0xff]  }
 0x14e   : > { %8963 = vmatmul.mubr.msk.bf16.gmra.mrb[28].mxu1 %vm455_vm1, %v10237_v55  ;;  %9235 = vmatmul.mubr.msk.bf16.gmra.mrb[28].mxu0 %vm455_vm1, %v10238_v56  ;;  %v10303_v55 = vld [vmem:[%s11042_s26 + $0x70] sm:$0xff]  }
 0x14f   : > { %8966 = vmatprep.mubr.msk.bf16.mxu1 %vm455_vm1, %v10239_v57  ;;  %9238 = vmatprep.mubr.msk.bf16.mxu0 %vm455_vm1, %v10240_v58  ;;  %v10304_v56 = vld [vmem:[%s11048_s29 + $0x70] sm:$0xff]   ;;  %v10305_v57 = vld [vmem:[%s11042_s26 + $0x78] sm:$0xff]  }
 0x150   : > { %v10306_v58 = vld [vmem:[%s11048_s29 + $0x78] sm:$0xff]  }
 0x156   : > { %8967 = vmatmul.mubr.msk.bf16.gmra.mrb[32].mxu1 %vm455_vm1, %v10241_v59  ;;  %9239 = vmatmul.mubr.msk.bf16.gmra.mrb[32].mxu0 %vm455_vm1, %v10242_v60  ;;  %v10307_v59 = vld [vmem:[%s11042_s26 + $0x80] sm:$0xff]  }
 0x157   : > { %8970 = vmatprep.mubr.msk.bf16.mxu1 %vm455_vm1, %v10244_v61  ;;  %9242 = vmatprep.mubr.msk.bf16.mxu0 %vm455_vm1, %v10245_v62  ;;  %v10308_v60 = vld [vmem:[%s11048_s29 + $0x80] sm:$0xff]   ;;  %v10309_v61 = vld [vmem:[%s11042_s26 + $0x88] sm:$0xff]  }
 0x158   : > { %v10310_v62 = vld [vmem:[%s11048_s29 + $0x88] sm:$0xff]  }
 0x15e   : > { %8971 = vmatmul.mubr.msk.bf16.gmra.mrb[36].mxu1 %vm455_vm1, %v10246_v63  ;;  %9243 = vmatmul.mubr.msk.bf16.gmra.mrb[36].mxu0 %vm455_vm1, %v10247_v0  ;;  %v10312_v63 = vld [vmem:[%s11042_s26 + $0x90] sm:$0xff]  }
 0x15f   : > { %8974 = vmatprep.mubr.msk.bf16.mxu1 %vm455_vm1, %v10248_v1  ;;  %9246 = vmatprep.mubr.msk.bf16.mxu0 %vm455_vm1, %v10249_v2  ;;  %v10313_v0 = vld [vmem:[%s11048_s29 + $0x90] sm:$0xff]   ;;  %v10314_v1 = vld [vmem:[%s11042_s26 + $0x98] sm:$0xff]  }
 0x160   : > { %v10315_v2 = vld [vmem:[%s11048_s29 + $0x98] sm:$0xff]  }
 0x166   : > { %8975 = vmatmul.mubr.msk.bf16.gmra.mrb[40].mxu1 %vm455_vm1, %v10250_v3  ;;  %9247 = vmatmul.mubr.msk.bf16.gmra.mrb[40].mxu0 %vm455_vm1, %v10251_v4  ;;  %v10316_v3 = vld [vmem:[%s11042_s26 + $0xa0] sm:$0xff]  }
 0x167   : > { %8978 = vmatprep.mubr.msk.bf16.mxu1 %vm455_vm1, %v10252_v5  ;;  %9250 = vmatprep.mubr.msk.bf16.mxu0 %vm455_vm1, %v10253_v6  ;;  %v10317_v4 = vld [vmem:[%s11048_s29 + $0xa0] sm:$0xff]   ;;  %v10318_v5 = vld [vmem:[%s11042_s26 + $0xa8] sm:$0xff]  }
 0x168   : > { %v10319_v6 = vld [vmem:[%s11048_s29 + $0xa8] sm:$0xff]  }
 0x16e   : > { %8979 = vmatmul.mubr.msk.bf16.gmra.mrb[44].mxu1 %vm455_vm1, %v10254_v7  ;;  %9251 = vmatmul.mubr.msk.bf16.gmra.mrb[44].mxu0 %vm455_vm1, %v10255_v8  ;;  %v10320_v7 = vld [vmem:[%s11042_s26 + $0xb0] sm:$0xff]  }
 0x16f   : > { %8982 = vmatprep.mubr.msk.bf16.mxu1 %vm455_vm1, %v10256_v9  ;;  %9254 = vmatprep.mubr.msk.bf16.mxu0 %vm455_vm1, %v10257_v10  ;;  %v10321_v8 = vld [vmem:[%s11048_s29 + $0xb0] sm:$0xff]   ;;  %v10322_v9 = vld [vmem:[%s11042_s26 + $0xb8] sm:$0xff]  }
 0x170   : > { %v10323_v10 = vld [vmem:[%s11048_s29 + $0xb8] sm:$0xff]  }
 0x176   : > { %8983 = vmatmul.mubr.msk.bf16.gmra.mrb[48].mxu1 %vm455_vm1, %v10258_v11  ;;  %9255 = vmatmul.mubr.msk.bf16.gmra.mrb[48].mxu0 %vm455_vm1, %v10259_v12  ;;  %v10324_v11 = vld [vmem:[%s11042_s26 + $0xc0] sm:$0xff]  }
 0x177   : > { %8986 = vmatprep.mubr.msk.bf16.mxu1 %vm455_vm1, %v10260_v13  ;;  %9258 = vmatprep.mubr.msk.bf16.mxu0 %vm455_vm1, %v10261_v14  ;;  %v10325_v12 = vld [vmem:[%s11048_s29 + $0xc0] sm:$0xff]   ;;  %v10326_v13 = vld [vmem:[%s11042_s26 + $0xc8] sm:$0xff]  }
 0x178   : > { %v10327_v14 = vld [vmem:[%s11048_s29 + $0xc8] sm:$0xff]  }
 0x17e   : > { %8987 = vmatmul.mubr.msk.bf16.gmra.mrb[52].mxu1 %vm455_vm1, %v10262_v15  ;;  %9259 = vmatmul.mubr.msk.bf16.gmra.mrb[52].mxu0 %vm455_vm1, %v10263_v16  ;;  %v10328_v15 = vld [vmem:[%s11042_s26 + $0xd0] sm:$0xff]  }
 0x17f   : > { %8990 = vmatprep.mubr.msk.bf16.mxu1 %vm455_vm1, %v10264_v17  ;;  %9262 = vmatprep.mubr.msk.bf16.mxu0 %vm455_vm1, %v10265_v18  ;;  %v10329_v16 = vld [vmem:[%s11048_s29 + $0xd0] sm:$0xff]   ;;  %v6557_v17 = vld [vmem:[%s12540_s3] sm:$0xf] }
 0x180   : > { %10057 = vmatprep.subr.msk.bf16.mxu1 %vm552_vm0, %v6557_v17  ;;  %v6663_v18 = vsel %vm552_vm0, %v6557_v17, 0 }
 0x186   : > { %8991 = vmatmul.mubr.msk.bf16.gmra.mrb[56].mxu1 %vm455_vm1, %v10266_v19  ;;  %9263 = vmatmul.mubr.msk.bf16.gmra.mrb[56].mxu0 %vm455_vm1, %v10267_v20  ;;  %v10330_v19 = vld [vmem:[%s11042_s26 + $0xd8] sm:$0xff]  }
 0x187   : > { %8994 = vmatprep.mubr.msk.bf16.mxu1 %vm455_vm1, %v10268_v21  ;;  %9266 = vmatprep.mubr.msk.bf16.mxu0 %vm455_vm1, %v10269_v22  ;;  %v10331_v20 = vld [vmem:[%s11048_s29 + $0xd8] sm:$0xff]   ;;  %v10332_v21 = vld [vmem:[%s11042_s26 + $0xe0] sm:$0xff]  }
 0x188   : > { %v10333_v22 = vld [vmem:[%s11048_s29 + $0xe0] sm:$0xff]  }
 0x18e   : > { %8995 = vmatmul.mubr.msk.bf16.gmra.mrb[60].mxu1 %vm455_vm1, %v10270_v23  ;;  %9267 = vmatmul.mubr.msk.bf16.gmra.mrb[60].mxu0 %vm455_vm1, %v10272_v24  ;;  %v10334_v23 = vld [vmem:[%s11042_s26 + $0xe8] sm:$0xff]  }
 0x18f   : > { %9002 = vmatprep.mubr.msk.bf16.mxu1 %vm455_vm1, %v10274_v25  ;;  %9274 = vmatprep.mubr.msk.bf16.mxu0 %vm455_vm1, %v10275_v27  ;;  %v10335_v24 = vld [vmem:[%s11048_s29 + $0xe8] sm:$0xff]   ;;  %v10336_v25 = vld [vmem:[%s11042_s26 + $0xf0] sm:$0xff]  }
 0x190   : > { %v10337_v27 = vld [vmem:[%s11048_s29 + $0xf0] sm:$0xff]  }
 0x196   : > { %9003 = vmatmul.mubr.msk.bf16.vlgmr.msra.gmra.mrb[0].mxu1 %vm455_vm1, %v10276_v28  ;;  %9275 = vmatmul.mubr.msk.bf16.vlgmr.msra.gmra.mrb[0].mxu0 %vm455_vm1, %v10277_v29  ;;  %v10338_v28 = vld [vmem:[%s11042_s26 + $0xf8] sm:$0xff]  }
 0x197   : > { %9006 = vmatprep.mubr.msk.bf16.mxu1 %vm455_vm1, %v10279_v30  ;;  %9339 = vmatpush3.bf16.msra.mxu0 %v11070_v33  ;;  %v10285_v33 = vld [vmem:[%s11042_s26 + $0x28] sm:$0xff]   ;;  %v10339_v29 = vld [vmem:[%s11048_s29 + $0xf8] sm:$0xff]   ;;  %v10340_v30 = vld [vmem:[%s11199_s14] sm:$0xff]  }
 0x198   : > { %9278 = vmatprep.mubr.msk.bf16.mxu0 %vm455_vm1, %v10280_v31  ;;  %10056 = vmatprep.subr.msk.bf16.mxu0 %vm552_vm0, %v10311_v32  ;;  %v10341_v31 = vld [vmem:[%s11199_s14 + $0x8] sm:$0xff]   ;;  %v10342_v32 = vld [vmem:[%s11199_s14 + $0x10] sm:$0xff]  }
 0x199   : > { %9407 = vmatpush3.bf16.msra.mxu1 %v6663_v18 }
 0x19b   : > { %9341 = vmatpush3.bf16.msra.mxu0 %v6106_v34  ;;  %v10344_v34 = vld [vmem:[%s11199_s14 + $0x20] sm:$0xff]  }
 0x19e   : > { %9007 = vmatmul.mubr.msk.bf16.gmra.mrb[4].mxu1 %vm455_vm1, %v10281_v26  ;;  %9279 = vmatmul.mubr.msk.bf16.gmra.mrb[4].mxu0 %vm455_vm1, %v10282_v35  ;;  %v10343_v26 = vld [vmem:[%s11199_s14 + $0x18] sm:$0xff]   ;;  %v10345_v35 = vld [vmem:[%s11199_s14 + $0x28] sm:$0xff]  }
 0x19f   : > { %9010 = vmatprep.mubr.msk.bf16.mxu1 %vm455_vm1, %v10283_v36  ;;  %9282 = vmatprep.mubr.msk.bf16.mxu0 %vm455_vm1, %v10284_v37  ;;  %v10346_v36 = vld [vmem:[%s11199_s14 + $0x30] sm:$0xff]   ;;  %v10347_v37 = vld [vmem:[%s11199_s14 + $0x38] sm:$0xff]  }
 0x1a6   : > { %9011 = vmatmul.mubr.msk.bf16.gmra.mrb[8].mxu1 %vm455_vm1, %v10285_v33  ;;  %9283 = vmatmul.mubr.msk.bf16.gmra.mrb[8].mxu0 %vm455_vm1, %v10286_v38  ;;  %v10348_v33 = vld [vmem:[%s11199_s14 + $0x40] sm:$0xff]   ;;  %v10349_v38 = vld [vmem:[%s11199_s14 + $0x48] sm:$0xff]  }
 0x1a7   : > { %9014 = vmatprep.mubr.msk.bf16.mxu1 %vm455_vm1, %v10287_v39  ;;  %9286 = vmatprep.mubr.msk.bf16.mxu0 %vm455_vm1, %v10288_v40  ;;  %v10350_v39 = vld [vmem:[%s11199_s14 + $0x50] sm:$0xff]   ;;  %v10351_v40 = vld [vmem:[%s11199_s14 + $0x58] sm:$0xff]  }
 0x1ae   : > { %9015 = vmatmul.mubr.msk.bf16.gmra.mrb[12].mxu1 %vm455_vm1, %v10289_v41  ;;  %9287 = vmatmul.mubr.msk.bf16.gmra.mrb[12].mxu0 %vm455_vm1, %v10290_v42  ;;  %v10352_v41 = vld [vmem:[%s11199_s14 + $0x60] sm:$0xff]   ;;  %v10353_v42 = vld [vmem:[%s11199_s14 + $0x68] sm:$0xff]  }
 0x1af   : > { %9018 = vmatprep.mubr.msk.bf16.mxu1 %vm455_vm1, %v10291_v43  ;;  %9290 = vmatprep.mubr.msk.bf16.mxu0 %vm455_vm1, %v10292_v44  ;;  %v10354_v43 = vld [vmem:[%s11199_s14 + $0x70] sm:$0xff]   ;;  %v10355_v44 = vld [vmem:[%s11199_s14 + $0x78] sm:$0xff]  }
 0x1b6   : > { %9019 = vmatmul.mubr.msk.bf16.gmra.mrb[16].mxu1 %vm455_vm1, %v10293_v45  ;;  %9291 = vmatmul.mubr.msk.bf16.gmra.mrb[16].mxu0 %vm455_vm1, %v10294_v46  ;;  %v10356_v45 = vld [vmem:[%s11199_s14 + $0x80] sm:$0xff]   ;;  %v10357_v46 = vld [vmem:[%s11199_s14 + $0x88] sm:$0xff]  }
 0x1b7   : > { %9022 = vmatprep.mubr.msk.bf16.mxu1 %vm455_vm1, %v10295_v47  ;;  %9294 = vmatprep.mubr.msk.bf16.mxu0 %vm455_vm1, %v10296_v48  ;;  %v10358_v47 = vld [vmem:[%s11199_s14 + $0x90] sm:$0xff]   ;;  %v10359_v48 = vld [vmem:[%s11199_s14 + $0x98] sm:$0xff]  }
 0x1be   : > { %9023 = vmatmul.mubr.msk.bf16.gmra.mrb[20].mxu1 %vm455_vm1, %v10297_v49  ;;  %9295 = vmatmul.mubr.msk.bf16.gmra.mrb[20].mxu0 %vm455_vm1, %v10298_v50  ;;  %v10360_v49 = vld [vmem:[%s11199_s14 + $0xa0] sm:$0xff]   ;;  %v10361_v50 = vld [vmem:[%s11199_s14 + $0xa8] sm:$0xff]  }
 0x1bf   : > { %9026 = vmatprep.mubr.msk.bf16.mxu1 %vm455_vm1, %v10299_v51  ;;  %9298 = vmatprep.mubr.msk.bf16.mxu0 %vm455_vm1, %v10300_v52  ;;  %v10362_v51 = vld [vmem:[%s11199_s14 + $0xb0] sm:$0xff]  }
 0x1c6   : > { %9027 = vmatmul.mubr.msk.bf16.gmra.mrb[24].mxu1 %vm455_vm1, %v10301_v53  ;;  %9299 = vmatmul.mubr.msk.bf16.gmra.mrb[24].mxu0 %vm455_vm1, %v10302_v54 }
 0x1c7   : > { %9030 = vmatprep.mubr.msk.bf16.mxu1 %vm455_vm1, %v10303_v55  ;;  %9302 = vmatprep.mubr.msk.bf16.mxu0 %vm455_vm1, %v10304_v56  ;;  %v10363_v55 = vld [vmem:[%s11199_s14 + $0xb8] sm:$0xff]  }
 0x1ce   : > { %9031 = vmatmul.mubr.msk.bf16.gmra.mrb[28].mxu1 %vm455_vm1, %v10305_v57  ;;  %9303 = vmatmul.mubr.msk.bf16.gmra.mrb[28].mxu0 %vm455_vm1, %v10306_v58  ;;  %v10364_v57 = vld [vmem:[%s11199_s14 + $0xc0] sm:$0xff]  }
 0x1cf   : > { %9034 = vmatprep.mubr.msk.bf16.mxu1 %vm455_vm1, %v10307_v59  ;;  %9306 = vmatprep.mubr.msk.bf16.mxu0 %vm455_vm1, %v10308_v60 }
 0x1d6   : > { %9035 = vmatmul.mubr.msk.bf16.gmra.mrb[32].mxu1 %vm455_vm1, %v10309_v61  ;;  %9307 = vmatmul.mubr.msk.bf16.gmra.mrb[32].mxu0 %vm455_vm1, %v10310_v62  ;;  %v10365_v61 = vld [vmem:[%s11199_s14 + $0xc8] sm:$0xff]  }
 0x1d7   : > { %9038 = vmatprep.mubr.msk.bf16.mxu1 %vm455_vm1, %v10312_v63  ;;  %9310 = vmatprep.mubr.msk.bf16.mxu0 %vm455_vm1, %v10313_v0  ;;  %v10366_v63 = vld [vmem:[%s11199_s14 + $0xd0] sm:$0xff]  }
 0x1de   : > { %9039 = vmatmul.mubr.msk.bf16.gmra.mrb[36].mxu1 %vm455_vm1, %v10314_v1  ;;  %9311 = vmatmul.mubr.msk.bf16.gmra.mrb[36].mxu0 %vm455_vm1, %v10315_v2 }
 0x1df   : > { %9042 = vmatprep.mubr.msk.bf16.mxu1 %vm455_vm1, %v10316_v3  ;;  %9314 = vmatprep.mubr.msk.bf16.mxu0 %vm455_vm1, %v10317_v4  ;;  %v10367_v3 = vld [vmem:[%s11199_s14 + $0xd8] sm:$0xff]  }
 0x1e6   : > { %9043 = vmatmul.mubr.msk.bf16.gmra.mrb[40].mxu1 %vm455_vm1, %v10318_v5  ;;  %9315 = vmatmul.mubr.msk.bf16.gmra.mrb[40].mxu0 %vm455_vm1, %v10319_v6  ;;  %v10368_v5 = vld [vmem:[%s11199_s14 + $0xe0] sm:$0xff]  }
 0x1e7   : > { %9046 = vmatprep.mubr.msk.bf16.mxu1 %vm455_vm1, %v10320_v7  ;;  %9318 = vmatprep.mubr.msk.bf16.mxu0 %vm455_vm1, %v10321_v8 }
 0x1ee   : > { %9047 = vmatmul.mubr.msk.bf16.gmra.mrb[44].mxu1 %vm455_vm1, %v10322_v9  ;;  %9319 = vmatmul.mubr.msk.bf16.gmra.mrb[44].mxu0 %vm455_vm1, %v10323_v10  ;;  %v10369_v9 = vld [vmem:[%s11199_s14 + $0xe8] sm:$0xff]  }
 0x1ef   : > { %9050 = vmatprep.mubr.msk.bf16.mxu1 %vm455_vm1, %v10324_v11  ;;  %9322 = vmatprep.mubr.msk.bf16.mxu0 %vm455_vm1, %v10325_v12  ;;  %v10370_v11 = vld [vmem:[%s11199_s14 + $0xf0] sm:$0xff]  }
 0x1f6   : > { %9051 = vmatmul.mubr.msk.bf16.gmra.mrb[48].mxu1 %vm455_vm1, %v10326_v13  ;;  %9323 = vmatmul.mubr.msk.bf16.gmra.mrb[48].mxu0 %vm455_vm1, %v10327_v14 }
 0x1f7   : > { %9054 = vmatprep.mubr.msk.bf16.mxu1 %vm455_vm1, %v10328_v15  ;;  %9326 = vmatprep.mubr.msk.bf16.mxu0 %vm455_vm1, %v10329_v16  ;;  %v10371_v15 = vld [vmem:[%s11199_s14 + $0xf8] sm:$0xff]  }
 0x1fe   : > { %9055 = vmatmul.mubr.msk.bf16.gmra.mrb[52].mxu1 %vm455_vm1, %v10330_v19  ;;  %9327 = vmatmul.mubr.msk.bf16.gmra.mrb[52].mxu0 %vm455_vm1, %v10331_v20 }
 0x1ff   : > { %9058 = vmatprep.mubr.msk.bf16.mxu1 %vm455_vm1, %v10332_v21  ;;  %9330 = vmatprep.mubr.msk.bf16.mxu0 %vm455_vm1, %v10333_v22 }
 0x206   : > { %9059 = vmatmul.mubr.msk.bf16.gmra.mrb[56].mxu1 %vm455_vm1, %v10334_v23  ;;  %9331 = vmatmul.mubr.msk.bf16.gmra.mrb[56].mxu0 %vm455_vm1, %v10335_v24 }
 0x207   : > { %9062 = vmatprep.mubr.msk.bf16.mxu1 %vm455_vm1, %v10336_v25  ;;  %9334 = vmatprep.mubr.msk.bf16.mxu0 %vm455_vm1, %v10337_v27 }
 0x20e   : > { %9063 = vmatmul.mubr.msk.bf16.gmra.mrb[60].mxu1 %vm455_vm1, %v10338_v28  ;;  %9335 = vmatmul.mubr.msk.bf16.gmra.mrb[60].mxu0 %vm455_vm1, %v10339_v29 }
 0x20f   : > { %9342 = vmatprep.mubr.msk.bf16.mxu0 %vm455_vm1, %v10340_v30 }
 0x216   : > { %9343 = vmatmul.mubr.msk.bf16.vlgmr.msra.gmra.mrb[0].mxu0 %vm455_vm1, %v10341_v31 }
 0x217   : > { %9346 = vmatprep.mubr.msk.bf16.mxu0 %vm455_vm1, %v10342_v32 }
 0x21e   : > { %9347 = vmatmul.mubr.msk.bf16.gmra.mrb[4].mxu0 %vm455_vm1, %v10343_v26 }
 0x21f   : > { %9350 = vmatprep.mubr.msk.bf16.mxu0 %vm455_vm1, %v10344_v34 }
 0x226   : > { %9351 = vmatmul.mubr.msk.bf16.gmra.mrb[8].mxu0 %vm455_vm1, %v10345_v35 }
 0x227   : > { %9354 = vmatprep.mubr.msk.bf16.mxu0 %vm455_vm1, %v10346_v36 }
 0x22e   : > { %9355 = vmatmul.mubr.msk.bf16.gmra.mrb[12].mxu0 %vm455_vm1, %v10347_v37 }
 0x22f   : > { %9358 = vmatprep.mubr.msk.bf16.mxu0 %vm455_vm1, %v10348_v33 }
 0x236   : > { %9359 = vmatmul.mubr.msk.bf16.gmra.mrb[16].mxu0 %vm455_vm1, %v10349_v38 }
 0x237   : > { %9362 = vmatprep.mubr.msk.bf16.mxu0 %vm455_vm1, %v10350_v39 }
 0x23e   : > { %9363 = vmatmul.mubr.msk.bf16.gmra.mrb[20].mxu0 %vm455_vm1, %v10351_v40 }
 0x23f   : > { %9366 = vmatprep.mubr.msk.bf16.mxu0 %vm455_vm1, %v10352_v41 }
 0x246   : > { %9367 = vmatmul.mubr.msk.bf16.gmra.mrb[24].mxu0 %vm455_vm1, %v10353_v42 }
 0x247   : > { %9370 = vmatprep.mubr.msk.bf16.mxu0 %vm455_vm1, %v10354_v43 }
 0x24e   : > { %9371 = vmatmul.mubr.msk.bf16.gmra.mrb[28].mxu0 %vm455_vm1, %v10355_v44 }
 0x24f   : > { %9374 = vmatprep.mubr.msk.bf16.mxu0 %vm455_vm1, %v10356_v45 }
 0x256   : > { %9375 = vmatmul.mubr.msk.bf16.gmra.mrb[32].mxu0 %vm455_vm1, %v10357_v46 }
 0x257   : > { %9378 = vmatprep.mubr.msk.bf16.mxu0 %vm455_vm1, %v10358_v47 }
 0x25e   : > { %9379 = vmatmul.mubr.msk.bf16.gmra.mrb[36].mxu0 %vm455_vm1, %v10359_v48 }
 0x25f   : > { %9382 = vmatprep.mubr.msk.bf16.mxu0 %vm455_vm1, %v10360_v49 }
 0x266   : > { %9383 = vmatmul.mubr.msk.bf16.gmra.mrb[40].mxu0 %vm455_vm1, %v10361_v50 }
 0x267   : > { %9386 = vmatprep.mubr.msk.bf16.mxu0 %vm455_vm1, %v10362_v51 }
 0x269   : > { %v11379_v52 = vpop.f32.mrb[0].mxu1 }
 0x26a   : > { %v11381_v53 = vpop.f32.mrb[1].mxu1 }
 0x26b   : > { %v11383_v54 = vpop.f32.mrb[2].mxu1 }
 0x26c   : > { %v11386_v56 = vpop.f32.mrb[3].mxu1 }
 0x26e   : > { %9387 = vmatmul.mubr.msk.bf16.gmra.mrb[44].mxu0 %vm455_vm1, %v10363_v55 }
 0x26f   : > { %9390 = vmatprep.mubr.msk.bf16.mxu0 %vm455_vm1, %v10364_v57 }
 0x271   : > { %v11391_v58 = vpop.f32.mrb[4].mxu1 }
 0x272   : > { %v11393_v59 = vpop.f32.mrb[5].mxu1 }
 0x273   : > { %v11395_v60 = vpop.f32.mrb[6].mxu1 }
 0x274   : > { %v11398_v62 = vpop.f32.mrb[7].mxu1 }
 0x276   : > { %9391 = vmatmul.mubr.msk.bf16.gmra.mrb[48].mxu0 %vm455_vm1, %v10365_v61 }
 0x277   : > { %9394 = vmatprep.mubr.msk.bf16.mxu0 %vm455_vm1, %v10366_v63 }
 0x279   : > { %v11403_v0 = vpop.f32.mrb[8].mxu1 }
 0x27a   : > { %v11405_v1 = vpop.f32.mrb[9].mxu1 }
 0x27b   : > { %v11407_v2 = vpop.f32.mrb[10].mxu1 }
 0x27c   : > { %v11410_v4 = vpop.f32.mrb[11].mxu1 }
 0x27e   : > { %9395 = vmatmul.mubr.msk.bf16.gmra.mrb[52].mxu0 %vm455_vm1, %v10367_v3 }
 0x27f   : > { %9398 = vmatprep.mubr.msk.bf16.mxu0 %vm455_vm1, %v10368_v5 }
 0x281   : > { %v11415_v6 = vpop.f32.mrb[12].mxu1 }
 0x282   : > { %v11417_v7 = vpop.f32.mrb[13].mxu1 }
 0x283   : > { %v11419_v8 = vpop.f32.mrb[14].mxu1 }
 0x284   : > { %v11422_v10 = vpop.f32.mrb[15].mxu1 }
 0x286   : > { %9399 = vmatmul.mubr.msk.bf16.gmra.mrb[56].mxu0 %vm455_vm1, %v10369_v9 }
 0x287   : > { %9402 = vmatprep.mubr.msk.bf16.mxu0 %vm455_vm1, %v10370_v11 }
 0x289   : > { %v11427_v12 = vpop.f32.mrb[16].mxu1 }
 0x28a   : > { %v11429_v13 = vpop.f32.mrb[17].mxu1 }
 0x28b   : > { %v11431_v14 = vpop.f32.mrb[18].mxu1 }
 0x28c   : > { %v11434_v16 = vpop.f32.mrb[19].mxu1 }
 0x28e   : > { %9403 = vmatmul.mubr.msk.bf16.gmra.mrb[60].mxu0 %vm455_vm1, %v10371_v15 }
 0x291   : > { %v11437_v17 = vpop.f32.mrb[20].mxu1 }
 0x292   : > { %v11439_v18 = vpop.f32.mrb[21].mxu1 }
 0x293   : > { %v11441_v19 = vpop.f32.mrb[22].mxu1 }
 0x294   : > { %v11443_v20 = vpop.f32.mrb[23].mxu1 }
 0x299   : > { %v11445_v21 = vpop.f32.mrb[24].mxu1 }
 0x29a   : > { %v11447_v22 = vpop.f32.mrb[25].mxu1 }
 0x29b   : > { %v11449_v23 = vpop.f32.mrb[26].mxu1 }
 0x29c   : > { %v11451_v24 = vpop.f32.mrb[27].mxu1 }
 0x2a1   : > { %v11453_v25 = vpop.f32.mrb[28].mxu1 }
 0x2a2   : > { %v11455_v27 = vpop.f32.mrb[29].mxu1 }
 0x2a3   : > { %v11457_v28 = vpop.f32.mrb[30].mxu1 }
 0x2a4   : > { %v11459_v29 = vpop.f32.mrb[31].mxu1 }
 0x2a9   : > { %v11461_v30 = vpop.f32.mrb[32].mxu1 }
 0x2aa   : > { %v11463_v31 = vpop.f32.mrb[33].mxu1 }
 0x2ab   : > { %v11465_v32 = vpop.f32.mrb[34].mxu1 }
 0x2ac   : > { %v11467_v26 = vpop.f32.mrb[35].mxu1 }
 0x2b1   : > { %v11469_v34 = vpop.f32.mrb[36].mxu1 }
 0x2b2   : > { %v11471_v35 = vpop.f32.mrb[37].mxu1 }
 0x2b3   : > { %v11473_v36 = vpop.f32.mrb[38].mxu1 }
 0x2b4   : > { %v11475_v37 = vpop.f32.mrb[39].mxu1 }
 0x2b9   : > { %v11477_v33 = vpop.f32.mrb[40].mxu1 }
 0x2ba   : > { %v11479_v38 = vpop.f32.mrb[41].mxu1 }
 0x2bb   : > { %v11481_v39 = vpop.f32.mrb[42].mxu1 }
 0x2bc   : > { %v11483_v40 = vpop.f32.mrb[43].mxu1 }
 0x2c1   : > { %v11485_v41 = vpop.f32.mrb[44].mxu1 }
 0x2c2   : > { %v11487_v42 = vpop.f32.mrb[45].mxu1 }
 0x2c3   : > { %v11489_v43 = vpop.f32.mrb[46].mxu1 }
 0x2c4   : > { %v11491_v44 = vpop.f32.mrb[47].mxu1 }
 0x2c5   : > { %12567 = vst [vmem:[#allocation2_spill] sm:$0xff] %v11491_v44 }
 0x2c9   : > { %v11493_v45 = vpop.f32.mrb[48].mxu1 }
 0x2ca   : > { %12568 = vst [vmem:[#allocation3_spill] sm:$0xff] %v11493_v45  ;;  %v11495_v46 = vpop.f32.mrb[49].mxu1 }
 0x2cb   : > { %12569 = vst [vmem:[#allocation4_spill] sm:$0xff] %v11495_v46  ;;  %v11497_v47 = vpop.f32.mrb[50].mxu1 }
 0x2cc   : > { %12570 = vst [vmem:[#allocation5_spill] sm:$0xff] %v11497_v47  ;;  %v11499_v48 = vpop.f32.mrb[51].mxu1 }
 0x2cd   : > { %12571 = vst [vmem:[#allocation6_spill] sm:$0xff] %v11499_v48 }
 0x2d1   : > { %v11501_v49 = vpop.f32.mrb[52].mxu1 }
 0x2d2   : > { %12572 = vst [vmem:[#allocation7_spill] sm:$0xff] %v11501_v49  ;;  %v11503_v50 = vpop.f32.mrb[53].mxu1 }
 0x2d3   : > { %12573 = vst [vmem:[#allocation8_spill] sm:$0xff] %v11503_v50  ;;  %v11505_v51 = vpop.f32.mrb[54].mxu1 }
 0x2d4   : > { %12574 = vst [vmem:[#allocation9_spill] sm:$0xff] %v11505_v51  ;;  %v11507_v55 = vpop.f32.mrb[55].mxu1 }
 0x2d5   : > { %12575 = vst [vmem:[#allocation10_spill] sm:$0xff] %v11507_v55  ;;  %v11528_v55 = vld [vmem:[%s12539_s2] ss:$0 sm:$0xff] }
 0x2d9   : > { %v11509_v57 = vpop.f32.mrb[56].mxu1 }
 0x2da   : > { %12576 = vst [vmem:[#allocation11_spill] sm:$0xff] %v11509_v57  ;;  %v11511_v61 = vpop.f32.mrb[57].mxu1 }
 0x2db   : > { %12577 = vst [vmem:[#allocation12_spill] sm:$0xff] %v11511_v61  ;;  %v11513_v63 = vpop.f32.mrb[58].mxu1  ;;  %v9472_v61 = vadd.f32 %v11379_v52, %v11528_v55 }
 0x2dc   : > { %12578 = vst [vmem:[#allocation13_spill] sm:$0xff] %v11513_v63  ;;  %v11515_v3 = vpop.f32.mrb[59].mxu1  ;;  %v9474_v63 = vadd.f32 %v11528_v55, %v11381_v53  ;;  %v9480_v53 = vadd.f32 %v11391_v58, %v11528_v55 }
 0x2dd   : > { %12579 = vst [vmem:[#allocation14_spill] sm:$0xff] %v11515_v3 }
 0x2e1   : > { %v11517_v5 = vpop.f32.mrb[60].mxu1 }
 0x2e2   : > { %12580 = vst [vmem:[#allocation15_spill] sm:$0xff] %v11517_v5  ;;  %v11519_v9 = vpop.f32.mrb[61].mxu1  ;;  %v9476_v5 = vadd.f32 %v11383_v54, %v11528_v55  ;;  %v9482_v54 = vadd.f32 %v11528_v55, %v11393_v59 }
 0x2e3   : > { %12581 = vst [vmem:[#allocation16_spill] sm:$0xff] %v11519_v9  ;;  %v11521_v11 = vpop.f32.mrb[62].mxu1 }
 0x2e4   : > { %12582 = vst [vmem:[#allocation17_spill] sm:$0xff] %v11521_v11  ;;  %v11523_v15 = vpop.f32.mrb[63].mxu1 }
 0x2e5   : > { %12583 = vst [vmem:[#allocation18_spill] sm:$0xff] %v11523_v15  ;;  %v9478_v15 = vadd.f32 %v11528_v55, %v11386_v56  ;;  %v9484_v56 = vadd.f32 %v11395_v60, %v11528_v55  ;;  %v9488_v60 = vadd.f32 %v11403_v0, %v11528_v55 }
 0x2e9   : > { %v9344_v3 = vpop.f32.mrb[0].mxu0 }
 0x2ea   : > { %v9473_v9 = vadd.f32 %v9472_v61, %v9344_v3  ;;  %v6142_v57 = vpop.f32.mrb[1].mxu0 }
 0x2eb   : > { %v9475_v11 = vadd.f32 %v9474_v63, %v6142_v57  ;;  %v9345_v51 = vpop.f32.mrb[2].mxu0 }
 0x2ec   : > { %v9477_v50 = vadd.f32 %v9476_v5, %v9345_v51  ;;  %v6145_v49 = vpop.f32.mrb[3].mxu0  ;;  %v6463_v47 = vmax.f32 %v9473_v9, 0.0 }
 0x2ed   : > { %v9479_v48 = vadd.f32 %v9478_v15, %v6145_v49  ;;  %v6461_v52 = vmax.f32 %v9475_v11, 0.0  ;;  %v9486_v49 = vadd.f32 %v11528_v55, %v11398_v62  ;;  %v9490_v62 = vadd.f32 %v11528_v55, %v11405_v1 }
 0x2ee   : > { %v6464_v46 = vmax.f32 %v9477_v50, 0.0 }
 0x2ef   : > { %v6462_v45 = vmax.f32 %v9479_v48, 0.0 }
 0x2f0   : > { %v6526_v44 = vpack.c.bf16 %v6464_v46, %v6463_v47 }
 0x2f1   : > { %v6525_v61 = vpack.c.bf16 %v6462_v45, %v6461_v52  ;;  %v9348_v3 = vpop.f32.mrb[4].mxu0  ;;  %v9492_v52 = vadd.f32 %v11407_v2, %v11528_v55  ;;  %v9496_v2 = vadd.f32 %v11415_v6, %v11528_v55 }
 0x2f2   : > { %v9481_v51 = vadd.f32 %v9480_v53, %v9348_v3  ;;  %v6158_v57 = vpop.f32.mrb[5].mxu0 }
 0x2f3   : > { %v9483_v50 = vadd.f32 %v9482_v54, %v6158_v57  ;;  %v9349_v48 = vpop.f32.mrb[6].mxu0  ;;  %9408 = vmatprep.mubr.msk.bf16.mxu1 %vm6565_vm2, %v6525_v61 }
 0x2f4   : > { %v9485_v58 = vadd.f32 %v9484_v56, %v9349_v48  ;;  %v6161_v46 = vpop.f32.mrb[7].mxu0  ;;  %9409 = vmatmul.mubr.msk.bf16.vlgmr.msra.gmra.mrb[64].mxu1 %vm6565_vm2, %v6526_v44  ;;  %v6467_v59 = vmax.f32 %v9481_v51, 0.0  ;;  %v9494_v44 = vadd.f32 %v11528_v55, %v11410_v4  ;;  %v9498_v4 = vadd.f32 %v11528_v55, %v11417_v7 }
 0x2f5   : > { %v9487_v47 = vadd.f32 %v9486_v49, %v6161_v46  ;;  %v6465_v63 = vmax.f32 %v9483_v50, 0.0 }
 0x2f6   : > { %v6468_v45 = vmax.f32 %v9485_v58, 0.0 }
 0x2f7   : > { %v6466_v5 = vmax.f32 %v9487_v47, 0.0  ;;  %v9500_v47 = vadd.f32 %v11419_v8, %v11528_v55  ;;  %v9504_v8 = vadd.f32 %v11427_v12, %v11528_v55 }
 0x2f8   : > { %v6528_v9 = vpack.c.bf16 %v6468_v45, %v6467_v59 }
 0x2f9   : > { %v6527_v11 = vpack.c.bf16 %v6466_v5, %v6465_v63  ;;  %v9352_v15 = vpop.f32.mrb[8].mxu0  ;;  %v9502_v63 = vadd.f32 %v11528_v55, %v11422_v10  ;;  %v9506_v10 = vadd.f32 %v11528_v55, %v11429_v13 }
 0x2fa   : > { %v9489_v53 = vadd.f32 %v9488_v60, %v9352_v15  ;;  %v6174_v54 = vpop.f32.mrb[9].mxu0 }
 0x2fb   : > { %v9491_v61 = vadd.f32 %v9490_v62, %v6174_v54  ;;  %v9353_v3 = vpop.f32.mrb[10].mxu0  ;;  %9412 = vmatprep.mubr.msk.bf16.mxu1 %vm6565_vm2, %v6527_v11 }
 0x2fc   : > { %v9493_v56 = vadd.f32 %v9492_v52, %v9353_v3  ;;  %v6177_v0 = vpop.f32.mrb[11].mxu0  ;;  %9413 = vmatmul.mubr.msk.bf16.gmra.mrb[68].mxu1 %vm6565_vm2, %v6528_v9  ;;  %v6471_v1 = vmax.f32 %v9489_v53, 0.0 }
 0x2fd   : > { %v9495_v51 = vadd.f32 %v9494_v44, %v6177_v0  ;;  %v6469_v49 = vmax.f32 %v9491_v61, 0.0  ;;  %v9508_v61 = vadd.f32 %v11431_v14, %v11528_v55  ;;  %v9510_v0 = vadd.f32 %v11528_v55, %v11434_v16 }
 0x2fe   : > { %v6472_v57 = vmax.f32 %v9493_v56, 0.0  ;;  %v9512_v14 = vadd.f32 %v11437_v17, %v11528_v55  ;;  %v9514_v16 = vadd.f32 %v11528_v55, %v11439_v18 }
 0x2ff   : > { %v6470_v50 = vmax.f32 %v9495_v51, 0.0 }
 0x300   : > { %v6530_v48 = vpack.c.bf16 %v6472_v57, %v6471_v1 }
 0x301   : > { %v6529_v58 = vpack.c.bf16 %v6470_v50, %v6469_v49  ;;  %v9356_v46 = vpop.f32.mrb[12].mxu0 }
 0x302   : > { %v9497_v59 = vadd.f32 %v9496_v2, %v9356_v46  ;;  %v6190_v45 = vpop.f32.mrb[13].mxu0 }
 0x303   : > { %v9499_v5 = vadd.f32 %v9498_v4, %v6190_v45  ;;  %v9357_v60 = vpop.f32.mrb[14].mxu0  ;;  %9416 = vmatprep.mubr.msk.bf16.mxu1 %vm6565_vm2, %v6529_v58 }
 0x304   : > { %v9501_v9 = vadd.f32 %v9500_v47, %v9357_v60  ;;  %v6193_v6 = vpop.f32.mrb[15].mxu0  ;;  %9417 = vmatmul.mubr.msk.bf16.gmra.mrb[72].mxu1 %vm6565_vm2, %v6530_v48  ;;  %v6475_v7 = vmax.f32 %v9497_v59, 0.0  ;;  %v9516_v47 = vadd.f32 %v11441_v19, %v11528_v55  ;;  %v9520_v19 = vadd.f32 %v11445_v21, %v11528_v55 }
 0x305   : > { %v9503_v62 = vadd.f32 %v9502_v63, %v6193_v6  ;;  %v6473_v15 = vmax.f32 %v9499_v5, 0.0  ;;  %v9518_v63 = vadd.f32 %v11528_v55, %v11443_v20  ;;  %v9522_v20 = vadd.f32 %v11528_v55, %v11447_v22 }
 0x306   : > { %v6476_v11 = vmax.f32 %v9501_v9, 0.0 }
 0x307   : > { %v6474_v52 = vmax.f32 %v9503_v62, 0.0 }
 0x308   : > { %v6532_v53 = vpack.c.bf16 %v6476_v11, %v6475_v7 }
 0x309   : > { %v6531_v54 = vpack.c.bf16 %v6474_v52, %v6473_v15  ;;  %v9360_v44 = vpop.f32.mrb[16].mxu0 }
 0x30a   : > { %v9505_v3 = vadd.f32 %v9504_v8, %v9360_v44  ;;  %v6206_v56 = vpop.f32.mrb[17].mxu0  ;;  %v9526_v44 = vadd.f32 %v11528_v55, %v11451_v24  ;;  %v9530_v24 = vadd.f32 %v11528_v55, %v11455_v27 }
 0x30b   : > { %v9507_v51 = vadd.f32 %v9506_v10, %v6206_v56  ;;  %v9361_v1 = vpop.f32.mrb[18].mxu0  ;;  %9420 = vmatprep.mubr.msk.bf16.mxu1 %vm6565_vm2, %v6531_v54 }
 0x30c   : > { %v9509_v57 = vadd.f32 %v9508_v61, %v9361_v1  ;;  %v6209_v12 = vpop.f32.mrb[19].mxu0  ;;  %9421 = vmatmul.mubr.msk.bf16.gmra.mrb[76].mxu1 %vm6565_vm2, %v6532_v53  ;;  %v6479_v13 = vmax.f32 %v9505_v3, 0.0  ;;  %v9524_v53 = vadd.f32 %v11449_v23, %v11528_v55  ;;  %v9528_v23 = vadd.f32 %v11453_v25, %v11528_v55 }
 0x30d   : > { %v9511_v49 = vadd.f32 %v9510_v0, %v6209_v12  ;;  %v6477_v2 = vmax.f32 %v9507_v51, 0.0 }
 0x30e   : > { %v6480_v50 = vmax.f32 %v9509_v57, 0.0 }
 0x30f   : > { %v6478_v48 = vmax.f32 %v9511_v49, 0.0 }
 0x310   : > { %v6534_v4 = vpack.c.bf16 %v6480_v50, %v6479_v13  ;;  %v9532_v50 = vadd.f32 %v11457_v28, %v11528_v55  ;;  %v9536_v28 = vadd.f32 %v11461_v30, %v11528_v55 }
 0x311   : > { %v6533_v58 = vpack.c.bf16 %v6478_v48, %v6477_v2  ;;  %v9364_v46 = vpop.f32.mrb[20].mxu0 }
 0x312   : > { %v9513_v59 = vadd.f32 %v9512_v14, %v9364_v46  ;;  %v6222_v45 = vpop.f32.mrb[21].mxu0  ;;  %v9534_v14 = vadd.f32 %v11528_v55, %v11459_v29  ;;  %v9538_v29 = vadd.f32 %v11528_v55, %v11463_v31 }
 0x313   : > { %v9515_v5 = vadd.f32 %v9514_v16, %v6222_v45  ;;  %v9365_v60 = vpop.f32.mrb[22].mxu0  ;;  %9424 = vmatprep.mubr.msk.bf16.mxu1 %vm6565_vm2, %v6533_v58 }
 0x314   : > { %v9517_v9 = vadd.f32 %v9516_v47, %v9365_v60  ;;  %v6225_v17 = vpop.f32.mrb[23].mxu0  ;;  %9425 = vmatmul.mubr.msk.bf16.gmra.mrb[80].mxu1 %vm6565_vm2, %v6534_v4  ;;  %v6483_v18 = vmax.f32 %v9513_v59, 0.0 }
 0x315   : > { %v9519_v6 = vadd.f32 %v9518_v63, %v6225_v17  ;;  %v6481_v7 = vmax.f32 %v9515_v5, 0.0 }
 0x316   : > { %v6484_v62 = vmax.f32 %v9517_v9, 0.0  ;;  %v9540_v9 = vadd.f32 %v11465_v32, %v11528_v55  ;;  %v9544_v32 = vadd.f32 %v11469_v34, %v11528_v55 }
 0x317   : > { %v6482_v11 = vmax.f32 %v9519_v6, 0.0 }
 0x318   : > { %v6536_v15 = vpack.c.bf16 %v6484_v62, %v6483_v18  ;;  %v9542_v18 = vadd.f32 %v11528_v55, %v11467_v26  ;;  %v9546_v26 = vadd.f32 %v11528_v55, %v11471_v35 }
 0x319   : > { %v6535_v52 = vpack.c.bf16 %v6482_v11, %v6481_v7  ;;  %v9368_v8 = vpop.f32.mrb[24].mxu0 }
 0x31a   : > { %v9521_v10 = vadd.f32 %v9520_v19, %v9368_v8  ;;  %v6238_v54 = vpop.f32.mrb[25].mxu0 }
 0x31b   : > { %v9523_v61 = vadd.f32 %v9522_v20, %v6238_v54  ;;  %v9369_v3 = vpop.f32.mrb[26].mxu0  ;;  %9428 = vmatprep.mubr.msk.bf16.mxu1 %vm6565_vm2, %v6535_v52  ;;  %v9548_v54 = vadd.f32 %v11473_v36, %v11528_v55  ;;  %v9552_v36 = vadd.f32 %v11477_v33, %v11528_v55 }
 0x31c   : > { %v9525_v56 = vadd.f32 %v9524_v53, %v9369_v3  ;;  %v6241_v21 = vpop.f32.mrb[27].mxu0  ;;  %9429 = vmatmul.mubr.msk.bf16.gmra.mrb[84].mxu1 %vm6565_vm2, %v6536_v15  ;;  %v6487_v22 = vmax.f32 %v9521_v10, 0.0  ;;  %v9550_v3 = vadd.f32 %v11528_v55, %v11475_v37  ;;  %v9554_v37 = vadd.f32 %v11528_v55, %v11479_v38 }
 0x31d   : > { %v9527_v0 = vadd.f32 %v9526_v44, %v6241_v21  ;;  %v6485_v1 = vmax.f32 %v9523_v61, 0.0 }
 0x31e   : > { %v6488_v51 = vmax.f32 %v9525_v56, 0.0 }
 0x31f   : > { %v6486_v57 = vmax.f32 %v9527_v0, 0.0 }
 0x320   : > { %v6538_v12 = vpack.c.bf16 %v6488_v51, %v6487_v22 }
 0x321   : > { %v6537_v49 = vpack.c.bf16 %v6486_v57, %v6485_v1  ;;  %v9372_v13 = vpop.f32.mrb[28].mxu0 }
 0x322   : > { %v9529_v2 = vadd.f32 %v9528_v23, %v9372_v13  ;;  %v6254_v48 = vpop.f32.mrb[29].mxu0 }
 0x323   : > { %v9531_v4 = vadd.f32 %v9530_v24, %v6254_v48  ;;  %v9373_v16 = vpop.f32.mrb[30].mxu0  ;;  %9432 = vmatprep.mubr.msk.bf16.mxu1 %vm6565_vm2, %v6537_v49  ;;  %v9556_v49 = vadd.f32 %v11481_v39, %v11528_v55  ;;  %v9560_v39 = vadd.f32 %v11485_v41, %v11528_v55 }
 0x324   : > { %v9533_v58 = vadd.f32 %v9532_v50, %v9373_v16  ;;  %v6257_v25 = vpop.f32.mrb[31].mxu0  ;;  %9433 = vmatmul.mubr.msk.bf16.gmra.mrb[88].mxu1 %vm6565_vm2, %v6538_v12  ;;  %v6491_v27 = vmax.f32 %v9529_v2, 0.0  ;;  %v9558_v2 = vadd.f32 %v11528_v55, %v11483_v40  ;;  %v9562_v40 = vadd.f32 %v11528_v55, %v11487_v42 }
 0x325   : > { %v9535_v46 = vadd.f32 %v9534_v14, %v6257_v25  ;;  %v6489_v59 = vmax.f32 %v9531_v4, 0.0 }
 0x326   : > { %v6492_v47 = vmax.f32 %v9533_v58, 0.0 }
 0x327   : > { %v6490_v45 = vmax.f32 %v9535_v46, 0.0 }
 0x328   : > { %v6540_v63 = vpack.c.bf16 %v6492_v47, %v6491_v27 }
 0x329   : > { %v6539_v5 = vpack.c.bf16 %v6490_v45, %v6489_v59  ;;  %v9376_v60 = vpop.f32.mrb[32].mxu0  ;;  %v9564_v45 = vadd.f32 %v11489_v43, %v11528_v55  ;;  %v12585_v43 = vld [vmem:[#allocation3_spill] sm:$0xff] }
 0x32a   : > { %v9537_v17 = vadd.f32 %v9536_v28, %v9376_v60  ;;  %v6270_v6 = vpop.f32.mrb[33].mxu0 }
 0x32b   : > { %v9539_v62 = vadd.f32 %v9538_v29, %v6270_v6  ;;  %v9377_v7 = vpop.f32.mrb[34].mxu0  ;;  %9436 = vmatprep.mubr.msk.bf16.mxu1 %vm6565_vm2, %v6539_v5  ;;  %v12584_v29 = vld [vmem:[#allocation2_spill] sm:$0xff] }
 0x32c   : > { %v9541_v11 = vadd.f32 %v9540_v9, %v9377_v7  ;;  %v6273_v30 = vpop.f32.mrb[35].mxu0  ;;  %9437 = vmatmul.mubr.msk.bf16.gmra.mrb[92].mxu1 %vm6565_vm2, %v6540_v63  ;;  %v6495_v31 = vmax.f32 %v9537_v17, 0.0  ;;  %v9566_v5 = vadd.f32 %v11528_v55, %v12584_v29 }
 0x32d   : > { %v9543_v19 = vadd.f32 %v9542_v18, %v6273_v30  ;;  %v6493_v20 = vmax.f32 %v9539_v62, 0.0 }
 0x32e   : > { %v6496_v15 = vmax.f32 %v9541_v11, 0.0  ;;  %v9568_v11 = vadd.f32 %v12585_v43, %v11528_v55 }
 0x32f   : > { %v6494_v52 = vmax.f32 %v9543_v19, 0.0  ;;  %v12586_v19 = vld [vmem:[#allocation4_spill] sm:$0xff] }
 0x330   : > { %v6542_v8 = vpack.c.bf16 %v6496_v15, %v6495_v31  ;;  %v9570_v31 = vadd.f32 %v11528_v55, %v12586_v19  ;;  %v12597_v19 = vld [vmem:[#allocation15_spill] sm:$0xff] }
 0x331   : > { %v6541_v53 = vpack.c.bf16 %v6494_v52, %v6493_v20  ;;  %v9380_v10 = vpop.f32.mrb[36].mxu0  ;;  %v12587_v52 = vld [vmem:[#allocation5_spill] sm:$0xff] }
 0x332   : > { %v9545_v44 = vadd.f32 %v9544_v32, %v9380_v10  ;;  %v6286_v61 = vpop.f32.mrb[37].mxu0  ;;  %v9572_v32 = vadd.f32 %v12587_v52, %v11528_v55 }
 0x333   : > { %v9547_v56 = vadd.f32 %v9546_v26, %v6286_v61  ;;  %v9381_v21 = vpop.f32.mrb[38].mxu0  ;;  %9440 = vmatprep.mubr.msk.bf16.mxu1 %vm6565_vm2, %v6541_v53  ;;  %v12588_v53 = vld [vmem:[#allocation6_spill] sm:$0xff] }
 0x334   : > { %v9549_v0 = vadd.f32 %v9548_v54, %v9381_v21  ;;  %v6289_v34 = vpop.f32.mrb[39].mxu0  ;;  %9441 = vmatmul.mubr.msk.bf16.gmra.mrb[96].mxu1 %vm6565_vm2, %v6542_v8  ;;  %v6499_v35 = vmax.f32 %v9545_v44, 0.0  ;;  %v9574_v10 = vadd.f32 %v11528_v55, %v12588_v53 }
 0x335   : > { %v9551_v22 = vadd.f32 %v9550_v3, %v6289_v34  ;;  %v6497_v1 = vmax.f32 %v9547_v56, 0.0 }
 0x336   : > { %v6500_v51 = vmax.f32 %v9549_v0, 0.0 }
 0x337   : > { %v6498_v57 = vmax.f32 %v9551_v22, 0.0 }
 0x338   : > { %v6544_v23 = vpack.c.bf16 %v6500_v51, %v6499_v35  ;;  %v12589_v35 = vld [vmem:[#allocation7_spill] sm:$0xff] }
 0x339   : > { %v6543_v12 = vpack.c.bf16 %v6498_v57, %v6497_v1  ;;  %v9384_v24 = vpop.f32.mrb[40].mxu0  ;;  %v9576_v51 = vadd.f32 %v12589_v35, %v11528_v55  ;;  %v12590_v57 = vld [vmem:[#allocation8_spill] sm:$0xff] }
 0x33a   : > { %v9553_v13 = vadd.f32 %v9552_v36, %v9384_v24  ;;  %v6302_v50 = vpop.f32.mrb[41].mxu0  ;;  %v9578_v36 = vadd.f32 %v11528_v55, %v12590_v57 }
 0x33b   : > { %v9555_v48 = vadd.f32 %v9554_v37, %v6302_v50  ;;  %v9385_v14 = vpop.f32.mrb[42].mxu0  ;;  %9444 = vmatprep.mubr.msk.bf16.mxu1 %vm6565_vm2, %v6543_v12  ;;  %v12591_v12 = vld [vmem:[#allocation9_spill] sm:$0xff]  ;;  %v12592_v50 = vld [vmem:[#allocation10_spill] sm:$0xff] }
 0x33c   : > { %v9557_v4 = vadd.f32 %v9556_v49, %v9385_v14  ;;  %v6305_v33 = vpop.f32.mrb[43].mxu0  ;;  %9445 = vmatmul.mubr.msk.bf16.gmra.mrb[100].mxu1 %vm6565_vm2, %v6544_v23  ;;  %v6503_v38 = vmax.f32 %v9553_v13, 0.0  ;;  %v9580_v24 = vadd.f32 %v12591_v12, %v11528_v55 }
 0x33d   : > { %v9559_v16 = vadd.f32 %v9558_v2, %v6305_v33  ;;  %v6501_v25 = vmax.f32 %v9555_v48, 0.0  ;;  %v9582_v2 = vadd.f32 %v11528_v55, %v12592_v50 }
 0x33e   : > { %v6504_v58 = vmax.f32 %v9557_v4, 0.0 }
 0x33f   : > { %v6502_v46 = vmax.f32 %v9559_v16, 0.0 }
 0x340   : > { %v6546_v27 = vpack.c.bf16 %v6504_v58, %v6503_v38 }
 0x341   : > { %v6545_v47 = vpack.c.bf16 %v6502_v46, %v6501_v25  ;;  %v9388_v59 = vpop.f32.mrb[44].mxu0 }
 0x342   : > { %v9561_v28 = vadd.f32 %v9560_v39, %v9388_v59  ;;  %v6318_v63 = vpop.f32.mrb[45].mxu0  ;;  %v12593_v39 = vld [vmem:[#allocation11_spill] sm:$0xff] }
 0x343   : > { %v9563_v60 = vadd.f32 %v9562_v40, %v6318_v63  ;;  %v9389_v9 = vpop.f32.mrb[46].mxu0  ;;  %9448 = vmatprep.mubr.msk.bf16.mxu1 %vm6565_vm2, %v6545_v47  ;;  %v12594_v47 = vld [vmem:[#allocation12_spill] sm:$0xff]  ;;  %v12595_v63 = vld [vmem:[#allocation13_spill] sm:$0xff] }
 0x344   : > { %v9565_v17 = vadd.f32 %v9564_v45, %v9389_v9  ;;  %v6321_v41 = vpop.f32.mrb[47].mxu0  ;;  %9449 = vmatmul.mubr.msk.bf16.gmra.mrb[104].mxu1 %vm6565_vm2, %v6546_v27  ;;  %v6507_v42 = vmax.f32 %v9561_v28, 0.0  ;;  %v9584_v27 = vadd.f32 %v12593_v39, %v11528_v55  ;;  %v9586_v59 = vadd.f32 %v11528_v55, %v12594_v47  ;;  %v12596_v9 = vld [vmem:[#allocation14_spill] sm:$0xff] }
 0x345   : > { %v9567_v6 = vadd.f32 %v9566_v5, %v6321_v41  ;;  %v6505_v62 = vmax.f32 %v9563_v60, 0.0  ;;  %v9588_v29 = vadd.f32 %v12595_v63, %v11528_v55 }
 0x346   : > { %v6508_v18 = vmax.f32 %v9565_v17, 0.0  ;;  %v9590_v17 = vadd.f32 %v11528_v55, %v12596_v9 }
 0x347   : > { %v6506_v7 = vmax.f32 %v9567_v6, 0.0 }
 0x348   : > { %v6548_v30 = vpack.c.bf16 %v6508_v18, %v6507_v42 }
 0x349   : > { %v6547_v15 = vpack.c.bf16 %v6506_v7, %v6505_v62  ;;  %v9392_v20 = vpop.f32.mrb[48].mxu0 }
 0x34a   : > { %v9569_v8 = vadd.f32 %v9568_v11, %v9392_v20  ;;  %v6334_v26 = vpop.f32.mrb[49].mxu0  ;;  %v12598_v20 = vld [vmem:[#allocation16_spill] sm:$0xff] }
 0x34b   : > { %v9571_v54 = vadd.f32 %v9570_v31, %v6334_v26  ;;  %v9393_v44 = vpop.f32.mrb[50].mxu0  ;;  %9452 = vmatprep.mubr.msk.bf16.mxu1 %vm6565_vm2, %v6547_v15  ;;  %v9592_v31 = vadd.f32 %v12597_v19, %v11528_v55  ;;  %v9594_v52 = vadd.f32 %v11528_v55, %v12598_v20  ;;  %v12599_v26 = vld [vmem:[#allocation17_spill] sm:$0xff] }
 0x34c   : > { %v9573_v61 = vadd.f32 %v9572_v32, %v9393_v44  ;;  %v6337_v3 = vpop.f32.mrb[51].mxu0  ;;  %9453 = vmatmul.mubr.msk.bf16.gmra.mrb[108].mxu1 %vm6565_vm2, %v6548_v30  ;;  %v6511_v21 = vmax.f32 %v9569_v8, 0.0  ;;  %v9596_v53 = vadd.f32 %v12599_v26, %v11528_v55  ;;  %v12600_v44 = vld [vmem:[#allocation18_spill] sm:$0xff] }
 0x34d   : > { %v9575_v56 = vadd.f32 %v9574_v10, %v6337_v3  ;;  %v6509_v34 = vmax.f32 %v9571_v54, 0.0 }
 0x34e   : > { %v6512_v0 = vmax.f32 %v9573_v61, 0.0  ;;  %v9598_v61 = vadd.f32 %v11528_v55, %v12600_v44  ;;  %v11693_v55 = vld [vmem:[%s12541_s4] ss:$0 sm:$0xff] }
 0x34f   : > { %v6510_v22 = vmax.f32 %v9575_v56, 0.0 }
 0x350   : > { %v6550_v1 = vpack.c.bf16 %v6512_v0, %v6511_v21 }
 0x351   : > { %v6549_v23 = vpack.c.bf16 %v6510_v22, %v6509_v34  ;;  %v9396_v37 = vpop.f32.mrb[52].mxu0 }
 0x352   : > { %v9577_v49 = vadd.f32 %v9576_v51, %v9396_v37  ;;  %v6350_v13 = vpop.f32.mrb[53].mxu0 }
 0x353   : > { %v9579_v48 = vadd.f32 %v9578_v36, %v6350_v13  ;;  %v9397_v14 = vpop.f32.mrb[54].mxu0  ;;  %9456 = vmatprep.mubr.msk.bf16.mxu1 %vm6565_vm2, %v6549_v23 }
 0x354   : > { %v9581_v4 = vadd.f32 %v9580_v24, %v9397_v14  ;;  %v6353_v33 = vpop.f32.mrb[55].mxu0  ;;  %9457 = vmatmul.mubr.msk.bf16.gmra.mrb[112].mxu1 %vm6565_vm2, %v6550_v1  ;;  %v6515_v38 = vmax.f32 %v9577_v49, 0.0 }
 0x355   : > { %v9583_v16 = vadd.f32 %v9582_v2, %v6353_v33  ;;  %v6513_v25 = vmax.f32 %v9579_v48, 0.0 }
 0x356   : > { %v6516_v58 = vmax.f32 %v9581_v4, 0.0 }
 0x357   : > { %v6514_v46 = vmax.f32 %v9583_v16, 0.0 }
 0x358   : > { %v6552_v40 = vpack.c.bf16 %v6516_v58, %v6515_v38 }
 0x359   : > { %v6551_v45 = vpack.c.bf16 %v6514_v46, %v6513_v25  ;;  %v9400_v28 = vpop.f32.mrb[56].mxu0 }
 0x35a   : > { %v9585_v5 = vadd.f32 %v9584_v27, %v9400_v28  ;;  %v6366_v60 = vpop.f32.mrb[57].mxu0 }
 0x35b   : > { %v9587_v41 = vadd.f32 %v9586_v59, %v6366_v60  ;;  %v9401_v6 = vpop.f32.mrb[58].mxu0  ;;  %9460 = vmatprep.mubr.msk.bf16.mxu1 %vm6565_vm2, %v6551_v45 }
 0x35c   : > { %v9589_v42 = vadd.f32 %v9588_v29, %v9401_v6  ;;  %v6369_v18 = vpop.f32.mrb[59].mxu0  ;;  %9461 = vmatmul.mubr.msk.bf16.gmra.mrb[116].mxu1 %vm6565_vm2, %v6552_v40  ;;  %v6519_v7 = vmax.f32 %v9585_v5, 0.0 }
 0x35d   : > { %v9591_v62 = vadd.f32 %v9590_v17, %v6369_v18  ;;  %v6517_v11 = vmax.f32 %v9587_v41, 0.0 }
 0x35e   : > { %v6520_v43 = vmax.f32 %v9589_v42, 0.0 }
 0x35f   : > { %v6518_v30 = vmax.f32 %v9591_v62, 0.0 }
 0x360   : > { %v6554_v15 = vpack.c.bf16 %v6520_v43, %v6519_v7 }
 0x361   : > { %v6553_v32 = vpack.c.bf16 %v6518_v30, %v6517_v11  ;;  %v9404_v8 = vpop.f32.mrb[60].mxu0 }
 0x362   : > { %v9593_v10 = vadd.f32 %v9592_v31, %v9404_v8  ;;  %v6382_v54 = vpop.f32.mrb[61].mxu0 }
 0x363   : > { %v9595_v3 = vadd.f32 %v9594_v52, %v6382_v54  ;;  %v9405_v56 = vpop.f32.mrb[62].mxu0  ;;  %9464 = vmatprep.mubr.msk.bf16.mxu1 %vm6565_vm2, %v6553_v32 }
 0x364   : > { %v9597_v21 = vadd.f32 %v9596_v53, %v9405_v56  ;;  %v6385_v0 = vpop.f32.mrb[63].mxu0  ;;  %9465 = vmatmul.mubr.msk.bf16.gmra.mrb[120].mxu1 %vm6565_vm2, %v6554_v15  ;;  %v6523_v22 = vmax.f32 %v9593_v10, 0.0 }
 0x365   : > { %v9599_v34 = vadd.f32 %v9598_v61, %v6385_v0  ;;  %v6521_v51 = vmax.f32 %v9595_v3, 0.0 }
 0x366   : > { %v6524_v35 = vmax.f32 %v9597_v21, 0.0 }
 0x367   : > { %v6522_v1 = vmax.f32 %v9599_v34, 0.0 }
 0x368   : > { %v6556_v57 = vpack.c.bf16 %v6524_v35, %v6523_v22 }
 0x369   : > { %v6555_v36 = vpack.c.bf16 %v6522_v1, %v6521_v51 }
 0x36b   : > { %9468 = vmatprep.mubr.msk.bf16.mxu1 %vm6565_vm2, %v6555_v36 }
 0x36c   : > { %9469 = vmatmul.mubr.msk.bf16.gmra.mrb[124].mxu1 %vm6565_vm2, %v6556_v57 }
 0x3c7   : > { %v9410_v23 = vpop.f32.mrb[64].mxu1 }
 0x3c8   : > { %v11696_v37 = vadd.f32 %v9410_v23, %v11693_v55  ;;  %v6699_v12 = vpop.f32.mrb[65].mxu1 }
 0x3c9   : > { %v11699_v24 = vadd.f32 %v11693_v55, %v6699_v12  ;;  %v9411_v49 = vpop.f32.mrb[66].mxu1 }
 0x3ca   : > { %v11702_v13 = vadd.f32 %v9411_v49, %v11693_v55  ;;  %v6702_v50 = vpop.f32.mrb[67].mxu1  ;;  %v6961_v2 = vsel %vm6954_vm3, %v11696_v37, -inf }
 0x3cb   : > { %v11707_v48 = vadd.f32 %v11693_v55, %v6702_v50  ;;  %6962 = vmax.xlane.f32.xlu1 %v6961_v2  ;;  %v6955_v14 = vsel %vm6954_vm3, %v11699_v24, -inf }
 0x3cc   : > { %6956 = vmax.xlane.f32.xlu0 %v6955_v14  ;;  %v6964_v4 = vsel %vm6954_vm3, %v11702_v13, -inf }
 0x3cd   : > { %v6958_v16 = vsel %vm6954_vm3, %v11707_v48, -inf }
 0x3cf   : > { %6965 = vmax.xlane.f32.xlu1 %v6964_v4  ;;  %v9414_v33 = vpop.f32.mrb[68].mxu1 }
 0x3d0   : > { %v11716_v38 = vadd.f32 %v9414_v33, %v11693_v55  ;;  %v6715_v58 = vpop.f32.mrb[69].mxu1  ;;  %6959 = vmax.xlane.f32.xlu0 %v6958_v16 }
 0x3d1   : > { %v9415_v25 = vpop.f32.mrb[70].mxu1  ;;  %v11724_v40 = vadd.f32 %v11693_v55, %v6715_v58 }
 0x3d2   : > { %v11719_v46 = vadd.f32 %v9415_v25, %v11693_v55  ;;  %v6718_v39 = vpop.f32.mrb[71].mxu1  ;;  %v6973_v27 = vsel %vm6954_vm3, %v11716_v38, -inf }
 0x3d3   : > { %v11727_v47 = vadd.f32 %v11693_v55, %v6718_v39  ;;  %v6967_v28 = vsel %vm6954_vm3, %v11724_v40, -inf }
 0x3d4   : > { %6974 = vmax.xlane.f32.xlu0 %v6973_v27  ;;  %v6976_v59 = vsel %vm6954_vm3, %v11719_v46, -inf }
 0x3d5   : > { %6977 = vmax.xlane.f32.xlu1 %v6976_v59  ;;  %v6970_v5 = vsel %vm6954_vm3, %v11727_v47, -inf }
 0x3d7   : > { %v9418_v45 = vpop.f32.mrb[72].mxu1 }
 0x3d8   : > { %v11734_v63 = vadd.f32 %v9418_v45, %v11693_v55  ;;  %v6731_v29 = vpop.f32.mrb[73].mxu1  ;;  %6968 = vmax.xlane.f32.xlu0 %v6967_v28 }
 0x3d9   : > { %v9419_v60 = vpop.f32.mrb[74].mxu1  ;;  %6971 = vmax.xlane.f32.xlu1 %v6970_v5  ;;  %v11744_v6 = vadd.f32 %v11693_v55, %v6731_v29 }
 0x3da   : > { %v11739_v9 = vadd.f32 %v9419_v60, %v11693_v55  ;;  %v6734_v17 = vpop.f32.mrb[75].mxu1  ;;  %v6985_v41 = vsel %vm6954_vm3, %v11734_v63, -inf }
 0x3db   : > { %v11747_v42 = vadd.f32 %v11693_v55, %v6734_v17  ;;  %v6979_v7 = vsel %vm6954_vm3, %v11744_v6, -inf }
 0x3dc   : > { %6986 = vmax.xlane.f32.xlu0 %v6985_v41  ;;  %v6988_v18 = vsel %vm6954_vm3, %v11739_v9, -inf }
 0x3dd   : > { %6989 = vmax.xlane.f32.xlu1 %v6988_v18  ;;  %v6982_v30 = vsel %vm6954_vm3, %v11747_v42, -inf }
 0x3df   : > { %v9422_v62 = vpop.f32.mrb[76].mxu1 }
 0x3e0   : > { %v11754_v43 = vadd.f32 %v9422_v62, %v11693_v55  ;;  %v6747_v11 = vpop.f32.mrb[77].mxu1  ;;  %6980 = vmax.xlane.f32.xlu0 %v6979_v7 }
 0x3e1   : > { %v9423_v19 = vpop.f32.mrb[78].mxu1  ;;  %6983 = vmax.xlane.f32.xlu1 %v6982_v30  ;;  %v11764_v52 = vadd.f32 %v11693_v55, %v6747_v11 }
 0x3e2   : > { %v11759_v31 = vadd.f32 %v9423_v19, %v11693_v55  ;;  %v6750_v15 = vpop.f32.mrb[79].mxu1  ;;  %v6997_v20 = vsel %vm6954_vm3, %v11754_v43, -inf }
 0x3e3   : > { %v11767_v32 = vadd.f32 %v11693_v55, %v6750_v15  ;;  %v6991_v53 = vsel %vm6954_vm3, %v11764_v52, -inf }
 0x3e4   : > { %6998 = vmax.xlane.f32.xlu0 %v6997_v20  ;;  %v7000_v8 = vsel %vm6954_vm3, %v11759_v31, -inf }
 0x3e5   : > { %7001 = vmax.xlane.f32.xlu1 %v7000_v8  ;;  %v6994_v44 = vsel %vm6954_vm3, %v11767_v32, -inf }
 0x3e7   : > { %v9426_v26 = vpop.f32.mrb[80].mxu1 }
 0x3e8   : > { %v11774_v10 = vadd.f32 %v9426_v26, %v11693_v55  ;;  %v6763_v54 = vpop.f32.mrb[81].mxu1  ;;  %6992 = vmax.xlane.f32.xlu0 %v6991_v53 }
 0x3e9   : > { %v9427_v61 = vpop.f32.mrb[82].mxu1  ;;  %6995 = vmax.xlane.f32.xlu1 %v6994_v44  ;;  %v11784_v0 = vadd.f32 %v11693_v55, %v6763_v54 }
 0x3ea   : > { %v11779_v3 = vadd.f32 %v9427_v61, %v11693_v55  ;;  %v6766_v56 = vpop.f32.mrb[83].mxu1  ;;  %v7009_v21 = vsel %vm6954_vm3, %v11774_v10, -inf }
 0x3eb   : > { %v11787_v34 = vadd.f32 %v11693_v55, %v6766_v56  ;;  %v7003_v51 = vsel %vm6954_vm3, %v11784_v0, -inf }
 0x3ec   : > { %7010 = vmax.xlane.f32.xlu0 %v7009_v21  ;;  %v7012_v22 = vsel %vm6954_vm3, %v11779_v3, -inf }
 0x3ed   : > { %7013 = vmax.xlane.f32.xlu1 %v7012_v22  ;;  %v7006_v36 = vsel %vm6954_vm3, %v11787_v34, -inf }
 0x3ef   : > { %v9430_v35 = vpop.f32.mrb[84].mxu1 }
 0x3f0   : > { %v11794_v1 = vadd.f32 %v9430_v35, %v11693_v55  ;;  %v6779_v57 = vpop.f32.mrb[85].mxu1  ;;  %7004 = vmax.xlane.f32.xlu0 %v7003_v51 }
 0x3f1   : > { %v9431_v23 = vpop.f32.mrb[86].mxu1  ;;  %7007 = vmax.xlane.f32.xlu1 %v7006_v36  ;;  %v11804_v2 = vadd.f32 %v11693_v55, %v6779_v57 }
 0x3f2   : > { %v11799_v12 = vadd.f32 %v9431_v23, %v11693_v55  ;;  %v6782_v49 = vpop.f32.mrb[87].mxu1  ;;  %v7021_v50 = vsel %vm6954_vm3, %v11794_v1, -inf }
 0x3f3   : > { %v11807_v14 = vadd.f32 %v11693_v55, %v6782_v49  ;;  %v7015_v16 = vsel %vm6954_vm3, %v11804_v2, -inf }
 0x3f4   : > { %7022 = vmax.xlane.f32.xlu0 %v7021_v50  ;;  %v7024_v4 = vsel %vm6954_vm3, %v11799_v12, -inf }
 0x3f5   : > { %7025 = vmax.xlane.f32.xlu1 %v7024_v4  ;;  %v7018_v39 = vsel %vm6954_vm3, %v11807_v14, -inf }
 0x3f7   : > { %v9434_v33 = vpop.f32.mrb[88].mxu1 }
 0x3f8   : > { %v11814_v58 = vadd.f32 %v9434_v33, %v11693_v55  ;;  %v6795_v25 = vpop.f32.mrb[89].mxu1  ;;  %7016 = vmax.xlane.f32.xlu0 %v7015_v16 }
 0x3f9   : > { %v9435_v27 = vpop.f32.mrb[90].mxu1  ;;  %7019 = vmax.xlane.f32.xlu1 %v7018_v39  ;;  %v11824_v29 = vadd.f32 %v11693_v55, %v6795_v25 }
 0x3fa   : > { %v11819_v59 = vadd.f32 %v9435_v27, %v11693_v55  ;;  %v6798_v45 = vpop.f32.mrb[91].mxu1  ;;  %v7033_v28 = vsel %vm6954_vm3, %v11814_v58, -inf }
 0x3fb   : > { %v11827_v5 = vadd.f32 %v11693_v55, %v6798_v45  ;;  %v7027_v41 = vsel %vm6954_vm3, %v11824_v29, -inf }
 0x3fc   : > { %7034 = vmax.xlane.f32.xlu0 %v7033_v28  ;;  %v7036_v60 = vsel %vm6954_vm3, %v11819_v59, -inf }
 0x3fd   : > { %7037 = vmax.xlane.f32.xlu1 %v7036_v60  ;;  %v7030_v7 = vsel %vm6954_vm3, %v11827_v5, -inf }
 0x3ff   : > { %v9438_v17 = vpop.f32.mrb[92].mxu1 }
 0x400   : > { %v11834_v18 = vadd.f32 %v9438_v17, %v11693_v55  ;;  %v6811_v62 = vpop.f32.mrb[93].mxu1  ;;  %7028 = vmax.xlane.f32.xlu0 %v7027_v41 }
 0x401   : > { %v9439_v11 = vpop.f32.mrb[94].mxu1  ;;  %7031 = vmax.xlane.f32.xlu1 %v7030_v7  ;;  %v11844_v20 = vadd.f32 %v11693_v55, %v6811_v62 }
 0x402   : > { %v11839_v30 = vadd.f32 %v9439_v11, %v11693_v55  ;;  %v6814_v19 = vpop.f32.mrb[95].mxu1  ;;  %v7045_v15 = vsel %vm6954_vm3, %v11834_v18, -inf }
 0x403   : > { %v11847_v8 = vadd.f32 %v11693_v55, %v6814_v19  ;;  %v7039_v54 = vsel %vm6954_vm3, %v11844_v20, -inf }
 0x404   : > { %7046 = vmax.xlane.f32.xlu0 %v7045_v15  ;;  %v7048_v26 = vsel %vm6954_vm3, %v11839_v30, -inf }
 0x405   : > { %7049 = vmax.xlane.f32.xlu1 %v7048_v26  ;;  %v7042_v56 = vsel %vm6954_vm3, %v11847_v8, -inf }
 0x407   : > { %v9442_v53 = vpop.f32.mrb[96].mxu1 }
 0x408   : > { %v11854_v44 = vadd.f32 %v9442_v53, %v11693_v55  ;;  %v6827_v61 = vpop.f32.mrb[97].mxu1  ;;  %7040 = vmax.xlane.f32.xlu0 %v7039_v54 }
 0x409   : > { %v9443_v21 = vpop.f32.mrb[98].mxu1  ;;  %7043 = vmax.xlane.f32.xlu1 %v7042_v56  ;;  %v11864_v57 = vadd.f32 %v11693_v55, %v6827_v61 }
 0x40a   : > { %v11859_v22 = vadd.f32 %v9443_v21, %v11693_v55  ;;  %v6830_v35 = vpop.f32.mrb[99].mxu1  ;;  %v7057_v51 = vsel %vm6954_vm3, %v11854_v44, -inf }
 0x40b   : > { %v11867_v36 = vadd.f32 %v11693_v55, %v6830_v35  ;;  %v7051_v50 = vsel %vm6954_vm3, %v11864_v57, -inf }
 0x40c   : > { %7058 = vmax.xlane.f32.xlu0 %v7057_v51  ;;  %v7060_v23 = vsel %vm6954_vm3, %v11859_v22, -inf }
 0x40d   : > { %7061 = vmax.xlane.f32.xlu1 %v7060_v23  ;;  %v7054_v16 = vsel %vm6954_vm3, %v11867_v36, -inf }
 0x40f   : > { %v9446_v49 = vpop.f32.mrb[100].mxu1 }
 0x410   : > { %v11874_v4 = vadd.f32 %v9446_v49, %v11693_v55  ;;  %v6843_v33 = vpop.f32.mrb[101].mxu1  ;;  %7052 = vmax.xlane.f32.xlu0 %v7051_v50 }
 0x411   : > { %v9447_v25 = vpop.f32.mrb[102].mxu1  ;;  %7055 = vmax.xlane.f32.xlu1 %v7054_v16  ;;  %v11884_v28 = vadd.f32 %v11693_v55, %v6843_v33 }
 0x412   : > { %v11879_v39 = vadd.f32 %v9447_v25, %v11693_v55  ;;  %v6846_v27 = vpop.f32.mrb[103].mxu1  ;;  %v7069_v45 = vsel %vm6954_vm3, %v11874_v4, -inf }
 0x413   : > { %v11887_v60 = vadd.f32 %v11693_v55, %v6846_v27  ;;  %v7063_v62 = vsel %vm6954_vm3, %v11884_v28, -inf }
 0x414   : > { %7070 = vmax.xlane.f32.xlu0 %v7069_v45  ;;  %v7072_v17 = vsel %vm6954_vm3, %v11879_v39, -inf }
 0x415   : > { %7073 = vmax.xlane.f32.xlu1 %v7072_v17  ;;  %v7066_v19 = vsel %vm6954_vm3, %v11887_v60, -inf }
 0x417   : > { %v9450_v41 = vpop.f32.mrb[104].mxu1 }
 0x418   : > { %v11894_v7 = vadd.f32 %v9450_v41, %v11693_v55  ;;  %v6859_v11 = vpop.f32.mrb[105].mxu1  ;;  %7064 = vmax.xlane.f32.xlu0 %v7063_v62 }
 0x419   : > { %v9451_v15 = vpop.f32.mrb[106].mxu1  ;;  %7067 = vmax.xlane.f32.xlu1 %v7066_v19  ;;  %v11904_v61 = vadd.f32 %v11693_v55, %v6859_v11 }
 0x41a   : > { %v11899_v26 = vadd.f32 %v9451_v15, %v11693_v55  ;;  %v6862_v53 = vpop.f32.mrb[107].mxu1  ;;  %v7081_v54 = vsel %vm6954_vm3, %v11894_v7, -inf }
 0x41b   : > { %v11907_v56 = vadd.f32 %v11693_v55, %v6862_v53  ;;  %v7075_v51 = vsel %vm6954_vm3, %v11904_v61, -inf }
 0x41c   : > { %7082 = vmax.xlane.f32.xlu0 %v7081_v54  ;;  %v7084_v21 = vsel %vm6954_vm3, %v11899_v26, -inf }
 0x41d   : > { %7085 = vmax.xlane.f32.xlu1 %v7084_v21  ;;  %v7078_v50 = vsel %vm6954_vm3, %v11907_v56, -inf }
 0x41f   : > { %v9454_v35 = vpop.f32.mrb[108].mxu1 }
 0x420   : > { %v11914_v23 = vadd.f32 %v9454_v35, %v11693_v55  ;;  %v6875_v49 = vpop.f32.mrb[109].mxu1  ;;  %7076 = vmax.xlane.f32.xlu0 %v7075_v51 }
 0x421   : > { %v9455_v33 = vpop.f32.mrb[110].mxu1  ;;  %7079 = vmax.xlane.f32.xlu1 %v7078_v50  ;;  %v11924_v45 = vadd.f32 %v11693_v55, %v6875_v49 }
 0x422   : > { %v11919_v16 = vadd.f32 %v9455_v33, %v11693_v55  ;;  %v6878_v25 = vpop.f32.mrb[111].mxu1  ;;  %v7093_v27 = vsel %vm6954_vm3, %v11914_v23, -inf }
 0x423   : > { %v11927_v17 = vadd.f32 %v11693_v55, %v6878_v25  ;;  %v7087_v11 = vsel %vm6954_vm3, %v11924_v45, -inf }
 0x424   : > { %7094 = vmax.xlane.f32.xlu0 %v7093_v27  ;;  %v7096_v41 = vsel %vm6954_vm3, %v11919_v16, -inf }
 0x425   : > { %7097 = vmax.xlane.f32.xlu1 %v7096_v41  ;;  %v7090_v53 = vsel %vm6954_vm3, %v11927_v17, -inf }
 0x427   : > { %v9458_v62 = vpop.f32.mrb[112].mxu1 }
 0x428   : > { %v11934_v19 = vadd.f32 %v9458_v62, %v11693_v55  ;;  %v6891_v15 = vpop.f32.mrb[113].mxu1  ;;  %7088 = vmax.xlane.f32.xlu0 %v7087_v11 }
 0x429   : > { %v9459_v54 = vpop.f32.mrb[114].mxu1  ;;  %7091 = vmax.xlane.f32.xlu1 %v7090_v53  ;;  %v11944_v49 = vadd.f32 %v11693_v55, %v6891_v15 }
 0x42a   : > { %v11939_v21 = vadd.f32 %v9459_v54, %v11693_v55  ;;  %v6894_v35 = vpop.f32.mrb[115].mxu1  ;;  %v7105_v51 = vsel %vm6954_vm3, %v11934_v19, -inf }
 0x42b   : > { %12601 = vst [vmem:[#allocation2_spill] sm:$0xff] %v11944_v49  ;;  %v11947_v50 = vadd.f32 %v11693_v55, %v6894_v35  ;;  %v7099_v27 = vsel %vm6954_vm3, %v11944_v49, -inf }
 0x42c   : > { %7106 = vmax.xlane.f32.xlu0 %v7105_v51  ;;  %v7108_v33 = vsel %vm6954_vm3, %v11939_v21, -inf }
 0x42d   : > { %12602 = vst [vmem:[#allocation3_spill] sm:$0xff] %v11947_v50  ;;  %7109 = vmax.xlane.f32.xlu1 %v7108_v33  ;;  %v7102_v11 = vsel %vm6954_vm3, %v11947_v50, -inf }
 0x42f   : > { %v9462_v25 = vpop.f32.mrb[116].mxu1 }
 0x430   : > { %v11954_v41 = vadd.f32 %v9462_v25, %v11693_v55  ;;  %v6907_v62 = vpop.f32.mrb[117].mxu1  ;;  %7100 = vmax.xlane.f32.xlu0 %v7099_v27 }
 0x431   : > { %v9463_v15 = vpop.f32.mrb[118].mxu1  ;;  %7103 = vmax.xlane.f32.xlu1 %v7102_v11  ;;  %v11964_v51 = vadd.f32 %v11693_v55, %v6907_v62 }
 0x432   : > { %12603 = vst [vmem:[#allocation4_spill] sm:$0xff] %v11954_v41  ;;  %v11959_v53 = vadd.f32 %v9463_v15, %v11693_v55  ;;  %v6910_v54 = vpop.f32.mrb[119].mxu1  ;;  %v7117_v35 = vsel %vm6954_vm3, %v11954_v41, -inf }
 0x433   : > { %12605 = vst [vmem:[#allocation6_spill] sm:$0xff] %v11964_v51  ;;  %v11967_v33 = vadd.f32 %v11693_v55, %v6910_v54  ;;  %v7111_v11 = vsel %vm6954_vm3, %v11964_v51, -inf }
 0x434   : > { %12604 = vst [vmem:[#allocation5_spill] sm:$0xff] %v11959_v53  ;;  %7118 = vmax.xlane.f32.xlu0 %v7117_v35  ;;  %v7120_v25 = vsel %vm6954_vm3, %v11959_v53, -inf }
 0x435   : > { %12606 = vst [vmem:[#allocation7_spill] sm:$0xff] %v11967_v33  ;;  %7121 = vmax.xlane.f32.xlu1 %v7120_v25  ;;  %v7114_v62 = vsel %vm6954_vm3, %v11967_v33, -inf }
 0x437   : > { %v9466_v27 = vpop.f32.mrb[120].mxu1 }
 0x438   : > { %v11974_v15 = vadd.f32 %v9466_v27, %v11693_v55  ;;  %v6923_v50 = vpop.f32.mrb[121].mxu1  ;;  %7112 = vmax.xlane.f32.xlu0 %v7111_v11 }
 0x439   : > { %v9467_v41 = vpop.f32.mrb[122].mxu1  ;;  %7115 = vmax.xlane.f32.xlu1 %v7114_v62  ;;  %v11984_v53 = vadd.f32 %v11693_v55, %v6923_v50 }
 0x43a   : > { %12607 = vst [vmem:[#allocation8_spill] sm:$0xff] %v11974_v15  ;;  %v11979_v54 = vadd.f32 %v9467_v41, %v11693_v55  ;;  %v6926_v35 = vpop.f32.mrb[123].mxu1  ;;  %v7129_v25 = vsel %vm6954_vm3, %v11974_v15, -inf }
 0x43b   : > { %12609 = vst [vmem:[#allocation10_spill] sm:$0xff] %v11984_v53  ;;  %v11987_v27 = vadd.f32 %v11693_v55, %v6926_v35  ;;  %v7123_v41 = vsel %vm6954_vm3, %v11984_v53, -inf }
 0x43c   : > { %12608 = vst [vmem:[#allocation9_spill] sm:$0xff] %v11979_v54  ;;  %7130 = vmax.xlane.f32.xlu0 %v7129_v25  ;;  %v7132_v11 = vsel %vm6954_vm3, %v11979_v54, -inf }
 0x43d   : > { %12610 = vst [vmem:[#allocation11_spill] sm:$0xff] %v11987_v27  ;;  %7133 = vmax.xlane.f32.xlu1 %v7132_v11  ;;  %v7126_v50 = vsel %vm6954_vm3, %v11987_v27, -inf }
 0x43f   : > { %v9470_v33 = vpop.f32.mrb[124].mxu1 }
 0x440   : > { %v11994_v62 = vadd.f32 %v9470_v33, %v11693_v55  ;;  %v6939_v51 = vpop.f32.mrb[125].mxu1  ;;  %7124 = vmax.xlane.f32.xlu0 %v7123_v41 }
 0x441   : > { %v9471_v15 = vpop.f32.mrb[126].mxu1  ;;  %7127 = vmax.xlane.f32.xlu1 %v7126_v50  ;;  %v12004_v54 = vadd.f32 %v11693_v55, %v6939_v51 }
 0x442   : > { %12611 = vst [vmem:[#allocation12_spill] sm:$0xff] %v11994_v62  ;;  %v11999_v35 = vadd.f32 %v9471_v15, %v11693_v55  ;;  %v6942_v25 = vpop.f32.mrb[127].mxu1  ;;  %v7141_v11 = vsel %vm6954_vm3, %v11994_v62, -inf }
 0x443   : > { %12613 = vst [vmem:[#allocation14_spill] sm:$0xff] %v12004_v54  ;;  %v12007_v33 = vadd.f32 %v11693_v55, %v6942_v25  ;;  %v7135_v50 = vsel %vm6954_vm3, %v12004_v54, -inf }
 0x444   : > { %12612 = vst [vmem:[#allocation13_spill] sm:$0xff] %v11999_v35  ;;  %7142 = vmax.xlane.f32.xlu0 %v7141_v11  ;;  %v7144_v41 = vsel %vm6954_vm3, %v11999_v35, -inf }
 0x445   : > { %12614 = vst [vmem:[#allocation15_spill] sm:$0xff] %v12007_v33  ;;  %7145 = vmax.xlane.f32.xlu1 %v7144_v41  ;;  %v7138_v15 = vsel %vm6954_vm3, %v12007_v33, -inf }
 0x448   : > { %7136 = vmax.xlane.f32.xlu0 %v7135_v50 }
 0x449   : > { %7139 = vmax.xlane.f32.xlu1 %v7138_v15 }
 0x458   : > { %v6963_v62 = vpop.xlane.xlu1 %6962 }
 0x459   : > { %v7149_v51 = vsub.f32 %v11696_v37, %v6963_v62  ;;  %v6957_v27 = vpop.xlane.xlu0 %6956 }
 0x45a   : > { %v7147_v55 = vsub.f32 %v11699_v24, %v6957_v27 }
 0x45b   : > { %v7215_v25 = vmul.f32 1.442695, %v7149_v51 }
 0x45c   : > { %v7211_v11 = vmul.f32 1.442695, %v7147_v55  ;;  %v6966_v53 = vpop.xlane.xlu1 %6965 }
 0x45d   : > { %10372 = vpow2.f32 %v7215_v25  ;;  %v7150_v41 = vsub.f32 %v11702_v13, %v6966_v53  ;;  %v6960_v35 = vpop.xlane.xlu0 %6959 }
 0x45e   : > { %v7148_v54 = vsub.f32 %v11707_v48, %v6960_v35  ;;  %10374 = vpow2.f32 %v7211_v11 }
 0x45f   : > { %v7217_v50 = vmul.f32 1.442695, %v7150_v41 }
 0x460   : > { %v7213_v49 = vmul.f32 1.442695, %v7148_v54 }
 0x461   : > { %10376 = vpow2.f32 %v7217_v50  ;;  %v6975_v15 = vpop.xlane.xlu0 %6974 }
 0x462   : > { %v7153_v33 = vsub.f32 %v11716_v38, %v6975_v15  ;;  %v6978_v37 = vpop.xlane.xlu1 %6977  ;;  %10378 = vpow2.f32 %v7213_v49 }
 0x463   : > { %v7154_v24 = vsub.f32 %v11719_v46, %v6978_v37 }
 0x464   : > { %v7223_v27 = vmul.f32 1.442695, %v7153_v33 }
 0x465   : > { %v7225_v62 = vmul.f32 1.442695, %v7154_v24  ;;  %v6969_v51 = vpop.xlane.xlu0 %6968 }
 0x466   : > { %10380 = vpow2.f32 %v7223_v27  ;;  %v7151_v13 = vsub.f32 %v11724_v40, %v6969_v51  ;;  %v6972_v53 = vpop.xlane.xlu1 %6971 }
 0x467   : > { %v12022_v55 = vpop.eup %10372  ;;  %10382 = vpow2.f32 %v7225_v62  ;;  %v7152_v48 = vsub.f32 %v11727_v47, %v6972_v53 }
 0x468   : > { %v7219_v54 = vmul.f32 1.442695, %v7151_v13  ;;  %v7345_v38 = vsel %vm6954_vm3, %v12022_v55, 0.0  ;;  %v12027_v35 = vpop.eup %10374 }
 0x469   : > { %v7221_v49 = vmul.f32 1.442695, %v7152_v48  ;;  %7346 = vadd.xlane.f32.xlu0 %v7345_v38  ;;  %v6987_v46 = vpop.xlane.xlu0 %6986  ;;  %v7339_v50 = vsel %vm6954_vm3, %v12027_v35, 0.0 }
 0x46a   : > { %10384 = vpow2.f32 %v7219_v54  ;;  %v7157_v33 = vsub.f32 %v11734_v63, %v6987_v46  ;;  %v6990_v25 = vpop.xlane.xlu1 %6989 }
 0x46b   : > { %v12030_v40 = vpop.eup %10376  ;;  %10386 = vpow2.f32 %v7221_v49  ;;  %v7158_v11 = vsub.f32 %v11739_v9, %v6990_v25 }
 0x46c   : > { %v7231_v41 = vmul.f32 1.442695, %v7157_v33  ;;  %v7348_v47 = vsel %vm6954_vm3, %v12030_v40, 0.0  ;;  %v12037_v15 = vpop.eup %10378 }
 0x46d   : > { %v7233_v37 = vmul.f32 1.442695, %v7158_v11  ;;  %7349 = vadd.xlane.f32.xlu1 %v7348_v47  ;;  %7340 = vadd.xlane.f32.xlu0 %v7339_v50  ;;  %v6981_v24 = vpop.xlane.xlu0 %6980  ;;  %v7342_v13 = vsel %vm6954_vm3, %v12037_v15, 0.0 }
 0x46e   : > { %10388 = vpow2.f32 %v7231_v41  ;;  %v7155_v63 = vsub.f32 %v11744_v6, %v6981_v24  ;;  %v6984_v27 = vpop.xlane.xlu1 %6983 }
 0x46f   : > { %10390 = vpow2.f32 %v7233_v37  ;;  %v7156_v9 = vsub.f32 %v11747_v42, %v6984_v27 }
 0x470   : > { %v12041_v62 = vpop.eup %10380  ;;  %v7227_v51 = vmul.f32 1.442695, %v7155_v63 }
 0x471   : > { %v12045_v53 = vpop.eup %10382  ;;  %v7229_v48 = vmul.f32 1.442695, %v7156_v9  ;;  %7343 = vadd.xlane.f32.xlu1 %v7342_v13  ;;  %v6999_v54 = vpop.xlane.xlu0 %6998  ;;  %v7357_v38 = vsel %vm6954_vm3, %v12041_v62, 0.0 }
 0x472   : > { %10392 = vpow2.f32 %v7227_v51  ;;  %v7161_v6 = vsub.f32 %v11754_v43, %v6999_v54  ;;  %v7002_v49 = vpop.xlane.xlu1 %7001  ;;  %7358 = vadd.xlane.f32.xlu0 %v7357_v38  ;;  %v7360_v25 = vsel %vm6954_vm3, %v12045_v53, 0.0 }
 0x473   : > { %10394 = vpow2.f32 %v7229_v48  ;;  %v7162_v42 = vsub.f32 %v11759_v31, %v7002_v49 }
 0x474   : > { %v12051_v46 = vpop.eup %10384  ;;  %v7239_v33 = vmul.f32 1.442695, %v7161_v6 }
 0x475   : > { %v12055_v11 = vpop.eup %10386  ;;  %v7241_v41 = vmul.f32 1.442695, %v7162_v42  ;;  %7361 = vadd.xlane.f32.xlu1 %v7360_v25  ;;  %v6993_v47 = vpop.xlane.xlu0 %6992  ;;  %v7351_v50 = vsel %vm6954_vm3, %v12051_v46, 0.0 }
 0x476   : > { %10396 = vpow2.f32 %v7239_v33  ;;  %v7159_v43 = vsub.f32 %v11764_v52, %v6993_v47  ;;  %v6996_v37 = vpop.xlane.xlu1 %6995  ;;  %7352 = vadd.xlane.f32.xlu0 %v7351_v50  ;;  %v7354_v27 = vsel %vm6954_vm3, %v12055_v11, 0.0 }
 0x477   : > { %10398 = vpow2.f32 %v7241_v41  ;;  %v7160_v31 = vsub.f32 %v11767_v32, %v6996_v37 }
 0x478   : > { %v12061_v24 = vpop.eup %10388  ;;  %v7235_v63 = vmul.f32 1.442695, %v7159_v43 }
 0x479   : > { %v12065_v9 = vpop.eup %10390  ;;  %v7237_v51 = vmul.f32 1.442695, %v7160_v31  ;;  %7355 = vadd.xlane.f32.xlu1 %v7354_v27  ;;  %v7011_v13 = vpop.xlane.xlu0 %7010  ;;  %v7369_v48 = vsel %vm6954_vm3, %v12061_v24, 0.0 }
 0x47a   : > { %10400 = vpow2.f32 %v7235_v63  ;;  %v7165_v52 = vsub.f32 %v11774_v10, %v7011_v13  ;;  %v7014_v54 = vpop.xlane.xlu1 %7013  ;;  %7370 = vadd.xlane.f32.xlu0 %v7369_v48  ;;  %v7372_v49 = vsel %vm6954_vm3, %v12065_v9, 0.0 }
 0x47b   : > { %10402 = vpow2.f32 %v7237_v51  ;;  %v7166_v32 = vsub.f32 %v11779_v3, %v7014_v54 }
 0x47c   : > { %v12071_v38 = vpop.eup %10392  ;;  %v7247_v6 = vmul.f32 1.442695, %v7165_v52 }
 0x47d   : > { %v12075_v42 = vpop.eup %10394  ;;  %v7249_v33 = vmul.f32 1.442695, %v7166_v32  ;;  %7373 = vadd.xlane.f32.xlu1 %v7372_v49  ;;  %v7005_v25 = vpop.xlane.xlu0 %7004  ;;  %v7363_v41 = vsel %vm6954_vm3, %v12071_v38, 0.0 }
 0x47e   : > { %10404 = vpow2.f32 %v7247_v6  ;;  %v7163_v10 = vsub.f32 %v11784_v0, %v7005_v25  ;;  %v7008_v47 = vpop.xlane.xlu1 %7007  ;;  %7364 = vadd.xlane.f32.xlu0 %v7363_v41  ;;  %v7366_v37 = vsel %vm6954_vm3, %v12075_v42, 0.0 }
 0x47f   : > { %10406 = vpow2.f32 %v7249_v33  ;;  %v7164_v3 = vsub.f32 %v11787_v34, %v7008_v47 }
 0x480   : > { %v12081_v50 = vpop.eup %10396  ;;  %v7243_v43 = vmul.f32 1.442695, %v7163_v10 }
 0x481   : > { %v12085_v31 = vpop.eup %10398  ;;  %v7245_v63 = vmul.f32 1.442695, %v7164_v3  ;;  %7367 = vadd.xlane.f32.xlu1 %v7366_v37  ;;  %v7023_v27 = vpop.xlane.xlu0 %7022  ;;  %v7381_v51 = vsel %vm6954_vm3, %v12081_v50, 0.0 }
 0x482   : > { %10408 = vpow2.f32 %v7243_v43  ;;  %v7169_v0 = vsub.f32 %v11794_v1, %v7023_v27  ;;  %v7026_v13 = vpop.xlane.xlu1 %7025  ;;  %7382 = vadd.xlane.f32.xlu0 %v7381_v51  ;;  %v7384_v54 = vsel %vm6954_vm3, %v12085_v31, 0.0 }
 0x483   : > { %10410 = vpow2.f32 %v7245_v63  ;;  %v7170_v34 = vsub.f32 %v11799_v12, %v7026_v13 }
 0x484   : > { %v12091_v48 = vpop.eup %10400  ;;  %v7255_v52 = vmul.f32 1.442695, %v7169_v0 }
 0x485   : > { %v12095_v32 = vpop.eup %10402  ;;  %v7257_v6 = vmul.f32 1.442695, %v7170_v34  ;;  %7385 = vadd.xlane.f32.xlu1 %v7384_v54  ;;  %v7017_v49 = vpop.xlane.xlu0 %7016  ;;  %v7375_v33 = vsel %vm6954_vm3, %v12091_v48, 0.0 }
 0x486   : > { %10412 = vpow2.f32 %v7255_v52  ;;  %v7167_v1 = vsub.f32 %v11804_v2, %v7017_v49  ;;  %v7020_v25 = vpop.xlane.xlu1 %7019  ;;  %7376 = vadd.xlane.f32.xlu0 %v7375_v33  ;;  %v7378_v47 = vsel %vm6954_vm3, %v12095_v32, 0.0 }
 0x487   : > { %10414 = vpow2.f32 %v7257_v6  ;;  %v7168_v12 = vsub.f32 %v11807_v14, %v7020_v25 }
 0x488   : > { %v12101_v41 = vpop.eup %10404  ;;  %v7251_v10 = vmul.f32 1.442695, %v7167_v1 }
 0x489   : > { %v12105_v3 = vpop.eup %10406  ;;  %v7253_v43 = vmul.f32 1.442695, %v7168_v12  ;;  %7379 = vadd.xlane.f32.xlu1 %v7378_v47  ;;  %v7035_v37 = vpop.xlane.xlu0 %7034  ;;  %v7393_v63 = vsel %vm6954_vm3, %v12101_v41, 0.0 }
 0x48a   : > { %10416 = vpow2.f32 %v7251_v10  ;;  %v7173_v2 = vsub.f32 %v11814_v58, %v7035_v37  ;;  %v7038_v27 = vpop.xlane.xlu1 %7037  ;;  %7394 = vadd.xlane.f32.xlu0 %v7393_v63  ;;  %v7396_v13 = vsel %vm6954_vm3, %v12105_v3, 0.0 }
 0x48b   : > { %10418 = vpow2.f32 %v7253_v43  ;;  %v7174_v14 = vsub.f32 %v11819_v59, %v7038_v27 }
 0x48c   : > { %v12111_v51 = vpop.eup %10408  ;;  %v7263_v0 = vmul.f32 1.442695, %v7173_v2 }
 0x48d   : > { %v12115_v34 = vpop.eup %10410  ;;  %v7265_v52 = vmul.f32 1.442695, %v7174_v14  ;;  %7397 = vadd.xlane.f32.xlu1 %v7396_v13  ;;  %v7029_v54 = vpop.xlane.xlu0 %7028  ;;  %v7387_v6 = vsel %vm6954_vm3, %v12111_v51, 0.0 }
 0x48e   : > { %10420 = vpow2.f32 %v7263_v0  ;;  %v7171_v58 = vsub.f32 %v11824_v29, %v7029_v54  ;;  %v7032_v49 = vpop.xlane.xlu1 %7031  ;;  %7388 = vadd.xlane.f32.xlu0 %v7387_v6  ;;  %v7390_v25 = vsel %vm6954_vm3, %v12115_v34, 0.0 }
 0x48f   : > { %10422 = vpow2.f32 %v7265_v52  ;;  %v7172_v59 = vsub.f32 %v11827_v5, %v7032_v49 }
 0x490   : > { %v12121_v33 = vpop.eup %10412  ;;  %v7259_v1 = vmul.f32 1.442695, %v7171_v58 }
 0x491   : > { %v12125_v12 = vpop.eup %10414  ;;  %v7261_v10 = vmul.f32 1.442695, %v7172_v59  ;;  %7391 = vadd.xlane.f32.xlu1 %v7390_v25  ;;  %v7047_v47 = vpop.xlane.xlu0 %7046  ;;  %v7405_v43 = vsel %vm6954_vm3, %v12121_v33, 0.0 }
 0x492   : > { %10424 = vpow2.f32 %v7259_v1  ;;  %v7177_v29 = vsub.f32 %v11834_v18, %v7047_v47  ;;  %v7050_v37 = vpop.xlane.xlu1 %7049  ;;  %7406 = vadd.xlane.f32.xlu0 %v7405_v43  ;;  %v7408_v27 = vsel %vm6954_vm3, %v12125_v12, 0.0 }
 0x493   : > { %10426 = vpow2.f32 %v7261_v10  ;;  %v7178_v5 = vsub.f32 %v11839_v30, %v7050_v37 }
 0x494   : > { %v12131_v63 = vpop.eup %10416  ;;  %v7271_v2 = vmul.f32 1.442695, %v7177_v29 }
 0x495   : > { %v12135_v14 = vpop.eup %10418  ;;  %v7273_v0 = vmul.f32 1.442695, %v7178_v5  ;;  %7409 = vadd.xlane.f32.xlu1 %v7408_v27  ;;  %v7041_v13 = vpop.xlane.xlu0 %7040  ;;  %v7399_v52 = vsel %vm6954_vm3, %v12131_v63, 0.0 }
 0x496   : > { %10428 = vpow2.f32 %v7271_v2  ;;  %v7175_v18 = vsub.f32 %v11844_v20, %v7041_v13  ;;  %v7044_v54 = vpop.xlane.xlu1 %7043  ;;  %7400 = vadd.xlane.f32.xlu0 %v7399_v52  ;;  %v7402_v49 = vsel %vm6954_vm3, %v12135_v14, 0.0 }
 0x497   : > { %10430 = vpow2.f32 %v7273_v0  ;;  %v7176_v30 = vsub.f32 %v11847_v8, %v7044_v54 }
 0x498   : > { %v12141_v6 = vpop.eup %10420  ;;  %v7267_v58 = vmul.f32 1.442695, %v7175_v18 }
 0x499   : > { %v12145_v59 = vpop.eup %10422  ;;  %v7269_v1 = vmul.f32 1.442695, %v7176_v30  ;;  %7403 = vadd.xlane.f32.xlu1 %v7402_v49  ;;  %v7059_v25 = vpop.xlane.xlu0 %7058  ;;  %v7417_v10 = vsel %vm6954_vm3, %v12141_v6, 0.0 }
 0x49a   : > { %10432 = vpow2.f32 %v7267_v58  ;;  %v7181_v20 = vsub.f32 %v11854_v44, %v7059_v25  ;;  %v7062_v47 = vpop.xlane.xlu1 %7061  ;;  %7418 = vadd.xlane.f32.xlu0 %v7417_v10  ;;  %v7420_v37 = vsel %vm6954_vm3, %v12145_v59, 0.0 }
 0x49b   : > { %10434 = vpow2.f32 %v7269_v1  ;;  %v7182_v8 = vsub.f32 %v11859_v22, %v7062_v47 }
 0x49c   : > { %v12151_v43 = vpop.eup %10424  ;;  %v7279_v29 = vmul.f32 1.442695, %v7181_v20 }
 0x49d   : > { %v12155_v5 = vpop.eup %10426  ;;  %v7281_v2 = vmul.f32 1.442695, %v7182_v8  ;;  %7421 = vadd.xlane.f32.xlu1 %v7420_v37  ;;  %v7053_v27 = vpop.xlane.xlu0 %7052  ;;  %v7411_v0 = vsel %vm6954_vm3, %v12151_v43, 0.0 }
 0x49e   : > { %10436 = vpow2.f32 %v7279_v29  ;;  %v7179_v44 = vsub.f32 %v11864_v57, %v7053_v27  ;;  %v7056_v13 = vpop.xlane.xlu1 %7055  ;;  %7412 = vadd.xlane.f32.xlu0 %v7411_v0  ;;  %v7414_v54 = vsel %vm6954_vm3, %v12155_v5, 0.0 }
 0x49f   : > { %10438 = vpow2.f32 %v7281_v2  ;;  %v7180_v22 = vsub.f32 %v11867_v36, %v7056_v13 }
 0x4a0   : > { %v12161_v52 = vpop.eup %10428  ;;  %v7275_v18 = vmul.f32 1.442695, %v7179_v44 }
 0x4a1   : > { %v12165_v30 = vpop.eup %10430  ;;  %v7277_v58 = vmul.f32 1.442695, %v7180_v22  ;;  %7415 = vadd.xlane.f32.xlu1 %v7414_v54  ;;  %v7071_v49 = vpop.xlane.xlu0 %7070  ;;  %v7429_v1 = vsel %vm6954_vm3, %v12161_v52, 0.0 }
 0x4a2   : > { %10440 = vpow2.f32 %v7275_v18  ;;  %v7185_v57 = vsub.f32 %v11874_v4, %v7071_v49  ;;  %v7074_v25 = vpop.xlane.xlu1 %7073  ;;  %7430 = vadd.xlane.f32.xlu0 %v7429_v1  ;;  %v7432_v47 = vsel %vm6954_vm3, %v12165_v30, 0.0 }
 0x4a3   : > { %10442 = vpow2.f32 %v7277_v58  ;;  %v7186_v36 = vsub.f32 %v11879_v39, %v7074_v25 }
 0x4a4   : > { %v12171_v10 = vpop.eup %10432  ;;  %v7287_v20 = vmul.f32 1.442695, %v7185_v57 }
 0x4a5   : > { %v12175_v8 = vpop.eup %10434  ;;  %v7289_v29 = vmul.f32 1.442695, %v7186_v36  ;;  %7433 = vadd.xlane.f32.xlu1 %v7432_v47  ;;  %v7065_v37 = vpop.xlane.xlu0 %7064  ;;  %v7423_v2 = vsel %vm6954_vm3, %v12171_v10, 0.0 }
 0x4a6   : > { %10444 = vpow2.f32 %v7287_v20  ;;  %v7183_v4 = vsub.f32 %v11884_v28, %v7065_v37  ;;  %v7068_v27 = vpop.xlane.xlu1 %7067  ;;  %7424 = vadd.xlane.f32.xlu0 %v7423_v2  ;;  %v7426_v13 = vsel %vm6954_vm3, %v12175_v8, 0.0 }
 0x4a7   : > { %10446 = vpow2.f32 %v7289_v29  ;;  %v7184_v39 = vsub.f32 %v11887_v60, %v7068_v27 }
 0x4a8   : > { %v12181_v0 = vpop.eup %10436  ;;  %v7283_v44 = vmul.f32 1.442695, %v7183_v4 }
 0x4a9   : > { %v12185_v22 = vpop.eup %10438  ;;  %v7285_v18 = vmul.f32 1.442695, %v7184_v39  ;;  %7427 = vadd.xlane.f32.xlu1 %v7426_v13  ;;  %v7083_v54 = vpop.xlane.xlu0 %7082  ;;  %v7441_v58 = vsel %vm6954_vm3, %v12181_v0, 0.0 }
 0x4aa   : > { %10448 = vpow2.f32 %v7283_v44  ;;  %v7189_v28 = vsub.f32 %v11894_v7, %v7083_v54  ;;  %v7086_v49 = vpop.xlane.xlu1 %7085  ;;  %7442 = vadd.xlane.f32.xlu0 %v7441_v58  ;;  %v7444_v25 = vsel %vm6954_vm3, %v12185_v22, 0.0 }
 0x4ab   : > { %10450 = vpow2.f32 %v7285_v18  ;;  %v7190_v60 = vsub.f32 %v11899_v26, %v7086_v49 }
 0x4ac   : > { %v12191_v1 = vpop.eup %10440  ;;  %v7295_v57 = vmul.f32 1.442695, %v7189_v28 }
 0x4ad   : > { %v12195_v36 = vpop.eup %10442  ;;  %v7297_v20 = vmul.f32 1.442695, %v7190_v60  ;;  %7445 = vadd.xlane.f32.xlu1 %v7444_v25  ;;  %v7077_v47 = vpop.xlane.xlu0 %7076  ;;  %v7435_v29 = vsel %vm6954_vm3, %v12191_v1, 0.0 }
 0x4ae   : > { %10452 = vpow2.f32 %v7295_v57  ;;  %v7187_v7 = vsub.f32 %v11904_v61, %v7077_v47  ;;  %v7080_v37 = vpop.xlane.xlu1 %7079  ;;  %7436 = vadd.xlane.f32.xlu0 %v7435_v29  ;;  %v7438_v27 = vsel %vm6954_vm3, %v12195_v36, 0.0 }
 0x4af   : > { %10454 = vpow2.f32 %v7297_v20  ;;  %v7188_v26 = vsub.f32 %v11907_v56, %v7080_v37 }
 0x4b0   : > { %v12201_v2 = vpop.eup %10444  ;;  %v7291_v4 = vmul.f32 1.442695, %v7187_v7 }
 0x4b1   : > { %v12205_v39 = vpop.eup %10446  ;;  %v7293_v44 = vmul.f32 1.442695, %v7188_v26  ;;  %7439 = vadd.xlane.f32.xlu1 %v7438_v27  ;;  %v7095_v13 = vpop.xlane.xlu0 %7094  ;;  %v7453_v18 = vsel %vm6954_vm3, %v12201_v2, 0.0 }
 0x4b2   : > { %10456 = vpow2.f32 %v7291_v4  ;;  %v7193_v61 = vsub.f32 %v11914_v23, %v7095_v13  ;;  %v7098_v54 = vpop.xlane.xlu1 %7097  ;;  %7454 = vadd.xlane.f32.xlu0 %v7453_v18  ;;  %v7456_v49 = vsel %vm6954_vm3, %v12205_v39, 0.0 }
 0x4b3   : > { %10458 = vpow2.f32 %v7293_v44  ;;  %v7194_v56 = vsub.f32 %v11919_v16, %v7098_v54 }
 0x4b4   : > { %v12211_v58 = vpop.eup %10448  ;;  %v7303_v28 = vmul.f32 1.442695, %v7193_v61 }
 0x4b5   : > { %v12215_v60 = vpop.eup %10450  ;;  %v7305_v57 = vmul.f32 1.442695, %v7194_v56  ;;  %7457 = vadd.xlane.f32.xlu1 %v7456_v49  ;;  %v7089_v25 = vpop.xlane.xlu0 %7088  ;;  %v7447_v20 = vsel %vm6954_vm3, %v12211_v58, 0.0 }
 0x4b6   : > { %10460 = vpow2.f32 %v7303_v28  ;;  %v7191_v23 = vsub.f32 %v11924_v45, %v7089_v25  ;;  %v7092_v47 = vpop.xlane.xlu1 %7091  ;;  %7448 = vadd.xlane.f32.xlu0 %v7447_v20  ;;  %v7450_v37 = vsel %vm6954_vm3, %v12215_v60, 0.0 }
 0x4b7   : > { %10462 = vpow2.f32 %v7305_v57  ;;  %v7192_v16 = vsub.f32 %v11927_v17, %v7092_v47 }
 0x4b8   : > { %v12221_v29 = vpop.eup %10452  ;;  %v7299_v7 = vmul.f32 1.442695, %v7191_v23 }
 0x4b9   : > { %v12225_v26 = vpop.eup %10454  ;;  %v7301_v4 = vmul.f32 1.442695, %v7192_v16  ;;  %7451 = vadd.xlane.f32.xlu1 %v7450_v37  ;;  %v7107_v27 = vpop.xlane.xlu0 %7106  ;;  %v7465_v44 = vsel %vm6954_vm3, %v12221_v29, 0.0 }
 0x4ba   : > { %10464 = vpow2.f32 %v7299_v7  ;;  %v7197_v45 = vsub.f32 %v11934_v19, %v7107_v27  ;;  %v7110_v13 = vpop.xlane.xlu1 %7109  ;;  %7466 = vadd.xlane.f32.xlu0 %v7465_v44  ;;  %v7468_v54 = vsel %vm6954_vm3, %v12225_v26, 0.0  ;;  %v12615_v19 = vld [vmem:[#allocation2_spill] sm:$0xff] }
 0x4bb   : > { %10466 = vpow2.f32 %v7301_v4  ;;  %v7198_v17 = vsub.f32 %v11939_v21, %v7110_v13  ;;  %v12616_v21 = vld [vmem:[#allocation3_spill] sm:$0xff] }
 0x4bc   : > { %v12231_v18 = vpop.eup %10456  ;;  %v7311_v61 = vmul.f32 1.442695, %v7197_v45  ;;  %v12618_v45 = vld [vmem:[#allocation4_spill] sm:$0xff] }
 0x4bd   : > { %v12235_v56 = vpop.eup %10458  ;;  %v7313_v28 = vmul.f32 1.442695, %v7198_v17  ;;  %7469 = vadd.xlane.f32.xlu1 %v7468_v54  ;;  %v7101_v49 = vpop.xlane.xlu0 %7100  ;;  %v7459_v57 = vsel %vm6954_vm3, %v12231_v18, 0.0 }
 0x4be   : > { %10468 = vpow2.f32 %v7311_v61  ;;  %v7195_v25 = vsub.f32 %v12615_v19, %v7101_v49  ;;  %v7104_v20 = vpop.xlane.xlu1 %7103  ;;  %7460 = vadd.xlane.f32.xlu0 %v7459_v57  ;;  %v7462_v7 = vsel %vm6954_vm3, %v12235_v56, 0.0  ;;  %v12619_v61 = vld [vmem:[#allocation5_spill] sm:$0xff] }
 0x4bf   : > { %10470 = vpow2.f32 %v7313_v28  ;;  %v7196_v23 = vsub.f32 %v12616_v21, %v7104_v20 }
 0x4c0   : > { %v12241_v47 = vpop.eup %10460  ;;  %v7307_v16 = vmul.f32 1.442695, %v7195_v25 }
 0x4c1   : > { %v12245_v37 = vpop.eup %10462  ;;  %v7309_v4 = vmul.f32 1.442695, %v7196_v23  ;;  %7463 = vadd.xlane.f32.xlu1 %v7462_v7  ;;  %v7119_v27 = vpop.xlane.xlu0 %7118  ;;  %v7477_v44 = vsel %vm6954_vm3, %v12241_v47, 0.0  ;;  %v12622_v23 = vld [vmem:[#allocation6_spill] sm:$0xff] }
 0x4c2   : > { %12617 = vst [vmem:[#allocation16_spill] sm:$0xff] %v12245_v37  ;;  %10472 = vpow2.f32 %v7307_v16  ;;  %v7201_v13 = vsub.f32 %v12618_v45, %v7119_v27  ;;  %v7122_v17 = vpop.xlane.xlu1 %7121  ;;  %7478 = vadd.xlane.f32.xlu0 %v7477_v44  ;;  %v7480_v57 = vsel %vm6954_vm3, %v12245_v37, 0.0 }
 0x4c3   : > { %10474 = vpow2.f32 %v7309_v4  ;;  %v7202_v54 = vsub.f32 %v12619_v61, %v7122_v17  ;;  %v12623_v4 = vld [vmem:[#allocation7_spill] sm:$0xff] }
 0x4c4   : > { %v12251_v28 = vpop.eup %10464  ;;  %v7319_v49 = vmul.f32 1.442695, %v7201_v13 }
 0x4c5   : > { %12620 = vst [vmem:[#allocation17_spill] sm:$0xff] %v12251_v28  ;;  %v12255_v19 = vpop.eup %10466  ;;  %v7321_v25 = vmul.f32 1.442695, %v7202_v54  ;;  %7481 = vadd.xlane.f32.xlu1 %v7480_v57  ;;  %v7113_v20 = vpop.xlane.xlu0 %7112  ;;  %v7471_v21 = vsel %vm6954_vm3, %v12251_v28, 0.0  ;;  %v12626_v57 = vld [vmem:[#allocation8_spill] sm:$0xff] }
 0x4c6   : > { %12621 = vst [vmem:[#allocation18_spill] sm:$0xff] %v12255_v19  ;;  %10476 = vpow2.f32 %v7319_v49  ;;  %v7199_v16 = vsub.f32 %v12622_v23, %v7113_v20  ;;  %v7116_v7 = vpop.xlane.xlu1 %7115  ;;  %7472 = vadd.xlane.f32.xlu0 %v7471_v21  ;;  %v7474_v13 = vsel %vm6954_vm3, %v12255_v19, 0.0  ;;  %v12627_v21 = vld [vmem:[#allocation9_spill] sm:$0xff] }
 0x4c7   : > { %10478 = vpow2.f32 %v7321_v25  ;;  %v7200_v27 = vsub.f32 %v12623_v4, %v7116_v7 }
 0x4c8   : > { %v12261_v44 = vpop.eup %10468  ;;  %v7315_v45 = vmul.f32 1.442695, %v7199_v16 }
 0x4c9   : > { %12624 = vst [vmem:[#allocation2_spill] sm:$0xff] %v12261_v44  ;;  %v12265_v17 = vpop.eup %10470  ;;  %v7317_v61 = vmul.f32 1.442695, %v7200_v27  ;;  %7475 = vadd.xlane.f32.xlu1 %v7474_v13  ;;  %v7131_v54 = vpop.xlane.xlu0 %7130  ;;  %v7489_v49 = vsel %vm6954_vm3, %v12261_v44, 0.0 }
 0x4ca   : > { %12625 = vst [vmem:[#allocation3_spill] sm:$0xff] %v12265_v17  ;;  %10480 = vpow2.f32 %v7315_v45  ;;  %v7205_v20 = vsub.f32 %v12626_v57, %v7131_v54  ;;  %v7134_v25 = vpop.xlane.xlu1 %7133  ;;  %7490 = vadd.xlane.f32.xlu0 %v7489_v49  ;;  %v7492_v4 = vsel %vm6954_vm3, %v12265_v17, 0.0  ;;  %v12630_v54 = vld [vmem:[#allocation10_spill] sm:$0xff]  ;;  %v12631_v57 = vld [vmem:[#allocation11_spill] sm:$0xff] }
 0x4cb   : > { %10482 = vpow2.f32 %v7317_v61  ;;  %v7206_v23 = vsub.f32 %v12627_v21, %v7134_v25 }
 0x4cc   : > { %v12271_v16 = vpop.eup %10472  ;;  %v7327_v7 = vmul.f32 1.442695, %v7205_v20 }
 0x4cd   : > { %12628 = vst [vmem:[#allocation4_spill] sm:$0xff] %v12271_v16  ;;  %v12275_v27 = vpop.eup %10474  ;;  %v7329_v13 = vmul.f32 1.442695, %v7206_v23  ;;  %7493 = vadd.xlane.f32.xlu1 %v7492_v4  ;;  %v7125_v19 = vpop.xlane.xlu0 %7124  ;;  %v7483_v45 = vsel %vm6954_vm3, %v12271_v16, 0.0 }
 0x4ce   : > { %12629 = vst [vmem:[#allocation5_spill] sm:$0xff] %v12275_v27  ;;  %10484 = vpow2.f32 %v7327_v7  ;;  %v7203_v49 = vsub.f32 %v12630_v54, %v7125_v19  ;;  %v7128_v61 = vpop.xlane.xlu1 %7127  ;;  %7484 = vadd.xlane.f32.xlu0 %v7483_v45  ;;  %v7486_v17 = vsel %vm6954_vm3, %v12275_v27, 0.0  ;;  %v12634_v45 = vld [vmem:[#allocation12_spill] sm:$0xff] }
 0x4cf   : > { %10486 = vpow2.f32 %v7329_v13  ;;  %v7204_v25 = vsub.f32 %v12631_v57, %v7128_v61  ;;  %v12635_v57 = vld [vmem:[#allocation13_spill] sm:$0xff] }
 0x4d0   : > { %v12281_v20 = vpop.eup %10476  ;;  %v7323_v21 = vmul.f32 1.442695, %v7203_v49 }
 0x4d1   : > { %12632 = vst [vmem:[#allocation6_spill] sm:$0xff] %v12281_v20  ;;  %v12285_v23 = vpop.eup %10478  ;;  %v7325_v4 = vmul.f32 1.442695, %v7204_v25  ;;  %7487 = vadd.xlane.f32.xlu1 %v7486_v17  ;;  %v7143_v44 = vpop.xlane.xlu0 %7142  ;;  %v7501_v7 = vsel %vm6954_vm3, %v12281_v20, 0.0 }
 0x4d2   : > { %12633 = vst [vmem:[#allocation7_spill] sm:$0xff] %v12285_v23  ;;  %10488 = vpow2.f32 %v7323_v21  ;;  %v7146_v19 = vpop.xlane.xlu1 %7145  ;;  %7502 = vadd.xlane.f32.xlu0 %v7501_v7  ;;  %v7209_v54 = vsub.f32 %v12634_v45, %v7143_v44  ;;  %v7504_v49 = vsel %vm6954_vm3, %v12285_v23, 0.0  ;;  %v12636_v21 = vld [vmem:[#allocation14_spill] sm:$0xff] }
 0x4d3   : > { %10490 = vpow2.f32 %v7325_v4  ;;  %v7210_v25 = vsub.f32 %v12635_v57, %v7146_v19  ;;  %v12637_v4 = vld [vmem:[#allocation15_spill] sm:$0xff] }
 0x4d4   : > { %v12289_v13 = vpop.eup %10480  ;;  %v7335_v44 = vmul.f32 1.442695, %v7209_v54 }
 0x4d5   : > { %v12294_v61 = vpop.eup %10482  ;;  %7505 = vadd.xlane.f32.xlu1 %v7504_v49  ;;  %v7137_v17 = vpop.xlane.xlu0 %7136  ;;  %v7495_v20 = vsel %vm6954_vm3, %v12289_v13, 0.0  ;;  %v7337_v19 = vmul.f32 1.442695, %v7210_v25 }
 0x4d6   : > { %v7207_v27 = vsub.f32 %v12636_v21, %v7137_v17  ;;  %v7140_v7 = vpop.xlane.xlu1 %7139  ;;  %7496 = vadd.xlane.f32.xlu0 %v7495_v20  ;;  %v7498_v23 = vsel %vm6954_vm3, %v12294_v61, 0.0 }
 0x4d7   : > { %v7208_v16 = vsub.f32 %v12637_v4, %v7140_v7 }
 0x4d8   : > { %v12301_v28 = vpop.eup %10484  ;;  %v7331_v45 = vmul.f32 1.442695, %v7207_v27 }
 0x4d9   : > { %v12305_v37 = vpop.eup %10486  ;;  %v7333_v49 = vmul.f32 1.442695, %v7208_v16  ;;  %7499 = vadd.xlane.f32.xlu1 %v7498_v23  ;;  %v7513_v57 = vsel %vm6954_vm3, %v12301_v28, 0.0 }
 0x4da   : > { %10492 = vpow2.f32 %v7331_v45  ;;  %7514 = vadd.xlane.f32.xlu0 %v7513_v57  ;;  %v7516_v27 = vsel %vm6954_vm3, %v12305_v37, 0.0 }
 0x4db   : > { %10494 = vpow2.f32 %v7333_v49 }
 0x4dc   : > { %v12309_v20 = vpop.eup %10488  ;;  %10496 = vpow2.f32 %v7335_v44 }
 0x4dd   : > { %v12313_v54 = vpop.eup %10490  ;;  %10498 = vpow2.f32 %v7337_v19  ;;  %7517 = vadd.xlane.f32.xlu1 %v7516_v27  ;;  %v7507_v16 = vsel %vm6954_vm3, %v12309_v20, 0.0 }
 0x4de   : > { %7508 = vadd.xlane.f32.xlu0 %v7507_v16  ;;  %v7510_v23 = vsel %vm6954_vm3, %v12313_v54, 0.0 }
 0x4e1   : > { %7511 = vadd.xlane.f32.xlu1 %v7510_v23 }
 0x4e4   : > { %v12319_v25 = vpop.eup %10492 }
 0x4e5   : > { %v12321_v17 = vpop.eup %10494  ;;  %v7519_v21 = vsel %vm6954_vm3, %v12319_v25, 0.0 }
 0x4e6   : > { %v12325_v7 = vpop.eup %10496  ;;  %7520 = vadd.xlane.f32.xlu0 %v7519_v21  ;;  %v7522_v4 = vsel %vm6954_vm3, %v12321_v17, 0.0 }
 0x4e7   : > { %v12329_v44 = vpop.eup %10498  ;;  %7523 = vadd.xlane.f32.xlu1 %v7522_v4  ;;  %v7525_v45 = vsel %vm6954_vm3, %v12325_v7, 0.0 }
 0x4e8   : > { %12638 = vst [vmem:[#allocation8_spill] sm:$0xff] %v12329_v44  ;;  %v7528_v19 = vsel %vm6954_vm3, %v12329_v44, 0.0 }
 0x4ea   : > { %7526 = vadd.xlane.f32.xlu0 %v7525_v45 }
 0x4eb   : > { %7529 = vadd.xlane.f32.xlu1 %v7528_v19 }
 0x4f6   : > { %v7347_v49 = vpop.xlane.xlu0 %7346 }
 0x4f7   : > { %10500 = vrcp.f32 %v7347_v49 }
 0x4fa   : > { %v7350_v57 = vpop.xlane.xlu1 %7349  ;;  %v7341_v27 = vpop.xlane.xlu0 %7340 }
 0x4fb   : > { %10502 = vrcp.f32 %v7350_v57 }
 0x4fc   : > { %10504 = vrcp.f32 %v7341_v27 }
 0x4fe   : > { %v7344_v16 = vpop.xlane.xlu1 %7343 }
 0x4ff   : > { %10506 = vrcp.f32 %v7344_v16  ;;  %v7359_v23 = vpop.xlane.xlu0 %7358 }
 0x500   : > { %10508 = vrcp.f32 %v7359_v23 }
 0x501   : > { %v10501_v21 = vpop.eup %10500 }
 0x502   : > { %v7597_v4 = vmul.f32 %v10501_v21, %v12022_v55  ;;  %v7362_v45 = vpop.xlane.xlu1 %7361 }
 0x503   : > { %10510 = vrcp.f32 %v7362_v45  ;;  %v7353_v19 = vpop.xlane.xlu0 %7352 }
 0x504   : > { %7661 = vst.msk [vmem:[%s12340_s8 + $0x10] sm:$0xff] %vm6954_vm3, %v7597_v4  ;;  %10512 = vrcp.f32 %v7353_v19 }
 0x505   : > { %v10503_v49 = vpop.eup %10502 }
 0x506   : > { %v10505_v57 = vpop.eup %10504  ;;  %v7598_v27 = vmul.f32 %v10503_v49, %v12030_v40  ;;  %v7356_v16 = vpop.xlane.xlu1 %7355 }
 0x507   : > { %v7595_v23 = vmul.f32 %v10505_v57, %v12027_v35  ;;  %10514 = vrcp.f32 %v7356_v16  ;;  %v7371_v44 = vpop.xlane.xlu0 %7370 }
 0x508   : > { %7662 = vst.msk [vmem:[%s12340_s8 + $0x18] sm:$0xff] %vm6954_vm3, %v7598_v27  ;;  %10516 = vrcp.f32 %v7371_v44 }
 0x509   : > { %v10507_v55 = vpop.eup %10506  ;;  %7659 = vst.msk [vmem:[%s12340_s8] sm:$0xff] %vm6954_vm3, %v7595_v23 }
 0x50a   : > { %v10509_v21 = vpop.eup %10508  ;;  %v7596_v4 = vmul.f32 %v10507_v55, %v12037_v15  ;;  %v7374_v45 = vpop.xlane.xlu1 %7373 }
 0x50b   : > { %v7601_v19 = vmul.f32 %v10509_v21, %v12041_v62  ;;  %10518 = vrcp.f32 %v7374_v45  ;;  %v7365_v40 = vpop.xlane.xlu0 %7364 }
 0x50c   : > { %7660 = vst.msk [vmem:[%s12340_s8 + $0x8] sm:$0xff] %vm6954_vm3, %v7596_v4  ;;  %10520 = vrcp.f32 %v7365_v40 }
 0x50d   : > { %v10511_v35 = vpop.eup %10510  ;;  %7665 = vst.msk [vmem:[%s12340_s8 + $0x30] sm:$0xff] %vm6954_vm3, %v7601_v19 }
 0x50e   : > { %v10513_v44 = vpop.eup %10512  ;;  %v7602_v49 = vmul.f32 %v10511_v35, %v12045_v53  ;;  %v7368_v57 = vpop.xlane.xlu1 %7367 }
 0x50f   : > { %v7599_v27 = vmul.f32 %v10513_v44, %v12051_v46  ;;  %10522 = vrcp.f32 %v7368_v57  ;;  %v7383_v15 = vpop.xlane.xlu0 %7382 }
 0x510   : > { %7666 = vst.msk [vmem:[%s12340_s8 + $0x38] sm:$0xff] %vm6954_vm3, %v7602_v49  ;;  %10524 = vrcp.f32 %v7383_v15 }
 0x511   : > { %v10515_v62 = vpop.eup %10514  ;;  %7663 = vst.msk [vmem:[%s12340_s8 + $0x20] sm:$0xff] %vm6954_vm3, %v7599_v27 }
 0x512   : > { %v10517_v16 = vpop.eup %10516  ;;  %v7600_v23 = vmul.f32 %v10515_v62, %v12055_v11  ;;  %v7386_v55 = vpop.xlane.xlu1 %7385 }
 0x513   : > { %v7605_v21 = vmul.f32 %v10517_v16, %v12061_v24  ;;  %10526 = vrcp.f32 %v7386_v55  ;;  %v7377_v53 = vpop.xlane.xlu0 %7376 }
 0x514   : > { %7664 = vst.msk [vmem:[%s12340_s8 + $0x28] sm:$0xff] %vm6954_vm3, %v7600_v23  ;;  %10528 = vrcp.f32 %v7377_v53 }
 0x515   : > { %v10519_v46 = vpop.eup %10518  ;;  %7669 = vst.msk [vmem:[%s12340_s8 + $0x50] sm:$0xff] %vm6954_vm3, %v7605_v21 }
 0x516   : > { %v10521_v4 = vpop.eup %10520  ;;  %v7606_v45 = vmul.f32 %v10519_v46, %v12065_v9  ;;  %v7380_v19 = vpop.xlane.xlu1 %7379 }
 0x517   : > { %v7603_v40 = vmul.f32 %v10521_v4, %v12071_v38  ;;  %10530 = vrcp.f32 %v7380_v19  ;;  %v7395_v11 = vpop.xlane.xlu0 %7394 }
 0x518   : > { %7670 = vst.msk [vmem:[%s12340_s8 + $0x58] sm:$0xff] %vm6954_vm3, %v7606_v45  ;;  %10532 = vrcp.f32 %v7395_v11 }
 0x519   : > { %v10523_v24 = vpop.eup %10522  ;;  %7667 = vst.msk [vmem:[%s12340_s8 + $0x40] sm:$0xff] %vm6954_vm3, %v7603_v40 }
 0x51a   : > { %v10525_v35 = vpop.eup %10524  ;;  %v7604_v44 = vmul.f32 %v10523_v24, %v12075_v42  ;;  %v7398_v49 = vpop.xlane.xlu1 %7397 }
 0x51b   : > { %v7609_v57 = vmul.f32 %v10525_v35, %v12081_v50  ;;  %10534 = vrcp.f32 %v7398_v49  ;;  %v7389_v9 = vpop.xlane.xlu0 %7388 }
 0x51c   : > { %7668 = vst.msk [vmem:[%s12340_s8 + $0x48] sm:$0xff] %vm6954_vm3, %v7604_v44  ;;  %10536 = vrcp.f32 %v7389_v9 }
 0x51d   : > { %v10527_v38 = vpop.eup %10526  ;;  %7673 = vst.msk [vmem:[%s12340_s8 + $0x70] sm:$0xff] %vm6954_vm3, %v7609_v57 }
 0x51e   : > { %v10529_v27 = vpop.eup %10528  ;;  %v7610_v15 = vmul.f32 %v10527_v38, %v12085_v31  ;;  %v7392_v62 = vpop.xlane.xlu1 %7391 }
 0x51f   : > { %v7607_v16 = vmul.f32 %v10529_v27, %v12091_v48  ;;  %10538 = vrcp.f32 %v7392_v62  ;;  %v7407_v42 = vpop.xlane.xlu0 %7406 }
 0x520   : > { %7674 = vst.msk [vmem:[%s12340_s8 + $0x78] sm:$0xff] %vm6954_vm3, %v7610_v15  ;;  %10540 = vrcp.f32 %v7407_v42 }
 0x521   : > { %v10531_v50 = vpop.eup %10530  ;;  %7671 = vst.msk [vmem:[%s12340_s8 + $0x60] sm:$0xff] %vm6954_vm3, %v7607_v16 }
 0x522   : > { %v10533_v23 = vpop.eup %10532  ;;  %v7608_v55 = vmul.f32 %v10531_v50, %v12095_v32  ;;  %v7410_v21 = vpop.xlane.xlu1 %7409 }
 0x523   : > { %v7613_v53 = vmul.f32 %v10533_v23, %v12101_v41  ;;  %10542 = vrcp.f32 %v7410_v21  ;;  %v7401_v31 = vpop.xlane.xlu0 %7400 }
 0x524   : > { %7672 = vst.msk [vmem:[%s12340_s8 + $0x68] sm:$0xff] %vm6954_vm3, %v7608_v55  ;;  %10544 = vrcp.f32 %v7401_v31 }
 0x525   : > { %v10535_v48 = vpop.eup %10534  ;;  %7677 = vst.msk [vmem:[%s12340_s8 + $0x90] sm:$0xff] %vm6954_vm3, %v7613_v53 }
 0x526   : > { %v10537_v46 = vpop.eup %10536  ;;  %v7614_v4 = vmul.f32 %v10535_v48, %v12105_v3  ;;  %v7404_v45 = vpop.xlane.xlu1 %7403 }
 0x527   : > { %v7611_v19 = vmul.f32 %v10537_v46, %v12111_v51  ;;  %10546 = vrcp.f32 %v7404_v45  ;;  %v7419_v32 = vpop.xlane.xlu0 %7418 }
 0x528   : > { %7678 = vst.msk [vmem:[%s12340_s8 + $0x98] sm:$0xff] %vm6954_vm3, %v7614_v4  ;;  %10548 = vrcp.f32 %v7419_v32 }
 0x529   : > { %v10539_v41 = vpop.eup %10538  ;;  %7675 = vst.msk [vmem:[%s12340_s8 + $0x80] sm:$0xff] %vm6954_vm3, %v7611_v19 }
 0x52a   : > { %v10541_v40 = vpop.eup %10540  ;;  %v7612_v11 = vmul.f32 %v10539_v41, %v12115_v34  ;;  %v7422_v24 = vpop.xlane.xlu1 %7421 }
 0x52b   : > { %v7617_v35 = vmul.f32 %v10541_v40, %v12121_v33  ;;  %10550 = vrcp.f32 %v7422_v24  ;;  %v7413_v3 = vpop.xlane.xlu0 %7412 }
 0x52c   : > { %7676 = vst.msk [vmem:[%s12340_s8 + $0x88] sm:$0xff] %vm6954_vm3, %v7612_v11  ;;  %10552 = vrcp.f32 %v7413_v3 }
 0x52d   : > { %v10543_v51 = vpop.eup %10542  ;;  %7681 = vst.msk [vmem:[%s12340_s8 + $0xb0] sm:$0xff] %vm6954_vm3, %v7617_v35 }
 0x52e   : > { %v10545_v44 = vpop.eup %10544  ;;  %v7618_v49 = vmul.f32 %v10543_v51, %v12125_v12  ;;  %v7416_v57 = vpop.xlane.xlu1 %7415 }
 0x52f   : > { %v7615_v9 = vmul.f32 %v10545_v44, %v12131_v63  ;;  %10554 = vrcp.f32 %v7416_v57  ;;  %v7431_v34 = vpop.xlane.xlu0 %7430 }
 0x530   : > { %7682 = vst.msk [vmem:[%s12340_s8 + $0xb8] sm:$0xff] %vm6954_vm3, %v7618_v49  ;;  %10556 = vrcp.f32 %v7431_v34 }
 0x531   : > { %v10547_v33 = vpop.eup %10546  ;;  %7679 = vst.msk [vmem:[%s12340_s8 + $0xa0] sm:$0xff] %vm6954_vm3, %v7615_v9 }
 0x532   : > { %v10549_v38 = vpop.eup %10548  ;;  %v7616_v27 = vmul.f32 %v10547_v33, %v12135_v14  ;;  %v7434_v15 = vpop.xlane.xlu1 %7433 }
 0x533   : > { %v7621_v62 = vmul.f32 %v10549_v38, %v12141_v6  ;;  %10558 = vrcp.f32 %v7434_v15  ;;  %v7425_v12 = vpop.xlane.xlu0 %7424 }
 0x534   : > { %7680 = vst.msk [vmem:[%s12340_s8 + $0xa8] sm:$0xff] %vm6954_vm3, %v7616_v27  ;;  %10560 = vrcp.f32 %v7425_v12 }
 0x535   : > { %v10551_v63 = vpop.eup %10550  ;;  %7685 = vst.msk [vmem:[%s12340_s8 + $0xd0] sm:$0xff] %vm6954_vm3, %v7621_v62 }
 0x536   : > { %v10553_v16 = vpop.eup %10552  ;;  %v7622_v42 = vmul.f32 %v10551_v63, %v12145_v59  ;;  %v7428_v50 = vpop.xlane.xlu1 %7427 }
 0x537   : > { %v7619_v23 = vmul.f32 %v10553_v16, %v12151_v43  ;;  %10562 = vrcp.f32 %v7428_v50  ;;  %v7443_v14 = vpop.xlane.xlu0 %7442 }
 0x538   : > { %7686 = vst.msk [vmem:[%s12340_s8 + $0xd8] sm:$0xff] %vm6954_vm3, %v7622_v42  ;;  %10564 = vrcp.f32 %v7443_v14 }
 0x539   : > { %v10555_v6 = vpop.eup %10554  ;;  %7683 = vst.msk [vmem:[%s12340_s8 + $0xc0] sm:$0xff] %vm6954_vm3, %v7619_v23 }
 0x53a   : > { %v10557_v55 = vpop.eup %10556  ;;  %v7620_v21 = vmul.f32 %v10555_v6, %v12155_v5  ;;  %v7446_v53 = vpop.xlane.xlu1 %7445 }
 0x53b   : > { %v7625_v31 = vmul.f32 %v10557_v55, %v12161_v52  ;;  %10566 = vrcp.f32 %v7446_v53  ;;  %v7437_v59 = vpop.xlane.xlu0 %7436  ;;  %v12639_v53 = vld [vmem:[#allocation16_spill] sm:$0xff] }
 0x53c   : > { %7684 = vst.msk [vmem:[%s12340_s8 + $0xc8] sm:$0xff] %vm6954_vm3, %v7620_v21  ;;  %10568 = vrcp.f32 %v7437_v59 }
 0x53d   : > { %v10559_v43 = vpop.eup %10558  ;;  %7689 = vst.msk [vmem:[%s12340_s8 + $0xf0] sm:$0xff] %vm6954_vm3, %v7625_v31 }
 0x53e   : > { %v10561_v48 = vpop.eup %10560  ;;  %v7626_v46 = vmul.f32 %v10559_v43, %v12165_v30  ;;  %v7440_v4 = vpop.xlane.xlu1 %7439  ;;  %v12640_v43 = vld [vmem:[#allocation17_spill] sm:$0xff] }
 0x53f   : > { %v7623_v45 = vmul.f32 %v10561_v48, %v12171_v10  ;;  %10570 = vrcp.f32 %v7440_v4  ;;  %v7455_v5 = vpop.xlane.xlu0 %7454  ;;  %v12641_v4 = vld [vmem:[#allocation18_spill] sm:$0xff] }
 0x540   : > { %7690 = vst.msk [vmem:[%s12340_s8 + $0xf8] sm:$0xff] %vm6954_vm3, %v7626_v46  ;;  %10572 = vrcp.f32 %v7455_v5 }
 0x541   : > { %v10563_v52 = vpop.eup %10562  ;;  %7687 = vst.msk [vmem:[%s12340_s8 + $0xe0] sm:$0xff] %vm6954_vm3, %v7623_v45 }
 0x542   : > { %v10565_v19 = vpop.eup %10564  ;;  %v7624_v32 = vmul.f32 %v10563_v52, %v12175_v8  ;;  %v7458_v41 = vpop.xlane.xlu1 %7457  ;;  %v12642_v52 = vld [vmem:[#allocation2_spill] sm:$0xff] }
 0x543   : > { %v7629_v40 = vmul.f32 %v10565_v19, %v12181_v0  ;;  %10574 = vrcp.f32 %v7458_v41  ;;  %v7449_v30 = vpop.xlane.xlu0 %7448 }
 0x544   : > { %7688 = vst.msk [vmem:[%s12340_s8 + $0xe8] sm:$0xff] %vm6954_vm3, %v7624_v32  ;;  %10576 = vrcp.f32 %v7449_v30  ;;  %v12643_v30 = vld [vmem:[#allocation3_spill] sm:$0xff] }
 0x545   : > { %v10567_v10 = vpop.eup %10566  ;;  %7693 = vst.msk [vmem:[%s12340_s8 + $0x110] sm:$0xff] %vm6954_vm3, %v7629_v40 }
 0x546   : > { %v10569_v11 = vpop.eup %10568  ;;  %v7630_v24 = vmul.f32 %v10567_v10, %v12185_v22  ;;  %v7452_v35 = vpop.xlane.xlu1 %7451 }
 0x547   : > { %v7627_v3 = vmul.f32 %v10569_v11, %v12191_v1  ;;  %10578 = vrcp.f32 %v7452_v35  ;;  %v7467_v8 = vpop.xlane.xlu0 %7466 }
 0x548   : > { %7694 = vst.msk [vmem:[%s12340_s8 + $0x118] sm:$0xff] %vm6954_vm3, %v7630_v24  ;;  %10580 = vrcp.f32 %v7467_v8  ;;  %v12644_v24 = vld [vmem:[#allocation4_spill] sm:$0xff] }
 0x549   : > { %v10571_v0 = vpop.eup %10570  ;;  %7691 = vst.msk [vmem:[%s12340_s8 + $0x100] sm:$0xff] %vm6954_vm3, %v7627_v3 }
 0x54a   : > { %v10573_v51 = vpop.eup %10572  ;;  %v7628_v44 = vmul.f32 %v10571_v0, %v12195_v36  ;;  %v7470_v49 = vpop.xlane.xlu1 %7469 }
 0x54b   : > { %v7633_v57 = vmul.f32 %v10573_v51, %v12201_v2  ;;  %10582 = vrcp.f32 %v7470_v49  ;;  %v7461_v22 = vpop.xlane.xlu0 %7460  ;;  %v12645_v51 = vld [vmem:[#allocation5_spill] sm:$0xff] }
 0x54c   : > { %7692 = vst.msk [vmem:[%s12340_s8 + $0x108] sm:$0xff] %vm6954_vm3, %v7628_v44  ;;  %10584 = vrcp.f32 %v7461_v22 }
 0x54d   : > { %v10575_v1 = vpop.eup %10574  ;;  %7697 = vst.msk [vmem:[%s12340_s8 + $0x130] sm:$0xff] %vm6954_vm3, %v7633_v57  ;;  %v12646_v57 = vld [vmem:[#allocation6_spill] sm:$0xff] }
 0x54e   : > { %v10577_v9 = vpop.eup %10576  ;;  %v7634_v34 = vmul.f32 %v10575_v1, %v12205_v39  ;;  %v7464_v33 = vpop.xlane.xlu1 %7463 }
 0x54f   : > { %v7631_v38 = vmul.f32 %v10577_v9, %v12211_v58  ;;  %10586 = vrcp.f32 %v7464_v33  ;;  %v7479_v36 = vpop.xlane.xlu0 %7478  ;;  %v12647_v33 = vld [vmem:[#allocation7_spill] sm:$0xff] }
 0x550   : > { %7698 = vst.msk [vmem:[%s12340_s8 + $0x138] sm:$0xff] %vm6954_vm3, %v7634_v34  ;;  %10588 = vrcp.f32 %v7479_v36 }
 0x551   : > { %v10579_v2 = vpop.eup %10578  ;;  %7695 = vst.msk [vmem:[%s12340_s8 + $0x120] sm:$0xff] %vm6954_vm3, %v7631_v38 }
 0x552   : > { %v10581_v27 = vpop.eup %10580  ;;  %v7632_v15 = vmul.f32 %v10579_v2, %v12215_v60  ;;  %v7482_v62 = vpop.xlane.xlu1 %7481 }
 0x553   : > { %v7637_v12 = vmul.f32 %v10581_v27, %v12221_v29  ;;  %10590 = vrcp.f32 %v7482_v62  ;;  %v7473_v39 = vpop.xlane.xlu0 %7472 }
 0x554   : > { %7696 = vst.msk [vmem:[%s12340_s8 + $0x128] sm:$0xff] %vm6954_vm3, %v7632_v15  ;;  %10592 = vrcp.f32 %v7473_v39 }
 0x555   : > { %v10583_v58 = vpop.eup %10582  ;;  %7701 = vst.msk [vmem:[%s12340_s8 + $0x150] sm:$0xff] %vm6954_vm3, %v7637_v12 }
 0x556   : > { %v10585_v63 = vpop.eup %10584  ;;  %v7638_v16 = vmul.f32 %v10583_v58, %v12225_v26  ;;  %v7476_v42 = vpop.xlane.xlu1 %7475 }
 0x557   : > { %v7635_v50 = vmul.f32 %v10585_v63, %v12231_v18  ;;  %10594 = vrcp.f32 %v7476_v42  ;;  %v7491_v60 = vpop.xlane.xlu0 %7490 }
 0x558   : > { %7702 = vst.msk [vmem:[%s12340_s8 + $0x158] sm:$0xff] %vm6954_vm3, %v7638_v16  ;;  %10596 = vrcp.f32 %v7491_v60 }
 0x559   : > { %v10587_v29 = vpop.eup %10586  ;;  %7699 = vst.msk [vmem:[%s12340_s8 + $0x140] sm:$0xff] %vm6954_vm3, %v7635_v50 }
 0x55a   : > { %v10589_v23 = vpop.eup %10588  ;;  %v7636_v14 = vmul.f32 %v10587_v29, %v12235_v56  ;;  %v7494_v6 = vpop.xlane.xlu1 %7493 }
 0x55b   : > { %v7641_v55 = vmul.f32 %v10589_v23, %v12241_v47  ;;  %10598 = vrcp.f32 %v7494_v6  ;;  %v7485_v26 = vpop.xlane.xlu0 %7484 }
 0x55c   : > { %7700 = vst.msk [vmem:[%s12340_s8 + $0x148] sm:$0xff] %vm6954_vm3, %v7636_v14  ;;  %10600 = vrcp.f32 %v7485_v26  ;;  %v12648_v26 = vld [vmem:[#allocation8_spill] sm:$0xff] }
 0x55d   : > { %v10591_v18 = vpop.eup %10590  ;;  %7705 = vst.msk [vmem:[%s12340_s8 + $0x170] sm:$0xff] %vm6954_vm3, %v7641_v55 }
 0x55e   : > { %v10593_v21 = vpop.eup %10592  ;;  %v7642_v31 = vmul.f32 %v10591_v18, %v12639_v53  ;;  %v7488_v59 = vpop.xlane.xlu1 %7487 }
 0x55f   : > { %v7639_v48 = vmul.f32 %v10593_v21, %v12640_v43  ;;  %10602 = vrcp.f32 %v7488_v59  ;;  %v7503_v56 = vpop.xlane.xlu0 %7502 }
 0x560   : > { %7706 = vst.msk [vmem:[%s12340_s8 + $0x178] sm:$0xff] %vm6954_vm3, %v7642_v31  ;;  %10604 = vrcp.f32 %v7503_v56 }
 0x561   : > { %v10595_v47 = vpop.eup %10594  ;;  %7703 = vst.msk [vmem:[%s12340_s8 + $0x160] sm:$0xff] %vm6954_vm3, %v7639_v48 }
 0x562   : > { %v10597_v46 = vpop.eup %10596  ;;  %v7640_v45 = vmul.f32 %v10595_v47, %v12641_v4  ;;  %v7506_v5 = vpop.xlane.xlu1 %7505 }
 0x563   : > { %v7645_v19 = vmul.f32 %v10597_v46, %v12642_v52  ;;  %10606 = vrcp.f32 %v7506_v5  ;;  %v7497_v32 = vpop.xlane.xlu0 %7496 }
 0x564   : > { %7704 = vst.msk [vmem:[%s12340_s8 + $0x168] sm:$0xff] %vm6954_vm3, %v7640_v45  ;;  %10608 = vrcp.f32 %v7497_v32 }
 0x565   : > { %v10599_v41 = vpop.eup %10598  ;;  %7709 = vst.msk [vmem:[%s12340_s8 + $0x190] sm:$0xff] %vm6954_vm3, %v7645_v19 }
 0x566   : > { %v10601_v40 = vpop.eup %10600  ;;  %v7646_v10 = vmul.f32 %v10599_v41, %v12643_v30  ;;  %v7500_v11 = vpop.xlane.xlu1 %7499 }
 0x567   : > { %v7643_v35 = vmul.f32 %v10601_v40, %v12644_v24  ;;  %10610 = vrcp.f32 %v7500_v11  ;;  %v7515_v3 = vpop.xlane.xlu0 %7514 }
 0x568   : > { %7710 = vst.msk [vmem:[%s12340_s8 + $0x198] sm:$0xff] %vm6954_vm3, %v7646_v10  ;;  %10612 = vrcp.f32 %v7515_v3 }
 0x569   : > { %v10603_v8 = vpop.eup %10602  ;;  %7707 = vst.msk [vmem:[%s12340_s8 + $0x180] sm:$0xff] %vm6954_vm3, %v7643_v35 }
 0x56a   : > { %v10605_v0 = vpop.eup %10604  ;;  %v7644_v44 = vmul.f32 %v10603_v8, %v12645_v51  ;;  %v7518_v49 = vpop.xlane.xlu1 %7517 }
 0x56b   : > { %v7649_v22 = vmul.f32 %v10605_v0, %v12646_v57  ;;  %10614 = vrcp.f32 %v7518_v49  ;;  %v7509_v1 = vpop.xlane.xlu0 %7508 }
 0x56c   : > { %7708 = vst.msk [vmem:[%s12340_s8 + $0x188] sm:$0xff] %vm6954_vm3, %v7644_v44  ;;  %10616 = vrcp.f32 %v7509_v1 }
 0x56d   : > { %v10607_v9 = vpop.eup %10606  ;;  %7713 = vst.msk [vmem:[%s12340_s8 + $0x1b0] sm:$0xff] %vm6954_vm3, %v7649_v22 }
 0x56e   : > { %v10609_v34 = vpop.eup %10608  ;;  %v7650_v38 = vmul.f32 %v10607_v9, %v12647_v33  ;;  %v7512_v36 = vpop.xlane.xlu1 %7511 }
 0x56f   : > { %v7647_v2 = vmul.f32 %v10609_v34, %v12289_v13  ;;  %10618 = vrcp.f32 %v7512_v36 }
 0x570   : > { %7714 = vst.msk [vmem:[%s12340_s8 + $0x1b8] sm:$0xff] %vm6954_vm3, %v7650_v38 }
 0x571   : > { %v10611_v27 = vpop.eup %10610  ;;  %7711 = vst.msk [vmem:[%s12340_s8 + $0x1a0] sm:$0xff] %vm6954_vm3, %v7647_v2 }
 0x572   : > { %v10613_v15 = vpop.eup %10612  ;;  %v7648_v62 = vmul.f32 %v10611_v27, %v12294_v61 }
 0x573   : > { %v7653_v12 = vmul.f32 %v10613_v15, %v12301_v28  ;;  %v7521_v39 = vpop.xlane.xlu0 %7520 }
 0x574   : > { %7712 = vst.msk [vmem:[%s12340_s8 + $0x1a8] sm:$0xff] %vm6954_vm3, %v7648_v62  ;;  %10620 = vrcp.f32 %v7521_v39  ;;  %v7524_v58 = vpop.xlane.xlu1 %7523 }
 0x575   : > { %v10615_v13 = vpop.eup %10614  ;;  %7717 = vst.msk [vmem:[%s12340_s8 + $0x1d0] sm:$0xff] %vm6954_vm3, %v7653_v12  ;;  %10622 = vrcp.f32 %v7524_v58 }
 0x576   : > { %v10617_v63 = vpop.eup %10616  ;;  %v7654_v16 = vmul.f32 %v10615_v13, %v12305_v37 }
 0x577   : > { %v7651_v42 = vmul.f32 %v10617_v63, %v12309_v20  ;;  %v7527_v61 = vpop.xlane.xlu0 %7526 }
 0x578   : > { %7718 = vst.msk [vmem:[%s12340_s8 + $0x1d8] sm:$0xff] %vm6954_vm3, %v7654_v16  ;;  %10624 = vrcp.f32 %v7527_v61  ;;  %v7530_v28 = vpop.xlane.xlu1 %7529 }
 0x579   : > { %v10619_v50 = vpop.eup %10618  ;;  %7715 = vst.msk [vmem:[%s12340_s8 + $0x1c0] sm:$0xff] %vm6954_vm3, %v7651_v42  ;;  %10626 = vrcp.f32 %v7530_v28 }
 0x57a   : > { %v7652_v60 = vmul.f32 %v10619_v50, %v12313_v54 }
 0x57c   : > { %7716 = vst.msk [vmem:[%s12340_s8 + $0x1c8] sm:$0xff] %vm6954_vm3, %v7652_v60 }
 0x57e   : > { %v10621_v29 = vpop.eup %10620 }
 0x57f   : > { %v10623_v37 = vpop.eup %10622  ;;  %v7655_v20 = vmul.f32 %v10621_v29, %v12319_v25 }
 0x580   : > { %v7656_v23 = vmul.f32 %v10623_v37, %v12321_v17 }
 0x581   : > { %7719 = vst.msk [vmem:[%s12340_s8 + $0x1e0] sm:$0xff] %vm6954_vm3, %v7655_v20 }
 0x582   : > { %v10625_v14 = vpop.eup %10624  ;;  %7720 = vst.msk [vmem:[%s12340_s8 + $0x1e8] sm:$0xff] %vm6954_vm3, %v7656_v23 }
 0x583   : > { %v10627_v6 = vpop.eup %10626  ;;  %v7657_v55 = vmul.f32 %v10625_v14, %v12325_v7 }
 0x584   : > { %v7658_v18 = vmul.f32 %v10627_v6, %v12648_v26 }
 0x585   : > { %7721 = vst.msk [vmem:[%s12340_s8 + $0x1f0] sm:$0xff] %vm6954_vm3, %v7657_v55 }
 0x586   : > { %7722 = vst.msk [vmem:[%s12340_s8 + $0x1f8] sm:$0xff] %vm6954_vm3, %v7658_v18 }
 0x587 PF: > { %s15_s18 = sadd.s32 1, %s10634_s18  }
 0x588   : > { %p12_p4 = scmp.ge.s32.totalorder %s15_s18, 9  }
 0x58a   :  { %14 = sbr.rel (!%p12_p4) target bundleno = 1 (0x1), region = 84 }

</bundles_post_ra>
